<compile_context>
chip_gen: v7x
topology: tpu7x:2x2x1
jax: 0.10.0
libtpu: 0.0.40
codegen_flags: <defaults>
</compile_context>

<pallas_src>
import functools

import jax
import jax.numpy as jnp
from jax.experimental import pallas as pl
from jax.experimental.pallas import tpu as pltpu

BN_EPS = 1e-5
CHANNEL_MULT = 16
FC_DIM = 512
C1 = CHANNEL_MULT * 4   # 64
C2 = CHANNEL_MULT * 2   # 32
C3 = CHANNEL_MULT * 1   # 16
HW1 = 16                # conv1 output spatial positions (4 x 4)
MAX_TAPS = 4            # a stride-2 ConvT output phase touches at most 4 taps

# Per-output-phase kernel taps of a stride-2 / pad-1 ConvTranspose along one
# axis: {K: {phase: ((k_index, input_shift), ...)}}.  Output index o = 2a+phase
# reads input index a + shift with weight tap k_index (out of range -> zero).
PHASE_TAPS = {
    3: {0: ((1, 0),), 1: ((0, 1), (2, 0))},
    4: {0: ((1, 0), (3, -1)), 1: ((0, 1), (2, 0))},
}

_CP = pltpu.CompilerParams(
    dimension_semantics=("arbitrary",),
    vmem_limit_bytes=32 * 1024 * 1024,
)


# --------------------------------------------------------------------------
# Pallas kernels
# --------------------------------------------------------------------------
def fc_conv1_kernel(x_ref, fcw_ref, fcg_ref, fcb_ref,
                    w1_ref, foldm_ref, foldb_ref, c1g_ref, c1b_ref, o_ref):
    # ---- fc: Linear (bias omitted: cancelled exactly by train-mode BN) ----
    h = jnp.dot(x_ref[...].astype(jnp.bfloat16), fcw_ref[...],
                preferred_element_type=jnp.float32)               # (B, 512)
    m = jnp.mean(h, axis=0, keepdims=True)
    v = jnp.mean(h * h, axis=0, keepdims=True) - m * m            # biased var
    h = fcg_ref[...] * (h - m) * jax.lax.rsqrt(v + BN_EPS) + fcb_ref[...]
    h = jnp.maximum(h, 0.0)

    # ---- conv1 (ConvT 512->64, k4, s1, p0 on 1x1 input) as a direct GEMM ----
    # column layout of y is NHWC-flat: col = (kh*4 + kw) * 64 + co
    y = jnp.dot(h.astype(jnp.bfloat16), w1_ref[...],
                preferred_element_type=jnp.float32)               # (B, 1024)

    # Per-channel BN stats via constant fold matmuls, batched into 2 GEMMs:
    # [mean; meansq] (2,1024) @ foldm (1024,64) and [scale; shift] @ foldb.
    mom = jnp.concatenate([jnp.mean(y, axis=0, keepdims=True),
                           jnp.mean(y * y, axis=0, keepdims=True)], axis=0)
    ch = jnp.dot(mom, foldm_ref[...], preferred_element_type=jnp.float32)  # (2, 64)
    chm = ch[0:1]
    var = ch[1:2] - chm * chm
    scale = c1g_ref[...] * jax.lax.rsqrt(var + BN_EPS)            # (1, 64)
    shift = c1b_ref[...] - chm * scale                            # (1, 64)
    ss = jnp.concatenate([scale, shift], axis=0)                  # (2, 64)
    ssf = jnp.dot(ss, foldb_ref[...], preferred_element_type=jnp.float32)  # (2, 1024)
    o_ref[...] = jnp.maximum(y * ssf[0:1] + ssf[1:2], 0.0).astype(o_ref.dtype)


def conv_bn_relu_kernel(p_ref, w_ref, g_ref, b_ref, o_ref, *, inv_n):
    # p_ref: (4, K, N) bf16 phase patches (zero-padded), w_ref: (4, C, K) bf16,
    # g_ref/b_ref: (C, 1) f32, o_ref: (4, C, N) bf16.  Lane-dense (N on lanes).
    ys = []
    s = None
    sq = None
    for p in range(4):
        y = jnp.dot(w_ref[p, :, :], p_ref[p, :, :],
                    preferred_element_type=jnp.float32)           # (C, N)
        ys.append(y)
        ps = jnp.sum(y, axis=1, keepdims=True)                    # lane reduce
        pq = jnp.sum(y * y, axis=1, keepdims=True)
        s = ps if s is None else s + ps
        sq = pq if sq is None else sq + pq
    # one-pass biased batch stats; zero-padded positions contribute exactly 0
    mean = s * inv_n
    var = sq * inv_n - mean * mean
    scale = g_ref[...] * jax.lax.rsqrt(var + BN_EPS)              # (C, 1)
    shift = b_ref[...] - mean * scale                             # (C, 1)
    for p in range(4):
        o_ref[p, :, :] = jnp.maximum(ys[p] * scale + shift, 0.0).astype(o_ref.dtype)


def conv_sigmoid_kernel(p_ref, w_ref, o_ref):
    # p_ref: (4, K, N) bf16, w_ref: (4, 1, K) bf16, o_ref: (4, 1, N) f32
    for p in range(4):
        y = jnp.dot(w_ref[p, :, :], p_ref[p, :, :],
                    preferred_element_type=jnp.float32)           # (1, N)
        o_ref[p, :, :] = 1.0 / (1.0 + jnp.exp(-y))                # exact sigmoid


# --------------------------------------------------------------------------
# pallas_call wrappers (whole-array blocks; everything fits VMEM easily)
# --------------------------------------------------------------------------
def fc_conv1(x, pk):
    B, E = x.shape
    return pl.pallas_call(
        fc_conv1_kernel,
        out_shape=jax.ShapeDtypeStruct((B, HW1 * C1), jnp.bfloat16),
        grid=(1,),
        in_specs=[
            pl.BlockSpec((B, E), lambda i: (0, 0)),
            pl.BlockSpec((E, FC_DIM), lambda i: (0, 0)),
            pl.BlockSpec((1, FC_DIM), lambda i: (0, 0)),
            pl.BlockSpec((1, FC_DIM), lambda i: (0, 0)),
            pl.BlockSpec((FC_DIM, HW1 * C1), lambda i: (0, 0)),
            pl.BlockSpec((HW1 * C1, C1), lambda i: (0, 0)),
            pl.BlockSpec((C1, HW1 * C1), lambda i: (0, 0)),
            pl.BlockSpec((1, C1), lambda i: (0, 0)),
            pl.BlockSpec((1, C1), lambda i: (0, 0)),
        ],
        out_specs=pl.BlockSpec((B, HW1 * C1), lambda i: (0, 0)),
        compiler_params=_CP,
    )(x, pk["fc_w"], pk["fc_gamma"], pk["fc_beta"],
      pk["w1_mat"], pk["fold_mean"], pk["fold_bcast"],
      pk["bn1_gamma"], pk["bn1_beta"])


def conv_bn_relu(patches, w_ph, gamma, beta, *, inv_n):
    P, K, N = patches.shape
    C = w_ph.shape[1]
    return pl.pallas_call(
        functools.partial(conv_bn_relu_kernel, inv_n=inv_n),
        out_shape=jax.ShapeDtypeStruct((P, C, N), jnp.bfloat16),
        grid=(1,),
        in_specs=[
            pl.BlockSpec((P, K, N), lambda i: (0, 0, 0)),
            pl.BlockSpec((P, C, K), lambda i: (0, 0, 0)),
            pl.BlockSpec((C, 1), lambda i: (0, 0)),
            pl.BlockSpec((C, 1), lambda i: (0, 0)),
        ],
        out_specs=pl.BlockSpec((P, C, N), lambda i: (0, 0, 0)),
        compiler_params=_CP,
    )(patches, w_ph, gamma, beta)


def conv_sigmoid(patches, w_ph):
    P, K, N = patches.shape
    return pl.pallas_call(
        conv_sigmoid_kernel,
        out_shape=jax.ShapeDtypeStruct((P, 1, N), jnp.float32),
        grid=(1,),
        in_specs=[
            pl.BlockSpec((P, K, N), lambda i: (0, 0, 0)),
            pl.BlockSpec((P, 1, K), lambda i: (0, 0, 0)),
        ],
        out_specs=pl.BlockSpec((P, 1, N), lambda i: (0, 0, 0)),
        compiler_params=_CP,
    )(patches, w_ph)


# --------------------------------------------------------------------------
# XLA glue: phase (sub-pixel) decomposition of the stride-2 transposed convs.
# No zero dilation -- only real input values are gathered.
# --------------------------------------------------------------------------
def _phase_size(n, k, ph):
    if k == 3:
        return n if ph == 0 else n - 1
    return n  # k == 4


def _shift(x, d, axis):
    """result[i] = x[i + d] along `axis`, zero-filled where out of range."""
    if d == 0:
        return x
    n = x.shape[axis]
    pad = [(0, 0)] * x.ndim
    idx = [slice(None)] * x.ndim
    if d > 0:
        pad[axis] = (0, d)
        idx[axis] = slice(d, d + n)
    else:
        pad[axis] = (-d, 0)
        idx[axis] = slice(0, n)
    return jnp.pad(x, pad)[tuple(idx)]


def build_phase_patches(x, k):
    """x: (B, H, W, C) NHWC -> (4, MAX_TAPS*C, B*maxR*maxC) channel-major
    per-output-phase patches (zero padded), ready for a transposed GEMM."""
    B, H, W, C = x.shape
    max_r = max(_phase_size(H, k, 0), _phase_size(H, k, 1))
    max_c = max(_phase_size(W, k, 0), _phase_size(W, k, 1))
    phases = []
    for ph_h in (0, 1):
        for ph_w in (0, 1):
            n_r = _phase_size(H, k, ph_h)
            n_c = _phase_size(W, k, ph_w)
            slabs = []
            for _, dh in PHASE_TAPS[k][ph_h]:
                xh = _shift(x, dh, 1)
                for _, dw in PHASE_TAPS[k][ph_w]:
                    slabs.append(_shift(xh, dw, 2)[:, :n_r, :n_c, :])
            p = jnp.concatenate(slabs, axis=-1)                   # (B, nR, nC, T*C)
            p = jnp.pad(p, ((0, 0), (0, max_r - n_r), (0, max_c - n_c),
                            (0, MAX_TAPS * C - p.shape[-1])))
            phases.append(p.transpose(3, 0, 1, 2).reshape(MAX_TAPS * C, -1))
    return jnp.stack(phases, axis=0)


def interleave_phases(y, B, H, W, k, C):
    """y: (4, C, B*maxR*maxC) phase-separated -> (B, Ho, Wo, C) NHWC."""
    Ho = 2 * H - (1 if k == 3 else 0)
    Wo = 2 * W - (1 if k == 3 else 0)
    max_r = max(_phase_size(H, k, 0), _phase_size(H, k, 1))
    max_c = max(_phase_size(W, k, 0), _phase_size(W, k, 1))
    out = jnp.zeros((B, Ho, Wo, C), y.dtype)
    p = 0
    for ph_h in (0, 1):
        for ph_w in (0, 1):
            n_r = _phase_size(H, k, ph_h)
            n_c = _phase_size(W, k, ph_w)
            blk = (y[p].reshape(C, B, max_r, max_c)[:, :, :n_r, :n_c]
                   .transpose(1, 2, 3, 0))
            out = out.at[:, ph_h::2, ph_w::2, :].set(blk)
            p += 1
    return out


# --------------------------------------------------------------------------
# One-time parameter packing (outside the jitted forward)
# --------------------------------------------------------------------------
def pack_phase_weights(w, k):
    """PyTorch ConvTranspose2d weight (Ci, Co, K, K) -> (4, Co, MAX_TAPS*Ci)
    bf16 per-output-phase GEMM matrices (row order matches build_phase_patches)."""
    ci = w.shape[0]
    mats = []
    for ph_h in (0, 1):
        for ph_w in (0, 1):
            blocks = [w[:, :, kh, kw].T
                      for kh, _ in PHASE_TAPS[k][ph_h]
                      for kw, _ in PHASE_TAPS[k][ph_w]]
            m = jnp.concatenate(blocks, axis=1)                   # (Co, T*Ci)
            m = jnp.pad(m, ((0, 0), (0, MAX_TAPS * ci - m.shape[1])))
            mats.append(m)
    return jnp.stack(mats, axis=0).astype(jnp.bfloat16)


def pack_params(params):
    cols = jnp.arange(HW1 * C1) % C1
    fold_mean = (cols[:, None] == jnp.arange(C1)[None, :]).astype(jnp.float32) / HW1
    fold_bcast = (jnp.arange(C1)[:, None] == cols[None, :]).astype(jnp.float32)
    return {
        "fc_w": params["fc_w"].astype(jnp.bfloat16),
        "fc_gamma": params["fc_gamma"].reshape(1, -1).astype(jnp.float32),
        "fc_beta": params["fc_beta"].reshape(1, -1).astype(jnp.float32),
        # conv1: (Ci, Co, Kh, Kw) -> (Ci, (kh, kw, co)) direct-GEMM matrix
        "w1_mat": params["w1"].transpose(0, 2, 3, 1).reshape(FC_DIM, HW1 * C1)
                              .astype(jnp.bfloat16),
        "fold_mean": fold_mean,            # (1024, 64) f32
        "fold_bcast": fold_bcast,          # (64, 1024) f32
        "bn1_gamma": params["bn1_gamma"].reshape(1, -1).astype(jnp.float32),
        "bn1_beta": params["bn1_beta"].reshape(1, -1).astype(jnp.float32),
        "w2_ph": pack_phase_weights(params["w2"], 3),              # (4, 32, 256)
        "bn2_gamma": params["bn2_gamma"].reshape(-1, 1).astype(jnp.float32),
        "bn2_beta": params["bn2_beta"].reshape(-1, 1).astype(jnp.float32),
        "w3_ph": pack_phase_weights(params["w3"], 4),              # (4, 16, 128)
        "bn3_gamma": params["bn3_gamma"].reshape(-1, 1).astype(jnp.float32),
        "bn3_beta": params["bn3_beta"].reshape(-1, 1).astype(jnp.float32),
        "w4_ph": pack_phase_weights(params["w4"], 4),              # (4, 1, 64)
    }


# --------------------------------------------------------------------------
# CNN_Decoder parameters & forward (data_size = (1, 28, 28))
# --------------------------------------------------------------------------
def init_params(key, embedding_size):
    keys = jax.random.split(key, 12)
    scale = 0.05

    def normal(k, shape):
        return scale * jax.random.normal(k, shape, jnp.float32)

    # NOTE: the nn.Linear bias is intentionally omitted -- a per-feature bias
    # right before training-mode BatchNorm1d is exactly cancelled by the mean
    # subtraction, so the forward output is unchanged.
    return {
        "fc_w": normal(keys[0], (embedding_size, FC_DIM)),
        "fc_gamma": 1.0 + 0.1 * jax.random.normal(keys[2], (FC_DIM,), jnp.float32),
        "fc_beta": 0.1 * jax.random.normal(keys[3], (FC_DIM,), jnp.float32),
        # ConvTranspose2d weights in PyTorch layout (Cin, Cout, Kh, Kw)
        "w1": normal(keys[4], (FC_DIM, C1, 4, 4)),
        "bn1_gamma": 1.0 + 0.1 * jax.random.normal(keys[5], (C1,), jnp.float32),
        "bn1_beta": 0.1 * jax.random.normal(keys[5], (C1,), jnp.float32),
        "w2": normal(keys[6], (C1, C2, 3, 3)),
        "bn2_gamma": 1.0 + 0.1 * jax.random.normal(keys[7], (C2,), jnp.float32),
        "bn2_beta": 0.1 * jax.random.normal(keys[7], (C2,), jnp.float32),
        "w3": normal(keys[8], (C2, C3, 4, 4)),
        "bn3_gamma": 1.0 + 0.1 * jax.random.normal(keys[9], (C3,), jnp.float32),
        "bn3_beta": 0.1 * jax.random.normal(keys[9], (C3,), jnp.float32),
        "w4": normal(keys[10], (C3, 1, 4, 4)),
    }


@jax.jit
def cnn_decoder_forward(packed, x):
    """x: (B, embedding_size) -> (B, 1, 28, 28)"""
    B = x.shape[0]

    # fc (Linear+BN1d+ReLU) fused with conv1 (direct GEMM + BN2d + ReLU)
    h = fc_conv1(x, packed)                         # (B, 1024) bf16, NHWC-flat
    x1 = h.reshape(B, 4, 4, C1)                     # (B, 4, 4, 64)

    # ConvT(64->32, k3, s2, p1) + BN + ReLU         -> (B, 7, 7, 32)
    p2 = build_phase_patches(x1, 3)                 # (4, 256, B*16)
    y2 = conv_bn_relu(p2, packed["w2_ph"], packed["bn2_gamma"],
                      packed["bn2_beta"], inv_n=1.0 / (B * 49))
    x2 = interleave_phases(y2, B, 4, 4, 3, C2)

    # ConvT(32->16, k4, s2, p1) + BN + ReLU         -> (B, 14, 14, 16)
    p3 = build_phase_patches(x2, 4)                 # (4, 128, B*49)
    y3 = conv_bn_relu(p3, packed["w3_ph"], packed["bn3_gamma"],
                      packed["bn3_beta"], inv_n=1.0 / (B * 196))
    x3 = interleave_phases(y3, B, 7, 7, 4, C3)

    # ConvT(16->1, k4, s2, p1) + Sigmoid            -> (B, 1, 28, 28)
    p4 = build_phase_patches(x3, 4)                 # (4, 64, B*196)
    y4 = conv_sigmoid(p4, packed["w4_ph"])          # (4, 1, B*196) f32
    img = interleave_phases(y4, B, 14, 14, 4, 1)    # (B, 28, 28, 1)
    return img.reshape(B, 1, 28, 28)


if __name__ == "__main__":
    key = jax.random.PRNGKey(0)
    k_param, k_x = jax.random.split(key)

    embedding_size = 32
    batch = 2
    params = init_params(k_param, embedding_size)
    packed = pack_params(params)                    # one-time packing, outside jit
    x = jax.random.normal(k_x, (batch, embedding_size), jnp.float32)

    out = cnn_decoder_forward(packed, x)
    out = jax.block_until_ready(out)

    assert out.shape == (batch, 1, 28, 28), out.shape
    assert bool(jnp.all(jnp.isfinite(out)))
    assert bool(jnp.all((out >= 0.0) & (out <= 1.0)))   # exact sigmoid range
    print("KERNEL_OK")
</pallas_src>

<mosaic_0001>
module attributes {stable_mosaic.version = 11 : i64} {
  func.func @fc_conv1_kernel(%arg0: i32, %arg1: memref<2x32xf32, #tpu.memory_space<vmem>>, %arg2: memref<32x512xbf16, #tpu.memory_space<vmem>>, %arg3: memref<1x512xf32, #tpu.memory_space<vmem>>, %arg4: memref<1x512xf32, #tpu.memory_space<vmem>>, %arg5: memref<512x1024xbf16, #tpu.memory_space<vmem>>, %arg6: memref<1024x64xf32, #tpu.memory_space<vmem>>, %arg7: memref<64x1024xf32, #tpu.memory_space<vmem>>, %arg8: memref<1x64xf32, #tpu.memory_space<vmem>>, %arg9: memref<1x64xf32, #tpu.memory_space<vmem>>, %arg10: memref<2x1024xbf16, #tpu.memory_space<vmem>>) attributes {dimension_semantics = [#tpu.dimension_semantics<arbitrary>], iteration_bounds = array<i64: 1>, scalar_prefetch = 0 : i64, scratch_operands = 0 : i64, tpu.core_type = #tpu.core_type<tc>, window_params = [{pipeline_mode = #tpu.pipeline_mode<synchronous>, transform_indices = @transform_0, window_bounds = array<i64: 2, 32>}, {pipeline_mode = #tpu.pipeline_mode<synchronous>, transform_indices = @transform_1, window_bounds = array<i64: 32, 512>}, {pipeline_mode = #tpu.pipeline_mode<synchronous>, transform_indices = @transform_2, window_bounds = array<i64: 1, 512>}, {pipeline_mode = #tpu.pipeline_mode<synchronous>, transform_indices = @transform_3, window_bounds = array<i64: 1, 512>}, {pipeline_mode = #tpu.pipeline_mode<synchronous>, transform_indices = @transform_4, window_bounds = array<i64: 512, 1024>}, {pipeline_mode = #tpu.pipeline_mode<synchronous>, transform_indices = @transform_5, window_bounds = array<i64: 1024, 64>}, {pipeline_mode = #tpu.pipeline_mode<synchronous>, transform_indices = @transform_6, window_bounds = array<i64: 64, 1024>}, {pipeline_mode = #tpu.pipeline_mode<synchronous>, transform_indices = @transform_7, window_bounds = array<i64: 1, 64>}, {pipeline_mode = #tpu.pipeline_mode<synchronous>, transform_indices = @transform_8, window_bounds = array<i64: 1, 64>}, {pipeline_mode = #tpu.pipeline_mode<synchronous>, transform_indices = @transform_9, window_bounds = array<i64: 2, 1024>}]} {
    %c0 = arith.constant 0 : index
    %c0_0 = arith.constant 0 : index
    %0 = vector.load %arg1[%c0, %c0_0] : memref<2x32xf32, #tpu.memory_space<vmem>>, vector<2x32xf32>
    %1 = arith.truncf %0 : vector<2x32xf32> to vector<2x32xbf16>
    %c0_1 = arith.constant 0 : index
    %c0_2 = arith.constant 0 : index
    %2 = vector.load %arg2[%c0_1, %c0_2] : memref<32x512xbf16, #tpu.memory_space<vmem>>, vector<32x512xbf16>
    %cst = arith.constant dense<0.000000e+00> : vector<2x512xf32>
    %3 = tpu.matmul %1, %2, %cst {dimension_numbers = #tpu.dot_dimension_numbers<[1], [0], [0], [1], [0, 0, 1, 1], [], []>} : vector<2x32xbf16>, vector<32x512xbf16>, vector<2x512xf32> -> vector<2x512xf32>
    %cst_3 = arith.constant dense<0.000000e+00> : vector<512xf32>
    %4 = vector.multi_reduction <add>, %3, %cst_3 [0] : vector<2x512xf32> to vector<512xf32>
    %5 = vector.shape_cast %4 : vector<512xf32> to vector<1x512xf32>
    %cst_4 = arith.constant 2.000000e+00 : f32
    %6 = vector.broadcast %cst_4 : f32 to vector<1x512xf32>
    %7 = arith.divf %5, %6 : vector<1x512xf32>
    %8 = arith.mulf %3, %3 : vector<2x512xf32>
    %cst_5 = arith.constant dense<0.000000e+00> : vector<512xf32>
    %9 = vector.multi_reduction <add>, %8, %cst_5 [0] : vector<2x512xf32> to vector<512xf32>
    %10 = vector.shape_cast %9 : vector<512xf32> to vector<1x512xf32>
    %cst_6 = arith.constant 2.000000e+00 : f32
    %11 = vector.broadcast %cst_6 : f32 to vector<1x512xf32>
    %12 = arith.divf %10, %11 : vector<1x512xf32>
    %13 = arith.mulf %7, %7 : vector<1x512xf32>
    %14 = arith.subf %12, %13 : vector<1x512xf32>
    %c0_7 = arith.constant 0 : index
    %c0_8 = arith.constant 0 : index
    %15 = vector.load %arg3[%c0_7, %c0_8] : memref<1x512xf32, #tpu.memory_space<vmem>>, vector<1x512xf32>
    %16 = vector.broadcast %7 : vector<1x512xf32> to vector<2x512xf32>
    %17 = arith.subf %3, %16 : vector<2x512xf32>
    %18 = vector.broadcast %15 : vector<1x512xf32> to vector<2x512xf32>
    %19 = arith.mulf %18, %17 : vector<2x512xf32>
    %cst_9 = arith.constant 9.99999974E-6 : f32
    %20 = vector.broadcast %cst_9 : f32 to vector<1x512xf32>
    %21 = arith.addf %14, %20 : vector<1x512xf32>
    %22 = math.rsqrt %21 : vector<1x512xf32>
    %23 = vector.broadcast %22 : vector<1x512xf32> to vector<2x512xf32>
    %24 = arith.mulf %19, %23 : vector<2x512xf32>
    %c0_10 = arith.constant 0 : index
    %c0_11 = arith.constant 0 : index
    %25 = vector.load %arg4[%c0_10, %c0_11] : memref<1x512xf32, #tpu.memory_space<vmem>>, vector<1x512xf32>
    %26 = vector.broadcast %25 : vector<1x512xf32> to vector<2x512xf32>
    %27 = arith.addf %24, %26 : vector<2x512xf32>
    %cst_12 = arith.constant 0.000000e+00 : f32
    %28 = vector.broadcast %cst_12 : f32 to vector<2x512xf32>
    %29 = arith.maximumf %27, %28 : vector<2x512xf32>
    %30 = arith.truncf %29 : vector<2x512xf32> to vector<2x512xbf16>
    %c0_13 = arith.constant 0 : index
    %c0_14 = arith.constant 0 : index
    %31 = vector.load %arg5[%c0_13, %c0_14] : memref<512x1024xbf16, #tpu.memory_space<vmem>>, vector<512x1024xbf16>
    %cst_15 = arith.constant dense<0.000000e+00> : vector<2x1024xf32>
    %32 = tpu.matmul %30, %31, %cst_15 {dimension_numbers = #tpu.dot_dimension_numbers<[1], [0], [0], [1], [0, 0, 1, 1], [], []>} : vector<2x512xbf16>, vector<512x1024xbf16>, vector<2x1024xf32> -> vector<2x1024xf32>
    %cst_16 = arith.constant dense<0.000000e+00> : vector<1024xf32>
    %33 = vector.multi_reduction <add>, %32, %cst_16 [0] : vector<2x1024xf32> to vector<1024xf32>
    %34 = vector.shape_cast %33 : vector<1024xf32> to vector<1x1024xf32>
    %cst_17 = arith.constant 2.000000e+00 : f32
    %35 = vector.broadcast %cst_17 : f32 to vector<1x1024xf32>
    %36 = arith.divf %34, %35 : vector<1x1024xf32>
    %37 = arith.mulf %32, %32 : vector<2x1024xf32>
    %cst_18 = arith.constant dense<0.000000e+00> : vector<1024xf32>
    %38 = vector.multi_reduction <add>, %37, %cst_18 [0] : vector<2x1024xf32> to vector<1024xf32>
    %39 = vector.shape_cast %38 : vector<1024xf32> to vector<1x1024xf32>
    %cst_19 = arith.constant 2.000000e+00 : f32
    %40 = vector.broadcast %cst_19 : f32 to vector<1x1024xf32>
    %41 = arith.divf %39, %40 : vector<1x1024xf32>
    %42 = tpu.concatenate %36, %41 in 0 : vector<1x1024xf32>, vector<1x1024xf32> -> vector<2x1024xf32>
    %c0_20 = arith.constant 0 : index
    %c0_21 = arith.constant 0 : index
    %43 = vector.load %arg6[%c0_20, %c0_21] : memref<1024x64xf32, #tpu.memory_space<vmem>>, vector<1024x64xf32>
    %cst_22 = arith.constant dense<0.000000e+00> : vector<2x64xf32>
    %44 = tpu.matmul %42, %43, %cst_22 {dimension_numbers = #tpu.dot_dimension_numbers<[1], [0], [0], [1], [0, 0, 1, 1], [], []>} : vector<2x1024xf32>, vector<1024x64xf32>, vector<2x64xf32> -> vector<2x64xf32>
    %45 = vector.extract_strided_slice %44 {offsets = [0, 0], sizes = [1, 64], strides = [1, 1]} : vector<2x64xf32> to vector<1x64xf32>
    %46 = vector.extract_strided_slice %44 {offsets = [1, 0], sizes = [1, 64], strides = [1, 1]} : vector<2x64xf32> to vector<1x64xf32>
    %47 = arith.mulf %45, %45 : vector<1x64xf32>
    %48 = arith.subf %46, %47 : vector<1x64xf32>
    %c0_23 = arith.constant 0 : index
    %c0_24 = arith.constant 0 : index
    %49 = vector.load %arg8[%c0_23, %c0_24] : memref<1x64xf32, #tpu.memory_space<vmem>>, vector<1x64xf32>
    %cst_25 = arith.constant 9.99999974E-6 : f32
    %50 = vector.broadcast %cst_25 : f32 to vector<1x64xf32>
    %51 = arith.addf %48, %50 : vector<1x64xf32>
    %52 = math.rsqrt %51 : vector<1x64xf32>
    %53 = arith.mulf %49, %52 : vector<1x64xf32>
    %c0_26 = arith.constant 0 : index
    %c0_27 = arith.constant 0 : index
    %54 = vector.load %arg9[%c0_26, %c0_27] : memref<1x64xf32, #tpu.memory_space<vmem>>, vector<1x64xf32>
    %55 = arith.mulf %45, %53 : vector<1x64xf32>
    %56 = arith.subf %54, %55 : vector<1x64xf32>
    %57 = tpu.concatenate %53, %56 in 0 : vector<1x64xf32>, vector<1x64xf32> -> vector<2x64xf32>
    %c0_28 = arith.constant 0 : index
    %c0_29 = arith.constant 0 : index
    %58 = vector.load %arg7[%c0_28, %c0_29] : memref<64x1024xf32, #tpu.memory_space<vmem>>, vector<64x1024xf32>
    %cst_30 = arith.constant dense<0.000000e+00> : vector<2x1024xf32>
    %59 = tpu.matmul %57, %58, %cst_30 {dimension_numbers = #tpu.dot_dimension_numbers<[1], [0], [0], [1], [0, 0, 1, 1], [], []>} : vector<2x64xf32>, vector<64x1024xf32>, vector<2x1024xf32> -> vector<2x1024xf32>
    %60 = vector.extract_strided_slice %59 {offsets = [0, 0], sizes = [1, 1024], strides = [1, 1]} : vector<2x1024xf32> to vector<1x1024xf32>
    %61 = vector.broadcast %60 : vector<1x1024xf32> to vector<2x1024xf32>
    %62 = arith.mulf %32, %61 : vector<2x1024xf32>
    %63 = vector.extract_strided_slice %59 {offsets = [1, 0], sizes = [1, 1024], strides = [1, 1]} : vector<2x1024xf32> to vector<1x1024xf32>
    %64 = vector.broadcast %63 : vector<1x1024xf32> to vector<2x1024xf32>
    %65 = arith.addf %62, %64 : vector<2x1024xf32>
    %cst_31 = arith.constant 0.000000e+00 : f32
    %66 = vector.broadcast %cst_31 : f32 to vector<2x1024xf32>
    %67 = arith.maximumf %65, %66 : vector<2x1024xf32>
    %68 = arith.truncf %67 : vector<2x1024xf32> to vector<2x1024xbf16>
    %c0_32 = arith.constant 0 : index
    %c0_33 = arith.constant 0 : index
    %69 = vector.load %arg10[%c0_32, %c0_33] : memref<2x1024xbf16, #tpu.memory_space<vmem>>, vector<2x1024xbf16>
    tpu.vector_store %arg10[%c0_32, %c0_33], %68 {strides = array<i32>} : memref<2x1024xbf16, #tpu.memory_space<vmem>>, vector<2x1024xbf16>,
    return
  }
  func.func @transform_0(%arg0: i32) -> (i32, i32) {
    %c0_i32 = arith.constant 0 : i32
    %c0_i32_0 = arith.constant 0 : i32
    %c0_i32_1 = arith.constant 0 : i32
    return %c0_i32, %c0_i32_0 : i32, i32
  }
  func.func @transform_1(%arg0: i32) -> (i32, i32) {
    %c0_i32 = arith.constant 0 : i32
    %c0_i32_0 = arith.constant 0 : i32
    %c0_i32_1 = arith.constant 0 : i32
    return %c0_i32, %c0_i32_0 : i32, i32
  }
  func.func @transform_2(%arg0: i32) -> (i32, i32) {
    %c0_i32 = arith.constant 0 : i32
    %c0_i32_0 = arith.constant 0 : i32
    %c0_i32_1 = arith.constant 0 : i32
    return %c0_i32, %c0_i32_0 : i32, i32
  }
  func.func @transform_3(%arg0: i32) -> (i32, i32) {
    %c0_i32 = arith.constant 0 : i32
    %c0_i32_0 = arith.constant 0 : i32
    %c0_i32_1 = arith.constant 0 : i32
    return %c0_i32, %c0_i32_0 : i32, i32
  }
  func.func @transform_4(%arg0: i32) -> (i32, i32) {
    %c0_i32 = arith.constant 0 : i32
    %c0_i32_0 = arith.constant 0 : i32
    %c0_i32_1 = arith.constant 0 : i32
    return %c0_i32, %c0_i32_0 : i32, i32
  }
  func.func @transform_5(%arg0: i32) -> (i32, i32) {
    %c0_i32 = arith.constant 0 : i32
    %c0_i32_0 = arith.constant 0 : i32
    %c0_i32_1 = arith.constant 0 : i32
    return %c0_i32, %c0_i32_0 : i32, i32
  }
  func.func @transform_6(%arg0: i32) -> (i32, i32) {
    %c0_i32 = arith.constant 0 : i32
    %c0_i32_0 = arith.constant 0 : i32
    %c0_i32_1 = arith.constant 0 : i32
    return %c0_i32, %c0_i32_0 : i32, i32
  }
  func.func @transform_7(%arg0: i32) -> (i32, i32) {
    %c0_i32 = arith.constant 0 : i32
    %c0_i32_0 = arith.constant 0 : i32
    %c0_i32_1 = arith.constant 0 : i32
    return %c0_i32, %c0_i32_0 : i32, i32
  }
  func.func @transform_8(%arg0: i32) -> (i32, i32) {
    %c0_i32 = arith.constant 0 : i32
    %c0_i32_0 = arith.constant 0 : i32
    %c0_i32_1 = arith.constant 0 : i32
    return %c0_i32, %c0_i32_0 : i32, i32
  }
  func.func @transform_9(%arg0: i32) -> (i32, i32) {
    %c0_i32 = arith.constant 0 : i32
    %c0_i32_0 = arith.constant 0 : i32
    %c0_i32_1 = arith.constant 0 : i32
    return %c0_i32, %c0_i32_0 : i32, i32
  }
}

module attributes {stable_mosaic.version = 11 : i64} {
  func.func @conv_bn_relu_kernel(%arg0: i32, %arg1: memref<4x256x32xbf16, #tpu.memory_space<vmem>>, %arg2: memref<4x32x256xbf16, #tpu.memory_space<vmem>>, %arg3: memref<32x1xf32, #tpu.memory_space<vmem>>, %arg4: memref<32x1xf32, #tpu.memory_space<vmem>>, %arg5: memref<4x32x32xbf16, #tpu.memory_space<vmem>>) attributes {dimension_semantics = [#tpu.dimension_semantics<arbitrary>], iteration_bounds = array<i64: 1>, scalar_prefetch = 0 : i64, scratch_operands = 0 : i64, tpu.core_type = #tpu.core_type<tc>, window_params = [{pipeline_mode = #tpu.pipeline_mode<synchronous>, transform_indices = @transform_0, window_bounds = array<i64: 4, 256, 32>}, {pipeline_mode = #tpu.pipeline_mode<synchronous>, transform_indices = @transform_1, window_bounds = array<i64: 4, 32, 256>}, {pipeline_mode = #tpu.pipeline_mode<synchronous>, transform_indices = @transform_2, window_bounds = array<i64: 32, 1>}, {pipeline_mode = #tpu.pipeline_mode<synchronous>, transform_indices = @transform_3, window_bounds = array<i64: 32, 1>}, {pipeline_mode = #tpu.pipeline_mode<synchronous>, transform_indices = @transform_4, window_bounds = array<i64: 4, 32, 32>}]} {
    %c0 = arith.constant 0 : index
    %c0_0 = arith.constant 0 : index
    %c0_1 = arith.constant 0 : index
    %0 = vector.load %arg2[%c0, %c0_0, %c0_1] : memref<4x32x256xbf16, #tpu.memory_space<vmem>>, vector<1x32x256xbf16>
    %1 = vector.shape_cast %0 : vector<1x32x256xbf16> to vector<32x256xbf16>
    %c0_2 = arith.constant 0 : index
    %c0_3 = arith.constant 0 : index
    %c0_4 = arith.constant 0 : index
    %2 = vector.load %arg1[%c0_2, %c0_3, %c0_4] : memref<4x256x32xbf16, #tpu.memory_space<vmem>>, vector<1x256x32xbf16>
    %3 = vector.shape_cast %2 : vector<1x256x32xbf16> to vector<256x32xbf16>
    %cst = arith.constant dense<0.000000e+00> : vector<32x32xf32>
    %4 = tpu.matmul %1, %3, %cst {dimension_numbers = #tpu.dot_dimension_numbers<[1], [0], [0], [1], [0, 0, 1, 1], [], []>} : vector<32x256xbf16>, vector<256x32xbf16>, vector<32x32xf32> -> vector<32x32xf32>
    %cst_5 = arith.constant dense<0.000000e+00> : vector<32xf32>
    %5 = vector.multi_reduction <add>, %4, %cst_5 [1] : vector<32x32xf32> to vector<32xf32>
    %6 = vector.shape_cast %5 : vector<32xf32> to vector<32x1xf32>
    %7 = arith.mulf %4, %4 : vector<32x32xf32>
    %cst_6 = arith.constant dense<0.000000e+00> : vector<32xf32>
    %8 = vector.multi_reduction <add>, %7, %cst_6 [1] : vector<32x32xf32> to vector<32xf32>
    %9 = vector.shape_cast %8 : vector<32xf32> to vector<32x1xf32>
    %c1 = arith.constant 1 : index
    %c0_7 = arith.constant 0 : index
    %c0_8 = arith.constant 0 : index
    %10 = vector.load %arg2[%c1, %c0_7, %c0_8] : memref<4x32x256xbf16, #tpu.memory_space<vmem>>, vector<1x32x256xbf16>
    %11 = vector.shape_cast %10 : vector<1x32x256xbf16> to vector<32x256xbf16>
    %c1_9 = arith.constant 1 : index
    %c0_10 = arith.constant 0 : index
    %c0_11 = arith.constant 0 : index
    %12 = vector.load %arg1[%c1_9, %c0_10, %c0_11] : memref<4x256x32xbf16, #tpu.memory_space<vmem>>, vector<1x256x32xbf16>
    %13 = vector.shape_cast %12 : vector<1x256x32xbf16> to vector<256x32xbf16>
    %cst_12 = arith.constant dense<0.000000e+00> : vector<32x32xf32>
    %14 = tpu.matmul %11, %13, %cst_12 {dimension_numbers = #tpu.dot_dimension_numbers<[1], [0], [0], [1], [0, 0, 1, 1], [], []>} : vector<32x256xbf16>, vector<256x32xbf16>, vector<32x32xf32> -> vector<32x32xf32>
    %cst_13 = arith.constant dense<0.000000e+00> : vector<32xf32>
    %15 = vector.multi_reduction <add>, %14, %cst_13 [1] : vector<32x32xf32> to vector<32xf32>
    %16 = vector.shape_cast %15 : vector<32xf32> to vector<32x1xf32>
    %17 = arith.mulf %14, %14 : vector<32x32xf32>
    %cst_14 = arith.constant dense<0.000000e+00> : vector<32xf32>
    %18 = vector.multi_reduction <add>, %17, %cst_14 [1] : vector<32x32xf32> to vector<32xf32>
    %19 = vector.shape_cast %18 : vector<32xf32> to vector<32x1xf32>
    %20 = arith.addf %6, %16 : vector<32x1xf32>
    %21 = arith.addf %9, %19 : vector<32x1xf32>
    %c2 = arith.constant 2 : index
    %c0_15 = arith.constant 0 : index
    %c0_16 = arith.constant 0 : index
    %22 = vector.load %arg2[%c2, %c0_15, %c0_16] : memref<4x32x256xbf16, #tpu.memory_space<vmem>>, vector<1x32x256xbf16>
    %23 = vector.shape_cast %22 : vector<1x32x256xbf16> to vector<32x256xbf16>
    %c2_17 = arith.constant 2 : index
    %c0_18 = arith.constant 0 : index
    %c0_19 = arith.constant 0 : index
    %24 = vector.load %arg1[%c2_17, %c0_18, %c0_19] : memref<4x256x32xbf16, #tpu.memory_space<vmem>>, vector<1x256x32xbf16>
    %25 = vector.shape_cast %24 : vector<1x256x32xbf16> to vector<256x32xbf16>
    %cst_20 = arith.constant dense<0.000000e+00> : vector<32x32xf32>
    %26 = tpu.matmul %23, %25, %cst_20 {dimension_numbers = #tpu.dot_dimension_numbers<[1], [0], [0], [1], [0, 0, 1, 1], [], []>} : vector<32x256xbf16>, vector<256x32xbf16>, vector<32x32xf32> -> vector<32x32xf32>
    %cst_21 = arith.constant dense<0.000000e+00> : vector<32xf32>
    %27 = vector.multi_reduction <add>, %26, %cst_21 [1] : vector<32x32xf32> to vector<32xf32>
    %28 = vector.shape_cast %27 : vector<32xf32> to vector<32x1xf32>
    %29 = arith.mulf %26, %26 : vector<32x32xf32>
    %cst_22 = arith.constant dense<0.000000e+00> : vector<32xf32>
    %30 = vector.multi_reduction <add>, %29, %cst_22 [1] : vector<32x32xf32> to vector<32xf32>
    %31 = vector.shape_cast %30 : vector<32xf32> to vector<32x1xf32>
    %32 = arith.addf %20, %28 : vector<32x1xf32>
    %33 = arith.addf %21, %31 : vector<32x1xf32>
    %c3 = arith.constant 3 : index
    %c0_23 = arith.constant 0 : index
    %c0_24 = arith.constant 0 : index
    %34 = vector.load %arg2[%c3, %c0_23, %c0_24] : memref<4x32x256xbf16, #tpu.memory_space<vmem>>, vector<1x32x256xbf16>
    %35 = vector.shape_cast %34 : vector<1x32x256xbf16> to vector<32x256xbf16>
    %c3_25 = arith.constant 3 : index
    %c0_26 = arith.constant 0 : index
    %c0_27 = arith.constant 0 : index
    %36 = vector.load %arg1[%c3_25, %c0_26, %c0_27] : memref<4x256x32xbf16, #tpu.memory_space<vmem>>, vector<1x256x32xbf16>
    %37 = vector.shape_cast %36 : vector<1x256x32xbf16> to vector<256x32xbf16>
    %cst_28 = arith.constant dense<0.000000e+00> : vector<32x32xf32>
    %38 = tpu.matmul %35, %37, %cst_28 {dimension_numbers = #tpu.dot_dimension_numbers<[1], [0], [0], [1], [0, 0, 1, 1], [], []>} : vector<32x256xbf16>, vector<256x32xbf16>, vector<32x32xf32> -> vector<32x32xf32>
    %cst_29 = arith.constant dense<0.000000e+00> : vector<32xf32>
    %39 = vector.multi_reduction <add>, %38, %cst_29 [1] : vector<32x32xf32> to vector<32xf32>
    %40 = vector.shape_cast %39 : vector<32xf32> to vector<32x1xf32>
    %41 = arith.mulf %38, %38 : vector<32x32xf32>
    %cst_30 = arith.constant dense<0.000000e+00> : vector<32xf32>
    %42 = vector.multi_reduction <add>, %41, %cst_30 [1] : vector<32x32xf32> to vector<32xf32>
    %43 = vector.shape_cast %42 : vector<32xf32> to vector<32x1xf32>
    %44 = arith.addf %32, %40 : vector<32x1xf32>
    %45 = arith.addf %33, %43 : vector<32x1xf32>
    %cst_31 = arith.constant 0.0102040814 : f32
    %46 = vector.broadcast %cst_31 : f32 to vector<32x1xf32>
    %47 = arith.mulf %44, %46 : vector<32x1xf32>
    %cst_32 = arith.constant 0.0102040814 : f32
    %48 = vector.broadcast %cst_32 : f32 to vector<32x1xf32>
    %49 = arith.mulf %45, %48 : vector<32x1xf32>
    %50 = arith.mulf %47, %47 : vector<32x1xf32>
    %51 = arith.subf %49, %50 : vector<32x1xf32>
    %c0_33 = arith.constant 0 : index
    %c0_34 = arith.constant 0 : index
    %52 = vector.load %arg3[%c0_33, %c0_34] : memref<32x1xf32, #tpu.memory_space<vmem>>, vector<32x1xf32>
    %cst_35 = arith.constant 9.99999974E-6 : f32
    %53 = vector.broadcast %cst_35 : f32 to vector<32x1xf32>
    %54 = arith.addf %51, %53 : vector<32x1xf32>
    %55 = math.rsqrt %54 : vector<32x1xf32>
    %56 = arith.mulf %52, %55 : vector<32x1xf32>
    %c0_36 = arith.constant 0 : index
    %c0_37 = arith.constant 0 : index
    %57 = vector.load %arg4[%c0_36, %c0_37] : memref<32x1xf32, #tpu.memory_space<vmem>>, vector<32x1xf32>
    %58 = arith.mulf %47, %56 : vector<32x1xf32>
    %59 = arith.subf %57, %58 : vector<32x1xf32>
    %60 = vector.broadcast %56 : vector<32x1xf32> to vector<32x32xf32>
    %61 = arith.mulf %4, %60 : vector<32x32xf32>
    %62 = vector.broadcast %59 : vector<32x1xf32> to vector<32x32xf32>
    %63 = arith.addf %61, %62 : vector<32x32xf32>
    %cst_38 = arith.constant 0.000000e+00 : f32
    %64 = vector.broadcast %cst_38 : f32 to vector<32x32xf32>
    %65 = arith.maximumf %63, %64 : vector<32x32xf32>
    %66 = arith.truncf %65 : vector<32x32xf32> to vector<32x32xbf16>
    %c0_39 = arith.constant 0 : index
    %c0_40 = arith.constant 0 : index
    %c0_41 = arith.constant 0 : index
    %67 = vector.load %arg5[%c0_39, %c0_40, %c0_41] : memref<4x32x32xbf16, #tpu.memory_space<vmem>>, vector<1x32x32xbf16>
    %68 = vector.shape_cast %67 : vector<1x32x32xbf16> to vector<32x32xbf16>
    %69 = vector.shape_cast %66 : vector<32x32xbf16> to vector<1x32x32xbf16>
    tpu.vector_store %arg5[%c0_39, %c0_40, %c0_41], %69 {strides = array<i32>} : memref<4x32x32xbf16, #tpu.memory_space<vmem>>, vector<1x32x32xbf16>,
    %70 = vector.broadcast %56 : vector<32x1xf32> to vector<32x32xf32>
    %71 = arith.mulf %14, %70 : vector<32x32xf32>
    %72 = vector.broadcast %59 : vector<32x1xf32> to vector<32x32xf32>
    %73 = arith.addf %71, %72 : vector<32x32xf32>
    %cst_42 = arith.constant 0.000000e+00 : f32
    %74 = vector.broadcast %cst_42 : f32 to vector<32x32xf32>
    %75 = arith.maximumf %73, %74 : vector<32x32xf32>
    %76 = arith.truncf %75 : vector<32x32xf32> to vector<32x32xbf16>
    %c1_43 = arith.constant 1 : index
    %c0_44 = arith.constant 0 : index
    %c0_45 = arith.constant 0 : index
    %77 = vector.load %arg5[%c1_43, %c0_44, %c0_45] : memref<4x32x32xbf16, #tpu.memory_space<vmem>>, vector<1x32x32xbf16>
    %78 = vector.shape_cast %77 : vector<1x32x32xbf16> to vector<32x32xbf16>
    %79 = vector.shape_cast %76 : vector<32x32xbf16> to vector<1x32x32xbf16>
    tpu.vector_store %arg5[%c1_43, %c0_44, %c0_45], %79 {strides = array<i32>} : memref<4x32x32xbf16, #tpu.memory_space<vmem>>, vector<1x32x32xbf16>,
    %80 = vector.broadcast %56 : vector<32x1xf32> to vector<32x32xf32>
    %81 = arith.mulf %26, %80 : vector<32x32xf32>
    %82 = vector.broadcast %59 : vector<32x1xf32> to vector<32x32xf32>
    %83 = arith.addf %81, %82 : vector<32x32xf32>
    %cst_46 = arith.constant 0.000000e+00 : f32
    %84 = vector.broadcast %cst_46 : f32 to vector<32x32xf32>
    %85 = arith.maximumf %83, %84 : vector<32x32xf32>
    %86 = arith.truncf %85 : vector<32x32xf32> to vector<32x32xbf16>
    %c2_47 = arith.constant 2 : index
    %c0_48 = arith.constant 0 : index
    %c0_49 = arith.constant 0 : index
    %87 = vector.load %arg5[%c2_47, %c0_48, %c0_49] : memref<4x32x32xbf16, #tpu.memory_space<vmem>>, vector<1x32x32xbf16>
    %88 = vector.shape_cast %87 : vector<1x32x32xbf16> to vector<32x32xbf16>
    %89 = vector.shape_cast %86 : vector<32x32xbf16> to vector<1x32x32xbf16>
    tpu.vector_store %arg5[%c2_47, %c0_48, %c0_49], %89 {strides = array<i32>} : memref<4x32x32xbf16, #tpu.memory_space<vmem>>, vector<1x32x32xbf16>,
    %90 = vector.broadcast %56 : vector<32x1xf32> to vector<32x32xf32>
    %91 = arith.mulf %38, %90 : vector<32x32xf32>
    %92 = vector.broadcast %59 : vector<32x1xf32> to vector<32x32xf32>
    %93 = arith.addf %91, %92 : vector<32x32xf32>
    %cst_50 = arith.constant 0.000000e+00 : f32
    %94 = vector.broadcast %cst_50 : f32 to vector<32x32xf32>
    %95 = arith.maximumf %93, %94 : vector<32x32xf32>
    %96 = arith.truncf %95 : vector<32x32xf32> to vector<32x32xbf16>
    %c3_51 = arith.constant 3 : index
    %c0_52 = arith.constant 0 : index
    %c0_53 = arith.constant 0 : index
    %97 = vector.load %arg5[%c3_51, %c0_52, %c0_53] : memref<4x32x32xbf16, #tpu.memory_space<vmem>>, vector<1x32x32xbf16>
    %98 = vector.shape_cast %97 : vector<1x32x32xbf16> to vector<32x32xbf16>
    %99 = vector.shape_cast %96 : vector<32x32xbf16> to vector<1x32x32xbf16>
    tpu.vector_store %arg5[%c3_51, %c0_52, %c0_53], %99 {strides = array<i32>} : memref<4x32x32xbf16, #tpu.memory_space<vmem>>, vector<1x32x32xbf16>,
    return
  }
  func.func @transform_0(%arg0: i32) -> (i32, i32, i32) {
    %c0_i32 = arith.constant 0 : i32
    %c0_i32_0 = arith.constant 0 : i32
    %c0_i32_1 = arith.constant 0 : i32
    %c0_i32_2 = arith.constant 0 : i32
    return %c0_i32, %c0_i32_0, %c0_i32_1 : i32, i32, i32
  }
  func.func @transform_1(%arg0: i32) -> (i32, i32, i32) {
    %c0_i32 = arith.constant 0 : i32
    %c0_i32_0 = arith.constant 0 : i32
    %c0_i32_1 = arith.constant 0 : i32
    %c0_i32_2 = arith.constant 0 : i32
    return %c0_i32, %c0_i32_0, %c0_i32_1 : i32, i32, i32
  }
  func.func @transform_2(%arg0: i32) -> (i32, i32) {
    %c0_i32 = arith.constant 0 : i32
    %c0_i32_0 = arith.constant 0 : i32
    %c0_i32_1 = arith.constant 0 : i32
    return %c0_i32, %c0_i32_0 : i32, i32
  }
  func.func @transform_3(%arg0: i32) -> (i32, i32) {
    %c0_i32 = arith.constant 0 : i32
    %c0_i32_0 = arith.constant 0 : i32
    %c0_i32_1 = arith.constant 0 : i32
    return %c0_i32, %c0_i32_0 : i32, i32
  }
  func.func @transform_4(%arg0: i32) -> (i32, i32, i32) {
    %c0_i32 = arith.constant 0 : i32
    %c0_i32_0 = arith.constant 0 : i32
    %c0_i32_1 = arith.constant 0 : i32
    %c0_i32_2 = arith.constant 0 : i32
    return %c0_i32, %c0_i32_0, %c0_i32_1 : i32, i32, i32
  }
}

module attributes {stable_mosaic.version = 11 : i64} {
  func.func @conv_bn_relu_kernel(%arg0: i32, %arg1: memref<4x128x98xbf16, #tpu.memory_space<vmem>>, %arg2: memref<4x16x128xbf16, #tpu.memory_space<vmem>>, %arg3: memref<16x1xf32, #tpu.memory_space<vmem>>, %arg4: memref<16x1xf32, #tpu.memory_space<vmem>>, %arg5: memref<4x16x98xbf16, #tpu.memory_space<vmem>>) attributes {dimension_semantics = [#tpu.dimension_semantics<arbitrary>], iteration_bounds = array<i64: 1>, scalar_prefetch = 0 : i64, scratch_operands = 0 : i64, tpu.core_type = #tpu.core_type<tc>, window_params = [{pipeline_mode = #tpu.pipeline_mode<synchronous>, transform_indices = @transform_0, window_bounds = array<i64: 4, 128, 98>}, {pipeline_mode = #tpu.pipeline_mode<synchronous>, transform_indices = @transform_1, window_bounds = array<i64: 4, 16, 128>}, {pipeline_mode = #tpu.pipeline_mode<synchronous>, transform_indices = @transform_2, window_bounds = array<i64: 16, 1>}, {pipeline_mode = #tpu.pipeline_mode<synchronous>, transform_indices = @transform_3, window_bounds = array<i64: 16, 1>}, {pipeline_mode = #tpu.pipeline_mode<synchronous>, transform_indices = @transform_4, window_bounds = array<i64: 4, 16, 98>}]} {
    %c0 = arith.constant 0 : index
    %c0_0 = arith.constant 0 : index
    %c0_1 = arith.constant 0 : index
    %0 = vector.load %arg2[%c0, %c0_0, %c0_1] : memref<4x16x128xbf16, #tpu.memory_space<vmem>>, vector<1x16x128xbf16>
    %1 = vector.shape_cast %0 : vector<1x16x128xbf16> to vector<16x128xbf16>
    %c0_2 = arith.constant 0 : index
    %c0_3 = arith.constant 0 : index
    %c0_4 = arith.constant 0 : index
    %2 = vector.load %arg1[%c0_2, %c0_3, %c0_4] : memref<4x128x98xbf16, #tpu.memory_space<vmem>>, vector<1x128x98xbf16>
    %3 = vector.shape_cast %2 : vector<1x128x98xbf16> to vector<128x98xbf16>
    %cst = arith.constant dense<0.000000e+00> : vector<16x98xf32>
    %4 = tpu.matmul %1, %3, %cst {dimension_numbers = #tpu.dot_dimension_numbers<[1], [0], [0], [1], [0, 0, 1, 1], [], []>} : vector<16x128xbf16>, vector<128x98xbf16>, vector<16x98xf32> -> vector<16x98xf32>
    %cst_5 = arith.constant dense<0.000000e+00> : vector<16xf32>
    %5 = vector.multi_reduction <add>, %4, %cst_5 [1] : vector<16x98xf32> to vector<16xf32>
    %6 = vector.shape_cast %5 : vector<16xf32> to vector<16x1xf32>
    %7 = arith.mulf %4, %4 : vector<16x98xf32>
    %cst_6 = arith.constant dense<0.000000e+00> : vector<16xf32>
    %8 = vector.multi_reduction <add>, %7, %cst_6 [1] : vector<16x98xf32> to vector<16xf32>
    %9 = vector.shape_cast %8 : vector<16xf32> to vector<16x1xf32>
    %c1 = arith.constant 1 : index
    %c0_7 = arith.constant 0 : index
    %c0_8 = arith.constant 0 : index
    %10 = vector.load %arg2[%c1, %c0_7, %c0_8] : memref<4x16x128xbf16, #tpu.memory_space<vmem>>, vector<1x16x128xbf16>
    %11 = vector.shape_cast %10 : vector<1x16x128xbf16> to vector<16x128xbf16>
    %c1_9 = arith.constant 1 : index
    %c0_10 = arith.constant 0 : index
    %c0_11 = arith.constant 0 : index
    %12 = vector.load %arg1[%c1_9, %c0_10, %c0_11] : memref<4x128x98xbf16, #tpu.memory_space<vmem>>, vector<1x128x98xbf16>
    %13 = vector.shape_cast %12 : vector<1x128x98xbf16> to vector<128x98xbf16>
    %cst_12 = arith.constant dense<0.000000e+00> : vector<16x98xf32>
    %14 = tpu.matmul %11, %13, %cst_12 {dimension_numbers = #tpu.dot_dimension_numbers<[1], [0], [0], [1], [0, 0, 1, 1], [], []>} : vector<16x128xbf16>, vector<128x98xbf16>, vector<16x98xf32> -> vector<16x98xf32>
    %cst_13 = arith.constant dense<0.000000e+00> : vector<16xf32>
    %15 = vector.multi_reduction <add>, %14, %cst_13 [1] : vector<16x98xf32> to vector<16xf32>
    %16 = vector.shape_cast %15 : vector<16xf32> to vector<16x1xf32>
    %17 = arith.mulf %14, %14 : vector<16x98xf32>
    %cst_14 = arith.constant dense<0.000000e+00> : vector<16xf32>
    %18 = vector.multi_reduction <add>, %17, %cst_14 [1] : vector<16x98xf32> to vector<16xf32>
    %19 = vector.shape_cast %18 : vector<16xf32> to vector<16x1xf32>
    %20 = arith.addf %6, %16 : vector<16x1xf32>
    %21 = arith.addf %9, %19 : vector<16x1xf32>
    %c2 = arith.constant 2 : index
    %c0_15 = arith.constant 0 : index
    %c0_16 = arith.constant 0 : index
    %22 = vector.load %arg2[%c2, %c0_15, %c0_16] : memref<4x16x128xbf16, #tpu.memory_space<vmem>>, vector<1x16x128xbf16>
    %23 = vector.shape_cast %22 : vector<1x16x128xbf16> to vector<16x128xbf16>
    %c2_17 = arith.constant 2 : index
    %c0_18 = arith.constant 0 : index
    %c0_19 = arith.constant 0 : index
    %24 = vector.load %arg1[%c2_17, %c0_18, %c0_19] : memref<4x128x98xbf16, #tpu.memory_space<vmem>>, vector<1x128x98xbf16>
    %25 = vector.shape_cast %24 : vector<1x128x98xbf16> to vector<128x98xbf16>
    %cst_20 = arith.constant dense<0.000000e+00> : vector<16x98xf32>
    %26 = tpu.matmul %23, %25, %cst_20 {dimension_numbers = #tpu.dot_dimension_numbers<[1], [0], [0], [1], [0, 0, 1, 1], [], []>} : vector<16x128xbf16>, vector<128x98xbf16>, vector<16x98xf32> -> vector<16x98xf32>
    %cst_21 = arith.constant dense<0.000000e+00> : vector<16xf32>
    %27 = vector.multi_reduction <add>, %26, %cst_21 [1] : vector<16x98xf32> to vector<16xf32>
    %28 = vector.shape_cast %27 : vector<16xf32> to vector<16x1xf32>
    %29 = arith.mulf %26, %26 : vector<16x98xf32>
    %cst_22 = arith.constant dense<0.000000e+00> : vector<16xf32>
    %30 = vector.multi_reduction <add>, %29, %cst_22 [1] : vector<16x98xf32> to vector<16xf32>
    %31 = vector.shape_cast %30 : vector<16xf32> to vector<16x1xf32>
    %32 = arith.addf %20, %28 : vector<16x1xf32>
    %33 = arith.addf %21, %31 : vector<16x1xf32>
    %c3 = arith.constant 3 : index
    %c0_23 = arith.constant 0 : index
    %c0_24 = arith.constant 0 : index
    %34 = vector.load %arg2[%c3, %c0_23, %c0_24] : memref<4x16x128xbf16, #tpu.memory_space<vmem>>, vector<1x16x128xbf16>
    %35 = vector.shape_cast %34 : vector<1x16x128xbf16> to vector<16x128xbf16>
    %c3_25 = arith.constant 3 : index
    %c0_26 = arith.constant 0 : index
    %c0_27 = arith.constant 0 : index
    %36 = vector.load %arg1[%c3_25, %c0_26, %c0_27] : memref<4x128x98xbf16, #tpu.memory_space<vmem>>, vector<1x128x98xbf16>
    %37 = vector.shape_cast %36 : vector<1x128x98xbf16> to vector<128x98xbf16>
    %cst_28 = arith.constant dense<0.000000e+00> : vector<16x98xf32>
    %38 = tpu.matmul %35, %37, %cst_28 {dimension_numbers = #tpu.dot_dimension_numbers<[1], [0], [0], [1], [0, 0, 1, 1], [], []>} : vector<16x128xbf16>, vector<128x98xbf16>, vector<16x98xf32> -> vector<16x98xf32>
    %cst_29 = arith.constant dense<0.000000e+00> : vector<16xf32>
    %39 = vector.multi_reduction <add>, %38, %cst_29 [1] : vector<16x98xf32> to vector<16xf32>
    %40 = vector.shape_cast %39 : vector<16xf32> to vector<16x1xf32>
    %41 = arith.mulf %38, %38 : vector<16x98xf32>
    %cst_30 = arith.constant dense<0.000000e+00> : vector<16xf32>
    %42 = vector.multi_reduction <add>, %41, %cst_30 [1] : vector<16x98xf32> to vector<16xf32>
    %43 = vector.shape_cast %42 : vector<16xf32> to vector<16x1xf32>
    %44 = arith.addf %32, %40 : vector<16x1xf32>
    %45 = arith.addf %33, %43 : vector<16x1xf32>
    %cst_31 = arith.constant 0.00255102036 : f32
    %46 = vector.broadcast %cst_31 : f32 to vector<16x1xf32>
    %47 = arith.mulf %44, %46 : vector<16x1xf32>
    %cst_32 = arith.constant 0.00255102036 : f32
    %48 = vector.broadcast %cst_32 : f32 to vector<16x1xf32>
    %49 = arith.mulf %45, %48 : vector<16x1xf32>
    %50 = arith.mulf %47, %47 : vector<16x1xf32>
    %51 = arith.subf %49, %50 : vector<16x1xf32>
    %c0_33 = arith.constant 0 : index
    %c0_34 = arith.constant 0 : index
    %52 = vector.load %arg3[%c0_33, %c0_34] : memref<16x1xf32, #tpu.memory_space<vmem>>, vector<16x1xf32>
    %cst_35 = arith.constant 9.99999974E-6 : f32
    %53 = vector.broadcast %cst_35 : f32 to vector<16x1xf32>
    %54 = arith.addf %51, %53 : vector<16x1xf32>
    %55 = math.rsqrt %54 : vector<16x1xf32>
    %56 = arith.mulf %52, %55 : vector<16x1xf32>
    %c0_36 = arith.constant 0 : index
    %c0_37 = arith.constant 0 : index
    %57 = vector.load %arg4[%c0_36, %c0_37] : memref<16x1xf32, #tpu.memory_space<vmem>>, vector<16x1xf32>
    %58 = arith.mulf %47, %56 : vector<16x1xf32>
    %59 = arith.subf %57, %58 : vector<16x1xf32>
    %60 = vector.broadcast %56 : vector<16x1xf32> to vector<16x98xf32>
    %61 = arith.mulf %4, %60 : vector<16x98xf32>
    %62 = vector.broadcast %59 : vector<16x1xf32> to vector<16x98xf32>
    %63 = arith.addf %61, %62 : vector<16x98xf32>
    %cst_38 = arith.constant 0.000000e+00 : f32
    %64 = vector.broadcast %cst_38 : f32 to vector<16x98xf32>
    %65 = arith.maximumf %63, %64 : vector<16x98xf32>
    %66 = arith.truncf %65 : vector<16x98xf32> to vector<16x98xbf16>
    %c0_39 = arith.constant 0 : index
    %c0_40 = arith.constant 0 : index
    %c0_41 = arith.constant 0 : index
    %67 = vector.load %arg5[%c0_39, %c0_40, %c0_41] : memref<4x16x98xbf16, #tpu.memory_space<vmem>>, vector<1x16x98xbf16>
    %68 = vector.shape_cast %67 : vector<1x16x98xbf16> to vector<16x98xbf16>
    %69 = vector.shape_cast %66 : vector<16x98xbf16> to vector<1x16x98xbf16>
    tpu.vector_store %arg5[%c0_39, %c0_40, %c0_41], %69 {strides = array<i32>} : memref<4x16x98xbf16, #tpu.memory_space<vmem>>, vector<1x16x98xbf16>,
    %70 = vector.broadcast %56 : vector<16x1xf32> to vector<16x98xf32>
    %71 = arith.mulf %14, %70 : vector<16x98xf32>
    %72 = vector.broadcast %59 : vector<16x1xf32> to vector<16x98xf32>
    %73 = arith.addf %71, %72 : vector<16x98xf32>
    %cst_42 = arith.constant 0.000000e+00 : f32
    %74 = vector.broadcast %cst_42 : f32 to vector<16x98xf32>
    %75 = arith.maximumf %73, %74 : vector<16x98xf32>
    %76 = arith.truncf %75 : vector<16x98xf32> to vector<16x98xbf16>
    %c1_43 = arith.constant 1 : index
    %c0_44 = arith.constant 0 : index
    %c0_45 = arith.constant 0 : index
    %77 = vector.load %arg5[%c1_43, %c0_44, %c0_45] : memref<4x16x98xbf16, #tpu.memory_space<vmem>>, vector<1x16x98xbf16>
    %78 = vector.shape_cast %77 : vector<1x16x98xbf16> to vector<16x98xbf16>
    %79 = vector.shape_cast %76 : vector<16x98xbf16> to vector<1x16x98xbf16>
    tpu.vector_store %arg5[%c1_43, %c0_44, %c0_45], %79 {strides = array<i32>} : memref<4x16x98xbf16, #tpu.memory_space<vmem>>, vector<1x16x98xbf16>,
    %80 = vector.broadcast %56 : vector<16x1xf32> to vector<16x98xf32>
    %81 = arith.mulf %26, %80 : vector<16x98xf32>
    %82 = vector.broadcast %59 : vector<16x1xf32> to vector<16x98xf32>
    %83 = arith.addf %81, %82 : vector<16x98xf32>
    %cst_46 = arith.constant 0.000000e+00 : f32
    %84 = vector.broadcast %cst_46 : f32 to vector<16x98xf32>
    %85 = arith.maximumf %83, %84 : vector<16x98xf32>
    %86 = arith.truncf %85 : vector<16x98xf32> to vector<16x98xbf16>
    %c2_47 = arith.constant 2 : index
    %c0_48 = arith.constant 0 : index
    %c0_49 = arith.constant 0 : index
    %87 = vector.load %arg5[%c2_47, %c0_48, %c0_49] : memref<4x16x98xbf16, #tpu.memory_space<vmem>>, vector<1x16x98xbf16>
    %88 = vector.shape_cast %87 : vector<1x16x98xbf16> to vector<16x98xbf16>
    %89 = vector.shape_cast %86 : vector<16x98xbf16> to vector<1x16x98xbf16>
    tpu.vector_store %arg5[%c2_47, %c0_48, %c0_49], %89 {strides = array<i32>} : memref<4x16x98xbf16, #tpu.memory_space<vmem>>, vector<1x16x98xbf16>,
    %90 = vector.broadcast %56 : vector<16x1xf32> to vector<16x98xf32>
    %91 = arith.mulf %38, %90 : vector<16x98xf32>
    %92 = vector.broadcast %59 : vector<16x1xf32> to vector<16x98xf32>
    %93 = arith.addf %91, %92 : vector<16x98xf32>
    %cst_50 = arith.constant 0.000000e+00 : f32
    %94 = vector.broadcast %cst_50 : f32 to vector<16x98xf32>
    %95 = arith.maximumf %93, %94 : vector<16x98xf32>
    %96 = arith.truncf %95 : vector<16x98xf32> to vector<16x98xbf16>
    %c3_51 = arith.constant 3 : index
    %c0_52 = arith.constant 0 : index
    %c0_53 = arith.constant 0 : index
    %97 = vector.load %arg5[%c3_51, %c0_52, %c0_53] : memref<4x16x98xbf16, #tpu.memory_space<vmem>>, vector<1x16x98xbf16>
    %98 = vector.shape_cast %97 : vector<1x16x98xbf16> to vector<16x98xbf16>
    %99 = vector.shape_cast %96 : vector<16x98xbf16> to vector<1x16x98xbf16>
    tpu.vector_store %arg5[%c3_51, %c0_52, %c0_53], %99 {strides = array<i32>} : memref<4x16x98xbf16, #tpu.memory_space<vmem>>, vector<1x16x98xbf16>,
    return
  }
  func.func @transform_0(%arg0: i32) -> (i32, i32, i32) {
    %c0_i32 = arith.constant 0 : i32
    %c0_i32_0 = arith.constant 0 : i32
    %c0_i32_1 = arith.constant 0 : i32
    %c0_i32_2 = arith.constant 0 : i32
    return %c0_i32, %c0_i32_0, %c0_i32_1 : i32, i32, i32
  }
  func.func @transform_1(%arg0: i32) -> (i32, i32, i32) {
    %c0_i32 = arith.constant 0 : i32
    %c0_i32_0 = arith.constant 0 : i32
    %c0_i32_1 = arith.constant 0 : i32
    %c0_i32_2 = arith.constant 0 : i32
    return %c0_i32, %c0_i32_0, %c0_i32_1 : i32, i32, i32
  }
  func.func @transform_2(%arg0: i32) -> (i32, i32) {
    %c0_i32 = arith.constant 0 : i32
    %c0_i32_0 = arith.constant 0 : i32
    %c0_i32_1 = arith.constant 0 : i32
    return %c0_i32, %c0_i32_0 : i32, i32
  }
  func.func @transform_3(%arg0: i32) -> (i32, i32) {
    %c0_i32 = arith.constant 0 : i32
    %c0_i32_0 = arith.constant 0 : i32
    %c0_i32_1 = arith.constant 0 : i32
    return %c0_i32, %c0_i32_0 : i32, i32
  }
  func.func @transform_4(%arg0: i32) -> (i32, i32, i32) {
    %c0_i32 = arith.constant 0 : i32
    %c0_i32_0 = arith.constant 0 : i32
    %c0_i32_1 = arith.constant 0 : i32
    %c0_i32_2 = arith.constant 0 : i32
    return %c0_i32, %c0_i32_0, %c0_i32_1 : i32, i32, i32
  }
}

module attributes {stable_mosaic.version = 11 : i64} {
  func.func @conv_sigmoid_kernel(%arg0: i32, %arg1: memref<4x64x392xbf16, #tpu.memory_space<vmem>>, %arg2: memref<4x1x64xbf16, #tpu.memory_space<vmem>>, %arg3: memref<4x1x392xf32, #tpu.memory_space<vmem>>) attributes {dimension_semantics = [#tpu.dimension_semantics<arbitrary>], iteration_bounds = array<i64: 1>, scalar_prefetch = 0 : i64, scratch_operands = 0 : i64, tpu.core_type = #tpu.core_type<tc>, window_params = [{pipeline_mode = #tpu.pipeline_mode<synchronous>, transform_indices = @transform_0, window_bounds = array<i64: 4, 64, 392>}, {pipeline_mode = #tpu.pipeline_mode<synchronous>, transform_indices = @transform_1, window_bounds = array<i64: 4, 1, 64>}, {pipeline_mode = #tpu.pipeline_mode<synchronous>, transform_indices = @transform_2, window_bounds = array<i64: 4, 1, 392>}]} {
    %c0 = arith.constant 0 : index
    %c0_0 = arith.constant 0 : index
    %c0_1 = arith.constant 0 : index
    %0 = vector.load %arg2[%c0, %c0_0, %c0_1] : memref<4x1x64xbf16, #tpu.memory_space<vmem>>, vector<1x1x64xbf16>
    %1 = vector.shape_cast %0 : vector<1x1x64xbf16> to vector<1x64xbf16>
    %c0_2 = arith.constant 0 : index
    %c0_3 = arith.constant 0 : index
    %c0_4 = arith.constant 0 : index
    %2 = vector.load %arg1[%c0_2, %c0_3, %c0_4] : memref<4x64x392xbf16, #tpu.memory_space<vmem>>, vector<1x64x392xbf16>
    %3 = vector.shape_cast %2 : vector<1x64x392xbf16> to vector<64x392xbf16>
    %cst = arith.constant dense<0.000000e+00> : vector<1x392xf32>
    %4 = tpu.matmul %1, %3, %cst {dimension_numbers = #tpu.dot_dimension_numbers<[1], [0], [0], [1], [0, 0, 1, 1], [], []>} : vector<1x64xbf16>, vector<64x392xbf16>, vector<1x392xf32> -> vector<1x392xf32>
    %cst_5 = arith.constant 0.000000e+00 : f32
    %5 = vector.broadcast %cst_5 : f32 to vector<1x392xf32>
    %6 = arith.subf %5, %4 : vector<1x392xf32>
    %7 = math.exp %6 : vector<1x392xf32>
    %cst_6 = arith.constant 1.000000e+00 : f32
    %8 = vector.broadcast %cst_6 : f32 to vector<1x392xf32>
    %9 = arith.addf %8, %7 : vector<1x392xf32>
    %cst_7 = arith.constant 1.000000e+00 : f32
    %10 = vector.broadcast %cst_7 : f32 to vector<1x392xf32>
    %11 = arith.divf %10, %9 : vector<1x392xf32>
    %c0_8 = arith.constant 0 : index
    %c0_9 = arith.constant 0 : index
    %c0_10 = arith.constant 0 : index
    %12 = vector.load %arg3[%c0_8, %c0_9, %c0_10] : memref<4x1x392xf32, #tpu.memory_space<vmem>>, vector<1x1x392xf32>
    %13 = vector.shape_cast %12 : vector<1x1x392xf32> to vector<1x392xf32>
    %14 = vector.shape_cast %11 : vector<1x392xf32> to vector<1x1x392xf32>
    tpu.vector_store %arg3[%c0_8, %c0_9, %c0_10], %14 {strides = array<i32>} : memref<4x1x392xf32, #tpu.memory_space<vmem>>, vector<1x1x392xf32>,
    %c1 = arith.constant 1 : index
    %c0_11 = arith.constant 0 : index
    %c0_12 = arith.constant 0 : index
    %15 = vector.load %arg2[%c1, %c0_11, %c0_12] : memref<4x1x64xbf16, #tpu.memory_space<vmem>>, vector<1x1x64xbf16>
    %16 = vector.shape_cast %15 : vector<1x1x64xbf16> to vector<1x64xbf16>
    %c1_13 = arith.constant 1 : index
    %c0_14 = arith.constant 0 : index
    %c0_15 = arith.constant 0 : index
    %17 = vector.load %arg1[%c1_13, %c0_14, %c0_15] : memref<4x64x392xbf16, #tpu.memory_space<vmem>>, vector<1x64x392xbf16>
    %18 = vector.shape_cast %17 : vector<1x64x392xbf16> to vector<64x392xbf16>
    %cst_16 = arith.constant dense<0.000000e+00> : vector<1x392xf32>
    %19 = tpu.matmul %16, %18, %cst_16 {dimension_numbers = #tpu.dot_dimension_numbers<[1], [0], [0], [1], [0, 0, 1, 1], [], []>} : vector<1x64xbf16>, vector<64x392xbf16>, vector<1x392xf32> -> vector<1x392xf32>
    %cst_17 = arith.constant 0.000000e+00 : f32
    %20 = vector.broadcast %cst_17 : f32 to vector<1x392xf32>
    %21 = arith.subf %20, %19 : vector<1x392xf32>
    %22 = math.exp %21 : vector<1x392xf32>
    %cst_18 = arith.constant 1.000000e+00 : f32
    %23 = vector.broadcast %cst_18 : f32 to vector<1x392xf32>
    %24 = arith.addf %23, %22 : vector<1x392xf32>
    %cst_19 = arith.constant 1.000000e+00 : f32
    %25 = vector.broadcast %cst_19 : f32 to vector<1x392xf32>
    %26 = arith.divf %25, %24 : vector<1x392xf32>
    %c1_20 = arith.constant 1 : index
    %c0_21 = arith.constant 0 : index
    %c0_22 = arith.constant 0 : index
    %27 = vector.load %arg3[%c1_20, %c0_21, %c0_22] : memref<4x1x392xf32, #tpu.memory_space<vmem>>, vector<1x1x392xf32>
    %28 = vector.shape_cast %27 : vector<1x1x392xf32> to vector<1x392xf32>
    %29 = vector.shape_cast %26 : vector<1x392xf32> to vector<1x1x392xf32>
    tpu.vector_store %arg3[%c1_20, %c0_21, %c0_22], %29 {strides = array<i32>} : memref<4x1x392xf32, #tpu.memory_space<vmem>>, vector<1x1x392xf32>,
    %c2 = arith.constant 2 : index
    %c0_23 = arith.constant 0 : index
    %c0_24 = arith.constant 0 : index
    %30 = vector.load %arg2[%c2, %c0_23, %c0_24] : memref<4x1x64xbf16, #tpu.memory_space<vmem>>, vector<1x1x64xbf16>
    %31 = vector.shape_cast %30 : vector<1x1x64xbf16> to vector<1x64xbf16>
    %c2_25 = arith.constant 2 : index
    %c0_26 = arith.constant 0 : index
    %c0_27 = arith.constant 0 : index
    %32 = vector.load %arg1[%c2_25, %c0_26, %c0_27] : memref<4x64x392xbf16, #tpu.memory_space<vmem>>, vector<1x64x392xbf16>
    %33 = vector.shape_cast %32 : vector<1x64x392xbf16> to vector<64x392xbf16>
    %cst_28 = arith.constant dense<0.000000e+00> : vector<1x392xf32>
    %34 = tpu.matmul %31, %33, %cst_28 {dimension_numbers = #tpu.dot_dimension_numbers<[1], [0], [0], [1], [0, 0, 1, 1], [], []>} : vector<1x64xbf16>, vector<64x392xbf16>, vector<1x392xf32> -> vector<1x392xf32>
    %cst_29 = arith.constant 0.000000e+00 : f32
    %35 = vector.broadcast %cst_29 : f32 to vector<1x392xf32>
    %36 = arith.subf %35, %34 : vector<1x392xf32>
    %37 = math.exp %36 : vector<1x392xf32>
    %cst_30 = arith.constant 1.000000e+00 : f32
    %38 = vector.broadcast %cst_30 : f32 to vector<1x392xf32>
    %39 = arith.addf %38, %37 : vector<1x392xf32>
    %cst_31 = arith.constant 1.000000e+00 : f32
    %40 = vector.broadcast %cst_31 : f32 to vector<1x392xf32>
    %41 = arith.divf %40, %39 : vector<1x392xf32>
    %c2_32 = arith.constant 2 : index
    %c0_33 = arith.constant 0 : index
    %c0_34 = arith.constant 0 : index
    %42 = vector.load %arg3[%c2_32, %c0_33, %c0_34] : memref<4x1x392xf32, #tpu.memory_space<vmem>>, vector<1x1x392xf32>
    %43 = vector.shape_cast %42 : vector<1x1x392xf32> to vector<1x392xf32>
    %44 = vector.shape_cast %41 : vector<1x392xf32> to vector<1x1x392xf32>
    tpu.vector_store %arg3[%c2_32, %c0_33, %c0_34], %44 {strides = array<i32>} : memref<4x1x392xf32, #tpu.memory_space<vmem>>, vector<1x1x392xf32>,
    %c3 = arith.constant 3 : index
    %c0_35 = arith.constant 0 : index
    %c0_36 = arith.constant 0 : index
    %45 = vector.load %arg2[%c3, %c0_35, %c0_36] : memref<4x1x64xbf16, #tpu.memory_space<vmem>>, vector<1x1x64xbf16>
    %46 = vector.shape_cast %45 : vector<1x1x64xbf16> to vector<1x64xbf16>
    %c3_37 = arith.constant 3 : index
    %c0_38 = arith.constant 0 : index
    %c0_39 = arith.constant 0 : index
    %47 = vector.load %arg1[%c3_37, %c0_38, %c0_39] : memref<4x64x392xbf16, #tpu.memory_space<vmem>>, vector<1x64x392xbf16>
    %48 = vector.shape_cast %47 : vector<1x64x392xbf16> to vector<64x392xbf16>
    %cst_40 = arith.constant dense<0.000000e+00> : vector<1x392xf32>
    %49 = tpu.matmul %46, %48, %cst_40 {dimension_numbers = #tpu.dot_dimension_numbers<[1], [0], [0], [1], [0, 0, 1, 1], [], []>} : vector<1x64xbf16>, vector<64x392xbf16>, vector<1x392xf32> -> vector<1x392xf32>
    %cst_41 = arith.constant 0.000000e+00 : f32
    %50 = vector.broadcast %cst_41 : f32 to vector<1x392xf32>
    %51 = arith.subf %50, %49 : vector<1x392xf32>
    %52 = math.exp %51 : vector<1x392xf32>
    %cst_42 = arith.constant 1.000000e+00 : f32
    %53 = vector.broadcast %cst_42 : f32 to vector<1x392xf32>
    %54 = arith.addf %53, %52 : vector<1x392xf32>
    %cst_43 = arith.constant 1.000000e+00 : f32
    %55 = vector.broadcast %cst_43 : f32 to vector<1x392xf32>
    %56 = arith.divf %55, %54 : vector<1x392xf32>
    %c3_44 = arith.constant 3 : index
    %c0_45 = arith.constant 0 : index
    %c0_46 = arith.constant 0 : index
    %57 = vector.load %arg3[%c3_44, %c0_45, %c0_46] : memref<4x1x392xf32, #tpu.memory_space<vmem>>, vector<1x1x392xf32>
    %58 = vector.shape_cast %57 : vector<1x1x392xf32> to vector<1x392xf32>
    %59 = vector.shape_cast %56 : vector<1x392xf32> to vector<1x1x392xf32>
    tpu.vector_store %arg3[%c3_44, %c0_45, %c0_46], %59 {strides = array<i32>} : memref<4x1x392xf32, #tpu.memory_space<vmem>>, vector<1x1x392xf32>,
    return
  }
  func.func @transform_0(%arg0: i32) -> (i32, i32, i32) {
    %c0_i32 = arith.constant 0 : i32
    %c0_i32_0 = arith.constant 0 : i32
    %c0_i32_1 = arith.constant 0 : i32
    %c0_i32_2 = arith.constant 0 : i32
    return %c0_i32, %c0_i32_0, %c0_i32_1 : i32, i32, i32
  }
  func.func @transform_1(%arg0: i32) -> (i32, i32, i32) {
    %c0_i32 = arith.constant 0 : i32
    %c0_i32_0 = arith.constant 0 : i32
    %c0_i32_1 = arith.constant 0 : i32
    %c0_i32_2 = arith.constant 0 : i32
    return %c0_i32, %c0_i32_0, %c0_i32_1 : i32, i32, i32
  }
  func.func @transform_2(%arg0: i32) -> (i32, i32, i32) {
    %c0_i32 = arith.constant 0 : i32
    %c0_i32_0 = arith.constant 0 : i32
    %c0_i32_1 = arith.constant 0 : i32
    %c0_i32_2 = arith.constant 0 : i32
    return %c0_i32, %c0_i32_0, %c0_i32_1 : i32, i32, i32
  }
}

</mosaic_0001>

<bundles_post_ra>
// kernel: cnn_decoder_forward.5
= control target key start
LH: loop header
LB: loop body
LE: loop exit
PB: predicated region body
PF: predicated region fallthrough
CT: control target
= control target key end

     0   :  { %vm219_vm0 = vcmask 261120   ;;  %vm1077_vm1 = vcmask 257024   ;;  %s2110_s0 = inlined_call_operand.vmem [shape: bf16[4,256,32], index: 0, kind: input, shape index: {}]   ;;  %s2111_s1 = inlined_call_operand.vmem [shape: bf16[4,32,256], index: 1, kind: input, shape index: {}]   ;;  %s2112_s2 = inlined_call_operand.vmem [shape: f32[32,1], index: 2, kind: input, shape index: {}]   ;;  %s2113_s3 = inlined_call_operand.vmem [shape: f32[32,1], index: 3, kind: input, shape index: {}]   ;;  %s2114_s4 = inlined_call_operand.vmem [shape: bf16[4,32,32], index: 4, kind: output, shape index: {}]  }
   0x1   :  { %v1532_v0 = vld [vmem:[%s2110_s0 + $0x40] sm:$0xff]   ;;  %v1536_v4 = vld [vmem:[%s2110_s0 + $0x48] sm:$0xff]   ;;  %v1540_v8 = vld [vmem:[%s2110_s0 + $0x50] sm:$0xff]  }
   0x2   :  { %v1533_v1 = vld [vmem:[%s2110_s0 + $0xc0] sm:$0xff]   ;;  %1417 = vmatprep.subr.bf16.mxu0 %v1532_v0  ;;  %v1537_v5 = vld [vmem:[%s2110_s0 + $0xc8] sm:$0xff]   ;;  %v1541_v9 = vld [vmem:[%s2110_s0 + $0xd0] sm:$0xff]  }
   0x3   :  { %v1534_v2 = vld [vmem:[%s2110_s0] sm:$0xff]   ;;  %1445 = vmatprep.subr.bf16.mxu1 %v1533_v1  ;;  %v1538_v6 = vld [vmem:[%s2110_s0 + $0x8] sm:$0xff]   ;;  %v1542_v10 = vld [vmem:[%s2110_s0 + $0x10] sm:$0xff]  }
   0x4   :  { %v1535_v3 = vld [vmem:[%s2110_s0 + $0x80] sm:$0xff]   ;;  %1418 = vmatpush3.bf16.msra.mxu0 %v1534_v2  ;;  %v1539_v7 = vld [vmem:[%s2110_s0 + $0x88] sm:$0xff]   ;;  %v1543_v11 = vld [vmem:[%s2110_s0 + $0x90] sm:$0xff]  }
   0x5   :  { %1446 = vmatpush3.bf16.msra.mxu1 %v1535_v3  ;;  %1419 = vmatprep.subr.bf16.mxu0 %v1536_v4  ;;  %v1544_v12 = vld [vmem:[%s2110_s0 + $0x58] sm:$0xff]   ;;  %v1548_v16 = vld [vmem:[%s2110_s0 + $0x60] sm:$0xff]   ;;  %v1552_v20 = vld [vmem:[%s2110_s0 + $0x68] sm:$0xff]  }
   0x6   :  { %1447 = vmatprep.subr.bf16.mxu1 %v1537_v5  ;;  %v1545_v13 = vld [vmem:[%s2110_s0 + $0xd8] sm:$0xff]   ;;  %v1549_v17 = vld [vmem:[%s2110_s0 + $0xe0] sm:$0xff]   ;;  %v1553_v21 = vld [vmem:[%s2110_s0 + $0xe8] sm:$0xff]  }
   0x7   :  { %v1546_v14 = vld [vmem:[%s2110_s0 + $0x18] sm:$0xff]   ;;  %v1550_v18 = vld [vmem:[%s2110_s0 + $0x20] sm:$0xff]   ;;  %v1554_v22 = vld [vmem:[%s2110_s0 + $0x28] sm:$0xff]  }
   0x8   :  { %1420 = vmatpush3.bf16.msra.mxu0 %v1538_v6  ;;  %v1547_v15 = vld [vmem:[%s2110_s0 + $0x98] sm:$0xff]   ;;  %v1551_v19 = vld [vmem:[%s2110_s0 + $0xa0] sm:$0xff]   ;;  %v1555_v23 = vld [vmem:[%s2110_s0 + $0xa8] sm:$0xff]  }
   0x9   :  { %1448 = vmatpush3.bf16.msra.mxu1 %v1539_v7  ;;  %1421 = vmatprep.subr.bf16.mxu0 %v1540_v8  ;;  %v1556_v24 = vld [vmem:[%s2110_s0 + $0x70] sm:$0xff]   ;;  %v1560_v28 = vld [vmem:[%s2110_s0 + $0x78] sm:$0xff]   ;;  %v1564_v32 = vld [vmem:[%s2111_s1] ss:$8 sps:$4 sm:$0xff]  }
   0xa   :  { %1449 = vmatprep.subr.bf16.mxu1 %v1541_v9  ;;  %v1557_v25 = vld [vmem:[%s2110_s0 + $0xf0] sm:$0xff]   ;;  %v1561_v29 = vld [vmem:[%s2110_s0 + $0xf8] sm:$0xff]   ;;  %v1566_v33 = vld [vmem:[%s2111_s1 + $0x4] ss:$8 sps:$4 sm:$0xff]  }
   0xb   :  { %v1558_v26 = vld [vmem:[%s2110_s0 + $0x30] sm:$0xff]   ;;  %v1562_v30 = vld [vmem:[%s2110_s0 + $0x38] sm:$0xff]   ;;  %v1567_v34 = vld [vmem:[%s2111_s1 + $0x20] ss:$8 sps:$4 sm:$0xff]   ;;  %202 = vmatprep.mubr.bf16.mxu0 %v1566_v33 }
   0xc   :  { %1422 = vmatpush3.bf16.msra.mxu0 %v1542_v10  ;;  %v1559_v27 = vld [vmem:[%s2110_s0 + $0xb0] sm:$0xff]   ;;  %v1563_v31 = vld [vmem:[%s2110_s0 + $0xb8] sm:$0xff]   ;;  %v1569_v35 = vld [vmem:[%s2111_s1 + $0x24] ss:$8 sps:$4 sm:$0xff]  }
   0xd   :  { %1450 = vmatpush3.bf16.msra.mxu1 %v1543_v11  ;;  %1423 = vmatprep.subr.bf16.mxu0 %v1544_v12  ;;  %v1570_v36 = vld [vmem:[%s2110_s0 + $0x140] sm:$0xff]   ;;  %v1574_v40 = vld [vmem:[%s2110_s0 + $0x148] sm:$0xff]   ;;  %v1578_v44 = vld [vmem:[%s2110_s0 + $0x150] sm:$0xff]  }
   0xe   :  { %1451 = vmatprep.subr.bf16.mxu1 %v1545_v13  ;;  %434 = vmatprep.mubr.bf16.mxu1 %v1569_v35  ;;  %v1571_v37 = vld [vmem:[%s2110_s0 + $0x100] sm:$0xff]   ;;  %v1575_v41 = vld [vmem:[%s2110_s0 + $0x108] sm:$0xff]   ;;  %v1579_v45 = vld [vmem:[%s2110_s0 + $0x110] sm:$0xff]  }
   0xf   :  { %v1572_v38 = vld [vmem:[%s2110_s0 + $0x1c0] sm:$0xff]   ;;  %v1576_v42 = vld [vmem:[%s2110_s0 + $0x1c8] sm:$0xff]   ;;  %v1580_v46 = vld [vmem:[%s2110_s0 + $0x1d0] sm:$0xff]  }
  0x10   :  { %1424 = vmatpush3.bf16.msra.mxu0 %v1546_v14  ;;  %v1573_v39 = vld [vmem:[%s2110_s0 + $0x180] sm:$0xff]   ;;  %v1577_v43 = vld [vmem:[%s2110_s0 + $0x188] sm:$0xff]   ;;  %v1581_v47 = vld [vmem:[%s2110_s0 + $0x190] sm:$0xff]  }
  0x11   :  { %1452 = vmatpush3.bf16.msra.mxu1 %v1547_v15  ;;  %1425 = vmatprep.subr.bf16.mxu0 %v1548_v16  ;;  %v1582_v48 = vld [vmem:[%s2111_s1 + $0x14] ss:$8 sps:$4 sm:$0xff]   ;;  %v1585_v50 = vld [vmem:[%s2111_s1 + $0x10] ss:$8 sps:$4 sm:$0xff]   ;;  %v1591_v55 = vld [vmem:[%s2110_s0 + $0x160] sm:$0xff]  }
  0x12   :  { %1453 = vmatprep.subr.bf16.mxu1 %v1549_v17  ;;  %v1584_v49 = vld [vmem:[%s2110_s0 + $0x158] sm:$0xff]   ;;  %v1593_v57 = vld [vmem:[%s2110_s0 + $0x120] sm:$0xff]   ;;  %v1596_v60 = vld [vmem:[%s2110_s0 + $0x168] sm:$0xff]  }
  0x13   :  { %v1586_v51 = vld [vmem:[%s2110_s0 + $0x118] sm:$0xff]   ;;  %v1594_v58 = vld [vmem:[%s2110_s0 + $0x1e0] sm:$0xff]   ;;  %v1597_v61 = vld [vmem:[%s2110_s0 + $0x128] sm:$0xff]  }
  0x14   :  { %1426 = vmatpush3.bf16.msra.mxu0 %v1550_v18  ;;  %v1587_v52 = vld [vmem:[%s2110_s0 + $0x1d8] sm:$0xff]   ;;  %v1595_v59 = vld [vmem:[%s2110_s0 + $0x1a0] sm:$0xff]   ;;  %v1598_v62 = vld [vmem:[%s2110_s0 + $0x1e8] sm:$0xff]  }
  0x15   :  { %1454 = vmatpush3.bf16.msra.mxu1 %v1551_v19  ;;  %1427 = vmatprep.subr.bf16.mxu0 %v1552_v20  ;;  %v1588_v53 = vld [vmem:[%s2110_s0 + $0x198] sm:$0xff]   ;;  %v1599_v63 = vld [vmem:[%s2110_s0 + $0x1a8] sm:$0xff]   ;;  %v1600_v0 = vld [vmem:[%s2110_s0 + $0x170] sm:$0xff]  }
  0x16   :  { %1455 = vmatprep.subr.bf16.mxu1 %v1553_v21  ;;  %v1589_v54 = vld [vmem:[%s2111_s1 + $0x34] ss:$8 sps:$4 sm:$0xff]   ;;  %v1592_v56 = vld [vmem:[%s2111_s1 + $0x30] ss:$8 sps:$4 sm:$0xff]   ;;  %v1608_v8 = vld [vmem:[%s2111_s1 + $0x40] ss:$8 sps:$4 sm:$0xff]  }
  0x17   :  { %v1601_v1 = vld [vmem:[%s2110_s0 + $0x130] sm:$0xff]   ;;  %v1604_v4 = vld [vmem:[%s2110_s0 + $0x178] sm:$0xff]   ;;  %v1610_v9 = vld [vmem:[%s2111_s1 + $0x44] ss:$8 sps:$4 sm:$0xff]  }
  0x18   :  { %1428 = vmatpush3.bf16.msra.mxu0 %v1554_v22  ;;  %v1602_v2 = vld [vmem:[%s2110_s0 + $0x1f0] sm:$0xff]   ;;  %v1605_v5 = vld [vmem:[%s2110_s0 + $0x138] sm:$0xff]   ;;  %v1611_v10 = vld [vmem:[%s2111_s1 + $0x60] ss:$8 sps:$4 sm:$0xff]  }
  0x19   :  { %1456 = vmatpush3.bf16.msra.mxu1 %v1555_v23  ;;  %1429 = vmatprep.subr.bf16.mxu0 %v1556_v24  ;;  %v1603_v3 = vld [vmem:[%s2110_s0 + $0x1b0] sm:$0xff]   ;;  %v1606_v6 = vld [vmem:[%s2110_s0 + $0x1f8] sm:$0xff]   ;;  %v1613_v11 = vld [vmem:[%s2111_s1 + $0x64] ss:$8 sps:$4 sm:$0xff]  }
  0x1a   :  { %1457 = vmatprep.subr.bf16.mxu1 %v1557_v25  ;;  %v1607_v7 = vld [vmem:[%s2110_s0 + $0x1b8] sm:$0xff]  }
  0x1b   :  { %v1614_v12 = vld [vmem:[%s2111_s1 + $0x54] ss:$8 sps:$4 sm:$0xff]   ;;  %v1616_v14 = vld [vmem:[%s2111_s1 + $0x50] ss:$8 sps:$4 sm:$0xff]  }
  0x1c   :  { %1430 = vmatpush3.bf16.msra.mxu0 %v1558_v26  ;;  %v1617_v13 = vld [vmem:[%s2111_s1 + $0x74] ss:$8 sps:$4 sm:$0xff]   ;;  %v1619_v15 = vld [vmem:[%s2111_s1 + $0x70] ss:$8 sps:$4 sm:$0xff]  }
  0x1d   :  { %1458 = vmatpush3.bf16.msra.mxu1 %v1559_v27  ;;  %1431 = vmatprep.subr.bf16.mxu0 %v1560_v28 }
  0x1e   :  { %1459 = vmatprep.subr.bf16.mxu1 %v1561_v29 }
  0x20   :  { %1432 = vmatpush3.bf16.msra.mxu0 %v1562_v30 }
  0x21   :  { %1460 = vmatpush3.bf16.msra.mxu1 %v1563_v31  ;;  %1473 = vmatprep.subr.bf16.mxu0 %v1570_v36 }
  0x22   :  { %1501 = vmatprep.subr.bf16.mxu1 %v1572_v38 }
  0x23   :  { %203 = vmatmul.mubr.bf16.vlgmr.msra.gmra.mrb[0].mxu0 %v1564_v32 }
  0x24   :  { %435 = vmatmul.mubr.bf16.vlgmr.msra.gmra.mrb[0].mxu1 %v1567_v34  ;;  %1474 = vmatpush3.bf16.msra.mxu0 %v1571_v37 }
  0x25   :  { %1502 = vmatpush3.bf16.msra.mxu1 %v1573_v39  ;;  %1475 = vmatprep.subr.bf16.mxu0 %v1574_v40 }
  0x26   :  { %1503 = vmatprep.subr.bf16.mxu1 %v1576_v42  ;;  %210 = vmatprep.mubr.bf16.mxu0 %v1582_v48 }
  0x27   :  { %442 = vmatprep.mubr.bf16.mxu1 %v1589_v54 }
  0x28   :  { %1476 = vmatpush3.bf16.msra.mxu0 %v1575_v41 }
  0x29   :  { %1504 = vmatpush3.bf16.msra.mxu1 %v1577_v43  ;;  %1477 = vmatprep.subr.bf16.mxu0 %v1578_v44 }
  0x2a   :  { %1505 = vmatprep.subr.bf16.mxu1 %v1580_v46 }
  0x2b   :  { %211 = vmatmul.mubr.bf16.gmra.mrb[4].mxu0 %v1585_v50 }
  0x2c   :  { %1478 = vmatpush3.bf16.msra.mxu0 %v1579_v45  ;;  %443 = vmatmul.mubr.bf16.gmra.mrb[4].mxu1 %v1592_v56 }
  0x2d   :  { %1506 = vmatpush3.bf16.msra.mxu1 %v1581_v47  ;;  %1479 = vmatprep.subr.bf16.mxu0 %v1584_v49 }
  0x2e   :  { %1507 = vmatprep.subr.bf16.mxu1 %v1587_v52  ;;  %673 = vmatprep.mubr.bf16.mxu0 %v1610_v9 }
  0x2f   :  { %912 = vmatprep.mubr.bf16.mxu1 %v1613_v11 }
  0x30   :  { %1480 = vmatpush3.bf16.msra.mxu0 %v1586_v51 }
  0x31   :  { %1508 = vmatpush3.bf16.msra.mxu1 %v1588_v53  ;;  %1481 = vmatprep.subr.bf16.mxu0 %v1591_v55 }
  0x32   :  { %1509 = vmatprep.subr.bf16.mxu1 %v1594_v58 }
  0x34   :  { %1482 = vmatpush3.bf16.msra.mxu0 %v1593_v57 }
  0x35   :  { %1510 = vmatpush3.bf16.msra.mxu1 %v1595_v59  ;;  %1483 = vmatprep.subr.bf16.mxu0 %v1596_v60 }
  0x36   :  { %1511 = vmatprep.subr.bf16.mxu1 %v1598_v62 }
  0x38   :  { %1484 = vmatpush3.bf16.msra.mxu0 %v1597_v61 }
  0x39   :  { %1512 = vmatpush3.bf16.msra.mxu1 %v1599_v63  ;;  %1485 = vmatprep.subr.bf16.mxu0 %v1600_v0 }
  0x3a   :  { %1513 = vmatprep.subr.bf16.mxu1 %v1602_v2 }
  0x3c   :  { %1486 = vmatpush3.bf16.msra.mxu0 %v1601_v1 }
  0x3d   :  { %1514 = vmatpush3.bf16.msra.mxu1 %v1603_v3  ;;  %1487 = vmatprep.subr.bf16.mxu0 %v1604_v4 }
  0x3e   :  { %1515 = vmatprep.subr.bf16.mxu1 %v1606_v6 }
  0x40   :  { %1488 = vmatpush3.bf16.msra.mxu0 %v1605_v5 }
  0x41   :  { %1516 = vmatpush3.bf16.msra.mxu1 %v1607_v7 }
  0x43   :  { %674 = vmatmul.mubr.bf16.vlgmr.msra.gmra.mrb[8].mxu0 %v1608_v8 }
  0x44   :  { %913 = vmatmul.mubr.bf16.vlgmr.msra.gmra.mrb[8].mxu1 %v1611_v10  ;;  %681 = vmatprep.mubr.bf16.mxu0 %v1614_v12 }
  0x45   :  { %920 = vmatprep.mubr.bf16.mxu1 %v1617_v13 }
  0x4b   :  { %682 = vmatmul.mubr.bf16.gmra.mrb[12].mxu0 %v1616_v14 }
  0x4c   :  { %921 = vmatmul.mubr.bf16.gmra.mrb[12].mxu1 %v1619_v15 }
  0xf6   :  { %v1433_v16 = vpop.f32.mrb[0].mxu0 }
  0xf7   :  { %v1461_v17 = vpop.f32.mrb[0].mxu1  ;;  %v1434_v18 = vpop.f32.mrb[1].mxu0 }
  0xf8   :  { %v1894_v19 = vadd.f32 %v1434_v18, %v1433_v16  ;;  %v1462_v20 = vpop.f32.mrb[1].mxu1  ;;  %v1436_v21 = vpop.f32.mrb[2].mxu0 }
  0xf9   :  { %v1896_v22 = vadd.f32 %v1462_v20, %v1461_v17  ;;  %v1464_v23 = vpop.f32.mrb[2].mxu1  ;;  %v1437_v24 = vpop.f32.mrb[3].mxu0 }
  0xfa   :  { %v1898_v25 = vadd.f32 %v1437_v24, %v1436_v21  ;;  %v1465_v26 = vpop.f32.mrb[3].mxu1  ;;  %v220_v27 = vsel %vm219_vm0, %v1894_v19, 0.0  ;;  %v232_v35 = vmul.f32 %v1894_v19, %v1894_v19 }
  0xfb   :  { %v1902_v28 = vadd.f32 %v1465_v26, %v1464_v23  ;;  %221 = vadd.xlane.f32.xlu0 %v220_v27  ;;  %v451_v31 = vsel %vm219_vm0, %v1896_v22, 0.0  ;;  %v463_v42 = vmul.f32 %v1896_v22, %v1896_v22 }
  0xfc   :  { %v233_v30 = vmul.f32 %v1898_v25, %v1898_v25  ;;  %v223_v34 = vsel %vm219_vm0, %v1898_v25, 0.0  ;;  %v236_v41 = vsel %vm219_vm0, %v232_v35, 0.0 }
  0xfd   :  { %v454_v29 = vsel %vm219_vm0, %v1902_v28, 0.0  ;;  %v464_v33 = vmul.f32 %v1902_v28, %v1902_v28  ;;  %v467_v47 = vsel %vm219_vm0, %v463_v42, 0.0 }
  0xfe   :  { %455 = vadd.xlane.f32.xlu1 %v454_v29  ;;  %v239_v32 = vsel %vm219_vm0, %v233_v30, 0.0  ;;  %v1439_v36 = vpop.f32.mrb[4].mxu0 }
  0xff   :  { %452 = vadd.xlane.f32.xlu0 %v451_v31  ;;  %v1440_v37 = vpop.f32.mrb[5].mxu0  ;;  %v470_v38 = vsel %vm219_vm0, %v464_v33, 0.0  ;;  %v1467_v46 = vpop.f32.mrb[4].mxu1 }
 0x100   :  { %v1918_v39 = vadd.f32 %v1440_v37, %v1439_v36  ;;  %v1442_v40 = vpop.f32.mrb[6].mxu0  ;;  %v1468_v48 = vpop.f32.mrb[5].mxu1 }
 0x101   :  { %v1443_v43 = vpop.f32.mrb[7].mxu0  ;;  %v1928_v49 = vadd.f32 %v1468_v48, %v1467_v46  ;;  %v1470_v50 = vpop.f32.mrb[6].mxu1 }
 0x102   :  { %240 = vadd.xlane.f32.xlu1 %v239_v32  ;;  %v1923_v44 = vadd.f32 %v1443_v43, %v1442_v40  ;;  %v226_v45 = vsel %vm219_vm0, %v1918_v39, 0.0  ;;  %v1471_v51 = vpop.f32.mrb[7].mxu1  ;;  %v234_v55 = vmul.f32 %v1918_v39, %v1918_v39 }
 0x103   :  { %224 = vadd.xlane.f32.xlu0 %v223_v34  ;;  %v1932_v53 = vadd.f32 %v1471_v51, %v1470_v50  ;;  %v457_v54 = vsel %vm219_vm0, %v1928_v49, 0.0  ;;  %v465_v59 = vmul.f32 %v1928_v49, %v1928_v49 }
 0x104   :  { %v229_v52 = vsel %vm219_vm0, %v1923_v44, 0.0  ;;  %v235_v57 = vmul.f32 %v1923_v44, %v1923_v44  ;;  %v242_v58 = vsel %vm219_vm0, %v234_v55, 0.0 }
 0x105   :  { %v460_v56 = vsel %vm219_vm0, %v1932_v53, 0.0  ;;  %v466_v61 = vmul.f32 %v1932_v53, %v1932_v53  ;;  %v473_v62 = vsel %vm219_vm0, %v465_v59, 0.0 }
 0x106   :  { %471 = vadd.xlane.f32.xlu1 %v470_v38  ;;  %v245_v60 = vsel %vm219_vm0, %v235_v57, 0.0 }
 0x107   :  { %237 = vadd.xlane.f32.xlu0 %v236_v41  ;;  %v476_v63 = vsel %vm219_vm0, %v466_v61, 0.0 }
 0x10a   :  { %227 = vadd.xlane.f32.xlu1 %v226_v45 }
 0x10b   :  { %468 = vadd.xlane.f32.xlu0 %v467_v47 }
 0x10e   :  { %230 = vadd.xlane.f32.xlu1 %v229_v52 }
 0x10f   :  { %458 = vadd.xlane.f32.xlu0 %v457_v54 }
 0x112   :  { %461 = vadd.xlane.f32.xlu1 %v460_v56  ;;  %v1628_v56 = vmov 0  }
 0x113   :  { %243 = vadd.xlane.f32.xlu0 %v242_v58  ;;  %1531 = vset.pattern.permute.xlu1 %v1628_v56 }
 0x114   :  { %1530 = vset.pattern.permute.xlu0 %v1628_v56 }
 0x116   :  { %246 = vadd.xlane.f32.xlu1 %v245_v60  ;;  %v1489_v0 = vpop.f32.mrb[8].mxu0 }
 0x117   :  { %474 = vadd.xlane.f32.xlu0 %v473_v62  ;;  %v1490_v1 = vpop.f32.mrb[9].mxu0  ;;  %v1517_v2 = vpop.f32.mrb[8].mxu1 }
 0x118   :  { %v1950_v3 = vadd.f32 %v1490_v1, %v1489_v0  ;;  %v1492_v4 = vpop.f32.mrb[10].mxu0  ;;  %v1518_v5 = vpop.f32.mrb[9].mxu1 }
 0x119   :  { %v1952_v6 = vadd.f32 %v1518_v5, %v1517_v2  ;;  %v1493_v7 = vpop.f32.mrb[11].mxu0  ;;  %v1520_v8 = vpop.f32.mrb[10].mxu1 }
 0x11a   :  { %477 = vadd.xlane.f32.xlu1 %v476_v63  ;;  %v1954_v9 = vadd.f32 %v1493_v7, %v1492_v4  ;;  %v1521_v10 = vpop.f32.mrb[11].mxu1  ;;  %v690_v11 = vsel %vm219_vm0, %v1950_v3, 0.0  ;;  %v702_v16 = vmul.f32 %v1950_v3, %v1950_v3 }
 0x11b   :  { %v1958_v12 = vadd.f32 %v1521_v10, %v1520_v8  ;;  %691 = vadd.xlane.f32.xlu0 %v690_v11  ;;  %v929_v14 = vsel %vm219_vm0, %v1952_v6, 0.0  ;;  %v941_v33 = vmul.f32 %v1952_v6, %v1952_v6 }
 0x11c   :  { %v693_v13 = vsel %vm219_vm0, %v1954_v9, 0.0  ;;  %v703_v24 = vmul.f32 %v1954_v9, %v1954_v9  ;;  %v706_v31 = vsel %vm219_vm0, %v702_v16, 0.0 }
 0x11d   :  { %v932_v20 = vsel %vm219_vm0, %v1958_v12, 0.0  ;;  %v942_v37 = vmul.f32 %v1958_v12, %v1958_v12  ;;  %v945_v38 = vsel %vm219_vm0, %v941_v33, 0.0 }
 0x11e   :  { %694 = vadd.xlane.f32.xlu1 %v693_v13  ;;  %v1495_v15 = vpop.f32.mrb[12].mxu0  ;;  %v709_v36 = vsel %vm219_vm0, %v703_v24, 0.0 }
 0x11f   :  { %930 = vadd.xlane.f32.xlu0 %v929_v14  ;;  %v1496_v17 = vpop.f32.mrb[13].mxu0  ;;  %v1523_v18 = vpop.f32.mrb[12].mxu1  ;;  %v948_v40 = vsel %vm219_vm0, %v942_v37, 0.0 }
 0x120   :  { %v1968_v21 = vadd.f32 %v1496_v17, %v1495_v15  ;;  %v1498_v23 = vpop.f32.mrb[14].mxu0  ;;  %v1524_v26 = vpop.f32.mrb[13].mxu1 }
 0x121   :  { %v1499_v27 = vpop.f32.mrb[15].mxu0  ;;  %v1972_v29 = vadd.f32 %v1524_v26, %v1523_v18  ;;  %v1526_v30 = vpop.f32.mrb[14].mxu1 }
 0x122   :  { %933 = vadd.xlane.f32.xlu1 %v932_v20  ;;  %v1975_v32 = vadd.f32 %v1499_v27, %v1498_v23  ;;  %v1527_v34 = vpop.f32.mrb[15].mxu1  ;;  %v696_v41 = vsel %vm219_vm0, %v1968_v21, 0.0  ;;  %v704_v45 = vmul.f32 %v1968_v21, %v1968_v21 }
 0x123   :  { %707 = vadd.xlane.f32.xlu0 %v706_v31  ;;  %v1979_v35 = vadd.f32 %v1527_v34, %v1526_v30  ;;  %v935_v43 = vsel %vm219_vm0, %v1972_v29, 0.0  ;;  %v943_v50 = vmul.f32 %v1972_v29, %v1972_v29 }
 0x124   :  { %v699_v42 = vsel %vm219_vm0, %v1975_v32, 0.0  ;;  %v705_v47 = vmul.f32 %v1975_v32, %v1975_v32  ;;  %v712_v48 = vsel %vm219_vm0, %v704_v45, 0.0 }
 0x125   :  { %v938_v46 = vsel %vm219_vm0, %v1979_v35, 0.0  ;;  %v944_v52 = vmul.f32 %v1979_v35, %v1979_v35  ;;  %v951_v54 = vsel %vm219_vm0, %v943_v50, 0.0 }
 0x126   :  { %710 = vadd.xlane.f32.xlu1 %v709_v36  ;;  %v715_v51 = vsel %vm219_vm0, %v705_v47, 0.0 }
 0x127   :  { %946 = vadd.xlane.f32.xlu0 %v945_v38  ;;  %v954_v55 = vsel %vm219_vm0, %v944_v52, 0.0 }
 0x12a   :  { %949 = vadd.xlane.f32.xlu1 %v948_v40 }
 0x12b   :  { %697 = vadd.xlane.f32.xlu0 %v696_v41 }
 0x12e   :  { %700 = vadd.xlane.f32.xlu1 %v699_v42 }
 0x12f   :  { %936 = vadd.xlane.f32.xlu0 %v935_v43 }
 0x132   :  { %939 = vadd.xlane.f32.xlu1 %v938_v46 }
 0x133   :  { %713 = vadd.xlane.f32.xlu0 %v712_v48 }
 0x136   :  { %716 = vadd.xlane.f32.xlu1 %v715_v51 }
 0x137   :  { %952 = vadd.xlane.f32.xlu0 %v951_v54 }
 0x13a   :  { %955 = vadd.xlane.f32.xlu1 %v954_v55 }
 0x188   :  { %v222_v57 = vpop.xlane.xlu0 %221 }
 0x18b   :  { %v456_v58 = vpop.xlane.xlu1 %455 }
 0x18c   :  { %v453_v59 = vpop.xlane.xlu0 %452 }
 0x18d   :  { %v479_v15 = vadd.f32 %v453_v59, %v222_v57 }
 0x18f   :  { %v241_v60 = vpop.xlane.xlu1 %240 }
 0x190   :  { %v225_v61 = vpop.xlane.xlu0 %224 }
 0x191   :  { %v480_v17 = vadd.f32 %v456_v58, %v225_v61 }
 0x193   :  { %v472_v62 = vpop.xlane.xlu1 %471 }
 0x194   :  { %v238_v63 = vpop.xlane.xlu0 %237  ;;  %v484_v33 = vadd.f32 %v472_v62, %v241_v60 }
 0x197   :  { %v228_v0 = vpop.xlane.xlu1 %227 }
 0x198   :  { %v469_v1 = vpop.xlane.xlu0 %468 }
 0x199   :  { %v483_v27 = vadd.f32 %v469_v1, %v238_v63 }
 0x19b   :  { %v231_v2 = vpop.xlane.xlu1 %230 }
 0x19c   :  { %v459_v4 = vpop.xlane.xlu0 %458 }
 0x19d   :  { %v481_v54 = vadd.f32 %v459_v4, %v228_v0 }
 0x19f   :  { %v462_v5 = vpop.xlane.xlu1 %461 }
 0x1a0   :  { %v244_v7 = vpop.xlane.xlu0 %243  ;;  %v482_v58 = vadd.f32 %v462_v5, %v231_v2  ;;  %v981_v2 = vld [vmem:[%s2112_s2] sm:$0xff] }
 0x1a3   :  { %v247_v8 = vpop.xlane.xlu1 %246 }
 0x1a4   :  { %v475_v10 = vpop.xlane.xlu0 %474 }
 0x1a7   :  { %v478_v11 = vpop.xlane.xlu1 %477 }
 0x1a8   :  { %v692_v13 = vpop.xlane.xlu0 %691 }
 0x1a9   :  { %v718_v18 = vadd.f32 %v692_v13, %v479_v15  ;;  %v485_v13 = vadd.f32 %v475_v10, %v244_v7  ;;  %v982_v7 = vld [vmem:[%s2112_s2 + $0x8] sm:$0xff] }
 0x1ab   :  { %v695_v14 = vpop.xlane.xlu1 %694 }
 0x1ac   :  { %v931_v16 = vpop.xlane.xlu0 %930  ;;  %v719_v23 = vadd.f32 %v695_v14, %v480_v17 }
 0x1ad   :  { %v957_v24 = vadd.f32 %v931_v16, %v718_v18  ;;  %v486_v16 = vadd.f32 %v478_v11, %v247_v8 }
 0x1af   :  { %v934_v20 = vpop.xlane.xlu1 %933  ;;  %v965_v34 = vmul.f32 0.010204081, %v957_v24 }
 0x1b0   :  { %v708_v26 = vpop.xlane.xlu0 %707  ;;  %v958_v30 = vadd.f32 %v934_v20, %v719_v23 }
 0x1b1   :  { %v722_v36 = vadd.f32 %v708_v26, %v483_v27  ;;  %v973_v43 = vmul.f32 %v965_v34, %v965_v34 }
 0x1b2   :  { %v966_v38 = vmul.f32 0.010204081, %v958_v30 }
 0x1b3   :  { %v711_v31 = vpop.xlane.xlu1 %710 }
 0x1b4   :  { %v947_v37 = vpop.xlane.xlu0 %946  ;;  %v723_v40 = vadd.f32 %v711_v31, %v484_v33  ;;  %v974_v48 = vmul.f32 %v966_v38, %v966_v38 }
 0x1b5   :  { %v961_v41 = vadd.f32 %v947_v37, %v722_v36 }
 0x1b7   :  { %v950_v42 = vpop.xlane.xlu1 %949  ;;  %v969_v45 = vmul.f32 0.010204081, %v961_v41 }
 0x1b8   :  { %v962_v46 = vadd.f32 %v950_v42, %v723_v40  ;;  %v698_v47 = vpop.xlane.xlu0 %697  ;;  %v997_v42 = vld [vmem:[%s2113_s3] sm:$0xff] }
 0x1b9   :  { %v977_v50 = vsub.f32 %v969_v45, %v973_v43  ;;  %v720_v60 = vadd.f32 %v698_v47, %v481_v54  ;;  %v998_v47 = vld [vmem:[%s2113_s3 + $0x8] sm:$0xff]  ;;  %v984_v54 = vld [vmem:[%s2112_s2 + $0x18] sm:$0xff] }
 0x1ba   :  { %v970_v51 = vmul.f32 0.010204081, %v962_v46 }
 0x1bb   :  { %v701_v52 = vpop.xlane.xlu1 %700  ;;  %v985_v55 = vadd.f32 1e-05, %v977_v50 }
 0x1bc   :  { %v978_v56 = vsub.f32 %v970_v51, %v974_v48  ;;  %v937_v57 = vpop.xlane.xlu0 %936  ;;  %v721_v62 = vadd.f32 %v701_v52, %v482_v58 }
 0x1bd   :  { %1620 = vrsqrt.f32 %v985_v55  ;;  %v959_v63 = vadd.f32 %v937_v57, %v720_v60 }
 0x1be   :  { %v986_v59 = vadd.f32 1e-05, %v978_v56  ;;  %v999_v56 = vld [vmem:[%s2113_s3 + $0x10] sm:$0xff] }
 0x1bf   :  { %v940_v61 = vpop.xlane.xlu1 %939  ;;  %v967_v17 = vmul.f32 0.010204081, %v959_v63 }
 0x1c0   :  { %1622 = vrsqrt.f32 %v986_v59  ;;  %v714_v1 = vpop.xlane.xlu0 %713  ;;  %v960_v14 = vadd.f32 %v940_v61, %v721_v62  ;;  %v1000_v59 = vld [vmem:[%s2113_s3 + $0x18] sm:$0xff] }
 0x1c1   :  { %v724_v18 = vadd.f32 %v714_v1, %v485_v13  ;;  %v975_v26 = vmul.f32 %v967_v17, %v967_v17 }
 0x1c2   :  { %v968_v0 = vmul.f32 0.010204081, %v960_v14 }
 0x1c3   :  { %v717_v15 = vpop.xlane.xlu1 %716 }
 0x1c4   :  { %v953_v20 = vpop.xlane.xlu0 %952  ;;  %v725_v4 = vadd.f32 %v717_v15, %v486_v16  ;;  %v976_v11 = vmul.f32 %v968_v0, %v968_v0 }
 0x1c5   :  { %v963_v23 = vadd.f32 %v953_v20, %v724_v18 }
 0x1c7   :  { %v956_v5 = vpop.xlane.xlu1 %955  ;;  %v1621_v24 = vpop.eup %1620  ;;  %v971_v27 = vmul.f32 0.010204081, %v963_v23 }
 0x1c8   :  { %v964_v30 = vadd.f32 %v956_v5, %v725_v4  ;;  %v993_v8 = vmul.f32 %v1621_v24, %v981_v2 }
 0x1c9   :  { %v979_v31 = vsub.f32 %v971_v27, %v975_v26 }
 0x1ca   :  { %v1623_v10 = vpop.eup %1622  ;;  %v972_v33 = vmul.f32 0.010204081, %v964_v30  ;;  %1011 = vperm.xlu0 %1530, %v993_v8   ;;  %v1001_v37 = vmul.f32 %v993_v8, %v965_v34  ;;  %v983_v34 = vld [vmem:[%s2112_s2 + $0x10] sm:$0xff] }
 0x1cb   :  { %v994_v36 = vmul.f32 %v1623_v10, %v982_v7  ;;  %v987_v40 = vadd.f32 1e-05, %v979_v31 }
 0x1cc   :  { %v980_v41 = vsub.f32 %v972_v33, %v976_v11  ;;  %v1005_v45 = vsub.f32 %v997_v42, %v1001_v37 }
 0x1cd   :  { %1016 = vperm.xlu1 %1531, %v994_v36   ;;  %1624 = vrsqrt.f32 %v987_v40  ;;  %v1002_v46 = vmul.f32 %v994_v36, %v966_v38 }
 0x1ce   :  { %v988_v43 = vadd.f32 1e-05, %v980_v41 }
 0x1cf   :  { %v1006_v48 = vsub.f32 %v998_v47, %v1002_v46 }
 0x1d0   :  { %1626 = vrsqrt.f32 %v988_v43 }
 0x1d1   :  { %1035 = vperm.xlu1 %1531, %v1005_v45  }
 0x1d5   :  { %1040 = vperm.xlu1 %1531, %v1006_v48  }
 0x1d7   :  { %v1625_v50 = vpop.eup %1624 }
 0x1d8   :  { %v995_v51 = vmul.f32 %v1625_v50, %v983_v34 }
 0x1da   :  { %v1627_v52 = vpop.eup %1626  ;;  %1021 = vperm.xlu1 %1531, %v995_v51   ;;  %v1003_v55 = vmul.f32 %v995_v51, %v967_v17 }
 0x1db   :  { %v996_v38 = vmul.f32 %v1627_v52, %v984_v54 }
 0x1dc   :  { %v1007_v57 = vsub.f32 %v999_v56, %v1003_v55 }
 0x1dd   :  { %v1004_v58 = vmul.f32 %v996_v38, %v968_v0 }
 0x1de   :  { %1026 = vperm.xlu1 %1531, %v996_v38  }
 0x1df   :  { %v1008_v60 = vsub.f32 %v1000_v59, %v1004_v58 }
 0x1e2   :  { %1045 = vperm.xlu1 %1531, %v1007_v57  }
 0x1e6   :  { %1050 = vperm.xlu1 %1531, %v1008_v60  }
 0x249   :  { %v1012_v61 = vpop.permute.xlu0 %1011 }
 0x24a   :  { %v1029_v63 = vmul.f32 %v1894_v19, %v1012_v61  ;;  %v1082_v1 = vmul.f32 %v1896_v22, %v1012_v61  ;;  %v1115_v13 = vmul.f32 %v1950_v3, %v1012_v61  ;;  %v1148_v14 = vmul.f32 %v1952_v6, %v1012_v61 }
 0x24c   :  { %v1017_v62 = vpop.permute.xlu1 %1016 }
 0x24d   :  { %v1030_v5 = vmul.f32 %v1898_v25, %v1017_v62  ;;  %v1083_v19 = vmul.f32 %v1902_v28, %v1017_v62  ;;  %v1116_v22 = vmul.f32 %v1954_v9, %v1017_v62  ;;  %v1149_v3 = vmul.f32 %v1958_v12, %v1017_v62 }
 0x250   :  { %v1036_v15 = vpop.permute.xlu1 %1035 }
 0x251   :  { %v1053_v16 = vadd.f32 %v1036_v15, %v1029_v63  ;;  %v1086_v17 = vadd.f32 %v1082_v1, %v1036_v15  ;;  %v1119_v18 = vadd.f32 %v1115_v13, %v1036_v15  ;;  %v1152_v20 = vadd.f32 %v1148_v14, %v1036_v15 }
 0x253   :  { %v1057_v0 = vmax.f32 %v1053_v16, 0.0  ;;  %v1090_v4 = vmax.f32 %v1086_v17, 0.0  ;;  %v1123_v23 = vmax.f32 %v1119_v18, 0.0  ;;  %v1156_v2 = vmax.f32 %v1152_v20, 0.0 }
 0x254   :  { %v1041_v24 = vpop.permute.xlu1 %1040 }
 0x255   :  { %v1401_v6 = vpack.c.bf16 %v1057_v0, %v1057_v0  ;;  %v1405_v26 = vpack.c.bf16 %v1090_v4, %v1090_v4  ;;  %v1409_v27 = vpack.c.bf16 %v1123_v23, %v1123_v23  ;;  %v1413_v30 = vpack.c.bf16 %v1156_v2, %v1156_v2 }
 0x256   :  { %v1054_v7 = vadd.f32 %v1041_v24, %v1030_v5  ;;  %v1087_v8 = vadd.f32 %v1083_v19, %v1041_v24  ;;  %v1120_v10 = vadd.f32 %v1116_v22, %v1041_v24  ;;  %v1153_v11 = vadd.f32 %v1149_v3, %v1041_v24 }
 0x257   :  { %1078 = vst.msk [vmem:[%s2114_s4] sm:$0xf] %vm1077_vm1, %v1401_v6  ;;  %1381 = vst.msk [vmem:[%s2114_s4 + $0x10] sm:$0xf] %vm1077_vm1, %v1405_v26 }
 0x258   :  { %1389 = vst.msk [vmem:[%s2114_s4 + $0x20] sm:$0xf] %vm1077_vm1, %v1409_v27  ;;  %1397 = vst.msk [vmem:[%s2114_s4 + $0x30] sm:$0xf] %vm1077_vm1, %v1413_v30  ;;  %v1058_v25 = vmax.f32 %v1054_v7, 0.0  ;;  %v1091_v28 = vmax.f32 %v1087_v8, 0.0 }
 0x259   :  { %v1124_v9 = vmax.f32 %v1120_v10, 0.0  ;;  %v1157_v12 = vmax.f32 %v1153_v11, 0.0  ;;  %v1022_v40 = vpop.permute.xlu1 %1021 }
 0x25a   :  { %v1402_v31 = vpack.c.bf16 %v1058_v25, %v1058_v25  ;;  %v1406_v33 = vpack.c.bf16 %v1091_v28, %v1091_v28  ;;  %v1031_v42 = vmul.f32 %v1918_v39, %v1022_v40  ;;  %v1084_v43 = vmul.f32 %v1928_v49, %v1022_v40 }
 0x25b   :  { %v1410_v36 = vpack.c.bf16 %v1124_v9, %v1124_v9  ;;  %v1414_v37 = vpack.c.bf16 %v1157_v12, %v1157_v12  ;;  %v1117_v45 = vmul.f32 %v1968_v21, %v1022_v40  ;;  %v1150_v46 = vmul.f32 %v1972_v29, %v1022_v40 }
 0x25c   :  { %1079 = vst.msk [vmem:[%s2114_s4 + $0x4] sm:$0xf] %vm1077_vm1, %v1402_v31  ;;  %1382 = vst.msk [vmem:[%s2114_s4 + $0x14] sm:$0xf] %vm1077_vm1, %v1406_v33 }
 0x25d   :  { %1390 = vst.msk [vmem:[%s2114_s4 + $0x24] sm:$0xf] %vm1077_vm1, %v1410_v36  ;;  %1398 = vst.msk [vmem:[%s2114_s4 + $0x34] sm:$0xf] %vm1077_vm1, %v1414_v37  ;;  %v1027_v41 = vpop.permute.xlu1 %1026 }
 0x25e   :  { %v1032_v56 = vmul.f32 %v1923_v44, %v1027_v41  ;;  %v1085_v57 = vmul.f32 %v1932_v53, %v1027_v41  ;;  %v1118_v39 = vmul.f32 %v1975_v32, %v1027_v41  ;;  %v1151_v49 = vmul.f32 %v1979_v35, %v1027_v41 }
 0x261   :  { %v1046_v47 = vpop.permute.xlu1 %1045 }
 0x262   :  { %v1055_v48 = vadd.f32 %v1046_v47, %v1031_v42  ;;  %v1088_v34 = vadd.f32 %v1084_v43, %v1046_v47  ;;  %v1121_v50 = vadd.f32 %v1117_v45, %v1046_v47  ;;  %v1154_v51 = vadd.f32 %v1150_v46, %v1046_v47 }
 0x264   :  { %v1059_v52 = vmax.f32 %v1055_v48, 0.0  ;;  %v1092_v54 = vmax.f32 %v1088_v34, 0.0  ;;  %v1125_v38 = vmax.f32 %v1121_v50, 0.0  ;;  %v1158_v55 = vmax.f32 %v1154_v51, 0.0 }
 0x265   :  { %v1051_v21 = vpop.permute.xlu1 %1050 }
 0x266   :  { %v1403_v58 = vpack.c.bf16 %v1059_v52, %v1059_v52  ;;  %v1407_v29 = vpack.c.bf16 %v1092_v54, %v1092_v54  ;;  %v1411_v59 = vpack.c.bf16 %v1125_v38, %v1125_v38  ;;  %v1415_v60 = vpack.c.bf16 %v1158_v55, %v1158_v55 }
 0x267   :  { %v1056_v61 = vadd.f32 %v1051_v21, %v1032_v56  ;;  %v1089_v62 = vadd.f32 %v1085_v57, %v1051_v21  ;;  %v1122_v63 = vadd.f32 %v1118_v39, %v1051_v21  ;;  %v1155_v1 = vadd.f32 %v1151_v49, %v1051_v21 }
 0x268   :  { %1080 = vst.msk [vmem:[%s2114_s4 + $0x8] sm:$0xf] %vm1077_vm1, %v1403_v58  ;;  %1383 = vst.msk [vmem:[%s2114_s4 + $0x18] sm:$0xf] %vm1077_vm1, %v1407_v29 }
 0x269   :  { %1391 = vst.msk [vmem:[%s2114_s4 + $0x28] sm:$0xf] %vm1077_vm1, %v1411_v59  ;;  %1399 = vst.msk [vmem:[%s2114_s4 + $0x38] sm:$0xf] %vm1077_vm1, %v1415_v60  ;;  %v1060_v44 = vmax.f32 %v1056_v61, 0.0  ;;  %v1093_v53 = vmax.f32 %v1089_v62, 0.0 }
 0x26a   :  { %v1126_v32 = vmax.f32 %v1122_v63, 0.0  ;;  %v1159_v35 = vmax.f32 %v1155_v1, 0.0 }
 0x26b   :  { %v1404_v13 = vpack.c.bf16 %v1060_v44, %v1060_v44  ;;  %v1408_v14 = vpack.c.bf16 %v1093_v53, %v1093_v53 }
 0x26c   :  { %v1412_v15 = vpack.c.bf16 %v1126_v32, %v1126_v32  ;;  %v1416_v16 = vpack.c.bf16 %v1159_v35, %v1159_v35 }
 0x26d   :  { %1081 = vst.msk [vmem:[%s2114_s4 + $0xc] sm:$0xf] %vm1077_vm1, %v1404_v13  ;;  %1384 = vst.msk [vmem:[%s2114_s4 + $0x1c] sm:$0xf] %vm1077_vm1, %v1408_v14 }
 0x26e   :  { %1392 = vst.msk [vmem:[%s2114_s4 + $0x2c] sm:$0xf] %vm1077_vm1, %v1412_v15  ;;  %1400 = vst.msk [vmem:[%s2114_s4 + $0x3c] sm:$0xf] %vm1077_vm1, %v1416_v16 }

// kernel: cnn_decoder_forward.4
= control target key start
LH: loop header
LB: loop body
LE: loop exit
PB: predicated region body
PF: predicated region fallthrough
CT: control target
= control target key end

     0   :  { %14 = vsyncpa [#allocation3], 0  ;;  %s3976_s30 = smov [#allocation2]   ;;  %s4875_s0 = inlined_call_operand.vmem [shape: f32[2,32], index: 0, kind: input, shape index: {}]   ;;  %s4876_s1 = inlined_call_operand.vmem [shape: bf16[32,512], index: 1, kind: input, shape index: {}]   ;;  %s4877_s2 = inlined_call_operand.vmem [shape: f32[1,512], index: 2, kind: input, shape index: {}]   ;;  %s4878_s3 = inlined_call_operand.vmem [shape: f32[1,512], index: 3, kind: input, shape index: {}]   ;;  %s4879_s4 = inlined_call_operand.hbm [shape: bf16[512,1024], index: 4, kind: input, shape index: {}]   ;;  %s4880_s5 = inlined_call_operand.vmem [shape: f32[1024,64], index: 5, kind: input, shape index: {}]   ;;  %s4881_s6 = inlined_call_operand.vmem [shape: f32[64,1024], index: 6, kind: input, shape index: {}]   ;;  %s4882_s7 = inlined_call_operand.vmem [shape: f32[1,64], index: 7, kind: input, shape index: {}]   ;;  %s4883_s8 = inlined_call_operand.vmem [shape: f32[1,64], index: 8, kind: input, shape index: {}]   ;;  %s4884_s9 = inlined_call_operand.vmem [shape: bf16[2,1024], index: 9, kind: output, shape index: {}]  }
   0x1   :  { %s28_s10 = sshll.u32 %s3976_s30, 4  ;;  %s3952_s13 = scalar_lea.hbm %s4879_s4, 32768  ;;  %s29_s10 = int_to_ptr.vmem [resolvable:$true] %s28_s10 }
   0x2   :  { %p3953_p0 = scmp.ne.s32.totalorder %s4879_s4, %s3952_s13  ;;  %p3956_p1 = scmp.lt.u32.totalorder %s3952_s13, %s4879_s4 }
   0x4   :  { %p3958_p2 = pnand %p3956_p1, %p3953_p0 }
   0x6   :  { %3961 = shalt.err (!%p3958_p2)
}
   0x7   :  { %s3962_s18 = scalar_lea.vmem %s29_s10, 32768  ;;  %p3967_p4 = scmp.lt.s32.totalorder %s29_s10, %s29_s10 }
   0x8   :  { %p3963_p3 = scmp.ne.s32.totalorder %s29_s10, %s3962_s18  ;;  %p3968_p5 = scmp.lt.s32.totalorder %s3962_s18, %s3962_s18 }
   0xa   :  { %p3969_p6 = por %p3968_p5, %p3967_p4 }
   0xc   :  { %p3970_p7 = pnand %p3969_p6, %p3963_p3 }
   0xe   :  { %3973 = shalt.err (!%p3970_p7)
}
   0xf   :  { %s3977_s19 = smov 512   ;;  %s3978_s20 = smov 32  }
  0x10   :  { %34 = dma.hbm_to_vmem [thread:$0]  %s4879_s4, 32768, %s29_s10, [#allocation3], %s3977_s19, %s3977_s19, %s3978_s20  }
  0x11   :  { %3974 = dma.done.wait [#allocation3], 32768  }
  0x12   :  { %3975 = vsyncadd [#allocation3], 4294934528  ;;  %v3979_v0 = vmov 0   ;;  %v3930_v1 = vld [vmem:[%s4876_s1 + $0x4] ss:$16 sps:$4 sm:$0xff]   ;;  %v338_v13 = vld [vmem:[#allocation2 + $0x8] sm:$0xff] }
  0x13   :  { %133 = vmatprep.mubr.bf16.mxu0 %v3979_v0  ;;  %174 = vmatprep.mubr.bf16.mxu1 %v3979_v0  ;;  %v3932_v2 = vld [vmem:[%s4876_s1] ss:$16 sps:$4 sm:$0xff]   ;;  %v3933_v3 = vld [vmem:[%s4876_s1 + $0x24] ss:$16 sps:$4 sm:$0xff]   ;;  %v3936_v6 = vld [vmem:[%s4876_s1 + $0xc] ss:$16 sps:$4 sm:$0xff]  }
  0x14   :  { %101 = vmatprep.subr.bf16.mxu0 %v3930_v1  ;;  %v3935_v4 = vld [vmem:[%s4876_s1 + $0x20] ss:$16 sps:$4 sm:$0xff]   ;;  %v3938_v7 = vld [vmem:[%s4876_s1 + $0x8] ss:$16 sps:$4 sm:$0xff]   ;;  %142 = vmatprep.subr.bf16.mxu1 %v3936_v6  ;;  %v3939_v8 = vld [vmem:[%s4876_s1 + $0x2c] ss:$16 sps:$4 sm:$0xff]  }
  0x15   :  { %v47_v5 = vld [vmem:[%s4875_s0] sm:$0x3]  ;;  %102 = vmatpush1.bf16.msra.mxu0 %v3932_v2  ;;  %v3941_v9 = vld [vmem:[%s4876_s1 + $0x28] ss:$16 sps:$4 sm:$0xff]   ;;  %143 = vmatpush1.bf16.msra.mxu1 %v3938_v7  ;;  %vm97_vm0 = vcmask 261120   ;;  %vm183_vm1 = vcmask 1041408  }
  0x16   :  { %103 = vmatprep.subr.bf16.mxu0 %v3933_v3  ;;  %v337_v10 = vld [vmem:[#allocation2] sm:$0xff]  ;;  %v48_v11 = vpack.c.bf16 %v47_v5, %v47_v5  ;;  %v342_v14 = vld [vmem:[#allocation2 + $0x28] sm:$0xff]  ;;  %144 = vmatprep.subr.bf16.mxu1 %v3939_v8  ;;  %vm2337_vm2 = vcmask 1040384   ;;  %vm2854_vm3 = vcmask 523264  }
  0x17   :  { %v341_v12 = vld [vmem:[#allocation2 + $0x20] sm:$0xff]  ;;  %v3315_v19 = vcombine.high %v338_v13, %v342_v14  ;;  %v346_v21 = vld [vmem:[#allocation2 + $0x48] sm:$0xff]  ;;  %v3314_v25 = vcombine.low %v338_v13, %v342_v14 }
  0x18   :  { %v3312_v15 = vcombine.low %v337_v10, %v341_v12  ;;  %v3313_v16 = vcombine.high %v337_v10, %v341_v12  ;;  %v345_v17 = vld [vmem:[#allocation2 + $0x40] sm:$0xff]  ;;  %v350_v22 = vld [vmem:[#allocation2 + $0x68] sm:$0xff] }
  0x19   :  { %104 = vmatpush1.bf16.msra.mxu0 %v3935_v4  ;;  %v349_v18 = vld [vmem:[#allocation2 + $0x60] sm:$0xff]  ;;  %145 = vmatpush1.bf16.msra.mxu1 %v3941_v9  ;;  %v3323_v27 = vcombine.high %v346_v21, %v350_v22  ;;  %v354_v29 = vld [vmem:[#allocation2 + $0x88] sm:$0xff]  ;;  %v3322_v33 = vcombine.low %v346_v21, %v350_v22 }
  0x1a   :  { %v3321_v20 = vcombine.high %v345_v17, %v349_v18  ;;  %1873 = vmatprep.subr.bf16.mxu0 %v3313_v16  ;;  %v353_v23 = vld [vmem:[#allocation2 + $0x80] sm:$0xff]  ;;  %1955 = vmatprep.subr.bf16.mxu1 %v3315_v19  ;;  %v3320_v26 = vcombine.low %v345_v17, %v349_v18  ;;  %v358_v30 = vld [vmem:[#allocation2 + $0xa8] sm:$0xff] }
  0x1b   :  { %v357_v24 = vld [vmem:[#allocation2 + $0xa0] sm:$0xff]  ;;  %v3331_v35 = vcombine.high %v354_v29, %v358_v30  ;;  %v362_v37 = vld [vmem:[#allocation2 + $0xc8] sm:$0xff]  ;;  %v3330_v41 = vcombine.low %v354_v29, %v358_v30 }
  0x1c   :  { %3310 = vmatmul.mubr.msk.bf16.vlgmr.msra.gmra.mrb[0].mxu0 %vm97_vm0, %v48_v11  ;;  %v3329_v28 = vcombine.high %v353_v23, %v357_v24  ;;  %3311 = vmatmul.mubr.msk.bf16.vlgmr.msra.gmra.mrb[0].mxu1 %vm97_vm0, %v48_v11  ;;  %v361_v31 = vld [vmem:[#allocation2 + $0xc0] sm:$0xff]  ;;  %v3328_v34 = vcombine.low %v353_v23, %v357_v24  ;;  %v366_v38 = vld [vmem:[#allocation2 + $0xe8] sm:$0xff] }
  0x1d   :  { %1874 = vmatpush1.bf16.msra.mxu0 %v3312_v15  ;;  %v365_v32 = vld [vmem:[#allocation2 + $0xe0] sm:$0xff]  ;;  %1956 = vmatpush1.bf16.msra.mxu1 %v3314_v25  ;;  %v3339_v43 = vcombine.high %v362_v37, %v366_v38  ;;  %v370_v45 = vld [vmem:[#allocation2 + $0x108] sm:$0xff]  ;;  %v3338_v49 = vcombine.low %v362_v37, %v366_v38 }
  0x1e   :  { %1875 = vmatprep.subr.bf16.mxu0 %v3321_v20  ;;  %1957 = vmatprep.subr.bf16.mxu1 %v3323_v27  ;;  %v3337_v36 = vcombine.high %v361_v31, %v365_v32  ;;  %v369_v39 = vld [vmem:[#allocation2 + $0x100] sm:$0xff]  ;;  %v3336_v42 = vcombine.low %v361_v31, %v365_v32  ;;  %v374_v46 = vld [vmem:[#allocation2 + $0x128] sm:$0xff] }
  0x1f   :  { %v373_v40 = vld [vmem:[#allocation2 + $0x120] sm:$0xff]  ;;  %v3347_v51 = vcombine.high %v370_v45, %v374_v46  ;;  %v378_v53 = vld [vmem:[#allocation2 + $0x148] sm:$0xff]  ;;  %v3346_v55 = vcombine.low %v370_v45, %v374_v46 }
  0x20   :  { %v3345_v44 = vcombine.high %v369_v39, %v373_v40  ;;  %v377_v47 = vld [vmem:[#allocation2 + $0x140] sm:$0xff]  ;;  %v3344_v50 = vcombine.low %v369_v39, %v373_v40  ;;  %v382_v54 = vld [vmem:[#allocation2 + $0x168] sm:$0xff] }
  0x21   :  { %1876 = vmatpush1.bf16.msra.mxu0 %v3320_v26  ;;  %1958 = vmatpush1.bf16.msra.mxu1 %v3322_v33  ;;  %v381_v48 = vld [vmem:[#allocation2 + $0x160] sm:$0xff]  ;;  %v3355_v57 = vcombine.high %v378_v53, %v382_v54  ;;  %v3354_v58 = vcombine.low %v378_v53, %v382_v54  ;;  %v386_v61 = vld [vmem:[#allocation2 + $0x188] sm:$0xff] }
  0x22   :  { %1877 = vmatprep.subr.bf16.mxu0 %v3329_v28  ;;  %1959 = vmatprep.subr.bf16.mxu1 %v3331_v35  ;;  %v3353_v52 = vcombine.high %v377_v47, %v381_v48  ;;  %v3352_v56 = vcombine.low %v377_v47, %v381_v48  ;;  %v385_v59 = vld [vmem:[#allocation2 + $0x180] sm:$0xff]  ;;  %v390_v63 = vld [vmem:[#allocation2 + $0x1a8] sm:$0xff] }
  0x23   :  { %v389_v60 = vld [vmem:[#allocation2 + $0x1a0] sm:$0xff]  ;;  %v3362_v1 = vcombine.low %v386_v61, %v390_v63  ;;  %v3363_v2 = vcombine.high %v386_v61, %v390_v63  ;;  %v394_v5 = vld [vmem:[#allocation2 + $0x1c8] sm:$0xff] }
  0x24   :  { %v3361_v62 = vcombine.high %v385_v59, %v389_v60  ;;  %v3360_v0 = vcombine.low %v385_v59, %v389_v60  ;;  %v393_v3 = vld [vmem:[#allocation2 + $0x1c0] sm:$0xff]  ;;  %v398_v7 = vld [vmem:[#allocation2 + $0x1e8] sm:$0xff] }
  0x25   :  { %1878 = vmatpush1.bf16.msra.mxu0 %v3328_v34  ;;  %1960 = vmatpush1.bf16.msra.mxu1 %v3330_v41  ;;  %v397_v4 = vld [vmem:[#allocation2 + $0x1e0] sm:$0xff]  ;;  %v3370_v9 = vcombine.low %v394_v5, %v398_v7  ;;  %v3371_v10 = vcombine.high %v394_v5, %v398_v7  ;;  %v402_v13 = vld [vmem:[#allocation2 + $0x208] sm:$0xff] }
  0x26   :  { %1879 = vmatprep.subr.bf16.mxu0 %v3337_v36  ;;  %1961 = vmatprep.subr.bf16.mxu1 %v3339_v43  ;;  %v3369_v6 = vcombine.high %v393_v3, %v397_v4  ;;  %v3368_v8 = vcombine.low %v393_v3, %v397_v4  ;;  %v401_v11 = vld [vmem:[#allocation2 + $0x200] sm:$0xff]  ;;  %v406_v15 = vld [vmem:[#allocation2 + $0x228] sm:$0xff] }
  0x27   :  { %v405_v12 = vld [vmem:[#allocation2 + $0x220] sm:$0xff]  ;;  %v3378_v17 = vcombine.low %v402_v13, %v406_v15  ;;  %v3379_v18 = vcombine.high %v402_v13, %v406_v15  ;;  %v410_v21 = vld [vmem:[#allocation2 + $0x248] sm:$0xff] }
  0x28   :  { %v3377_v14 = vcombine.high %v401_v11, %v405_v12  ;;  %v3376_v16 = vcombine.low %v401_v11, %v405_v12  ;;  %v409_v19 = vld [vmem:[#allocation2 + $0x240] sm:$0xff]  ;;  %v414_v23 = vld [vmem:[#allocation2 + $0x268] sm:$0xff] }
  0x29   :  { %1880 = vmatpush1.bf16.msra.mxu0 %v3336_v42  ;;  %1962 = vmatpush1.bf16.msra.mxu1 %v3338_v49  ;;  %v413_v20 = vld [vmem:[#allocation2 + $0x260] sm:$0xff]  ;;  %v3386_v25 = vcombine.low %v410_v21, %v414_v23  ;;  %v3387_v26 = vcombine.high %v410_v21, %v414_v23  ;;  %v418_v30 = vld [vmem:[#allocation2 + $0x288] sm:$0xff] }
  0x2a   :  { %1881 = vmatprep.subr.bf16.mxu0 %v3345_v44  ;;  %1963 = vmatprep.subr.bf16.mxu1 %v3347_v51  ;;  %v3385_v22 = vcombine.high %v409_v19, %v413_v20  ;;  %v3384_v24 = vcombine.low %v409_v19, %v413_v20  ;;  %v417_v27 = vld [vmem:[#allocation2 + $0x280] sm:$0xff]  ;;  %v422_v31 = vld [vmem:[#allocation2 + $0x2a8] sm:$0xff]  ;;  %v267_v19 = vlaneseq }
  0x2b   :  { %v421_v28 = vld [vmem:[#allocation2 + $0x2a0] sm:$0xff]  ;;  %v3394_v33 = vcombine.low %v418_v30, %v422_v31  ;;  %v3395_v34 = vcombine.high %v418_v30, %v422_v31  ;;  %v426_v37 = vld [vmem:[#allocation2 + $0x2c8] sm:$0xff] }
  0x2c   :  { %v3393_v29 = vcombine.high %v417_v27, %v421_v28  ;;  %v3392_v32 = vcombine.low %v417_v27, %v421_v28  ;;  %v425_v35 = vld [vmem:[#allocation2 + $0x2c0] sm:$0xff]  ;;  %v430_v39 = vld [vmem:[#allocation2 + $0x2e8] sm:$0xff]  ;;  %v4095_v23 = vshrl.u32 %v267_v19, 7 }
  0x2d   :  { %1882 = vmatpush1.bf16.msra.mxu0 %v3344_v50  ;;  %1964 = vmatpush1.bf16.msra.mxu1 %v3346_v55  ;;  %v429_v36 = vld [vmem:[#allocation2 + $0x2e0] sm:$0xff]  ;;  %v3402_v41 = vcombine.low %v426_v37, %v430_v39  ;;  %v3403_v42 = vcombine.high %v426_v37, %v430_v39  ;;  %v434_v45 = vld [vmem:[#allocation2 + $0x308] sm:$0xff] }
  0x2e   :  { %1883 = vmatprep.subr.bf16.mxu0 %v3353_v52  ;;  %1965 = vmatprep.subr.bf16.mxu1 %v3355_v57  ;;  %v3401_v38 = vcombine.high %v425_v35, %v429_v36  ;;  %v3400_v40 = vcombine.low %v425_v35, %v429_v36  ;;  %v433_v43 = vld [vmem:[#allocation2 + $0x300] sm:$0xff]  ;;  %v438_v47 = vld [vmem:[#allocation2 + $0x328] sm:$0xff] }
  0x2f   :  { %v437_v44 = vld [vmem:[#allocation2 + $0x320] sm:$0xff]  ;;  %v3410_v49 = vcombine.low %v434_v45, %v438_v47  ;;  %v3411_v50 = vcombine.high %v434_v45, %v438_v47  ;;  %v442_v53 = vld [vmem:[#allocation2 + $0x348] sm:$0xff] }
  0x30   :  { %v3409_v46 = vcombine.high %v433_v43, %v437_v44  ;;  %v3408_v48 = vcombine.low %v433_v43, %v437_v44  ;;  %v441_v51 = vld [vmem:[#allocation2 + $0x340] sm:$0xff]  ;;  %v446_v55 = vld [vmem:[#allocation2 + $0x368] sm:$0xff] }
  0x31   :  { %1884 = vmatpush1.bf16.msra.mxu0 %v3352_v56  ;;  %1966 = vmatpush1.bf16.msra.mxu1 %v3354_v58  ;;  %v445_v52 = vld [vmem:[#allocation2 + $0x360] sm:$0xff]  ;;  %v3418_v57 = vcombine.low %v442_v53, %v446_v55  ;;  %v3419_v58 = vcombine.high %v442_v53, %v446_v55  ;;  %v450_v61 = vld [vmem:[#allocation2 + $0x388] sm:$0xff] }
  0x32   :  { %1885 = vmatprep.subr.bf16.mxu0 %v3361_v62  ;;  %1967 = vmatprep.subr.bf16.mxu1 %v3363_v2  ;;  %v3417_v54 = vcombine.high %v441_v51, %v445_v52  ;;  %v3416_v56 = vcombine.low %v441_v51, %v445_v52  ;;  %v449_v59 = vld [vmem:[#allocation2 + $0x380] sm:$0xff]  ;;  %v454_v63 = vld [vmem:[#allocation2 + $0x3a8] sm:$0xff] }
  0x33   :  { %v453_v60 = vld [vmem:[#allocation2 + $0x3a0] sm:$0xff]  ;;  %v3427_v2 = vcombine.high %v450_v61, %v454_v63  ;;  %v458_v5 = vld [vmem:[#allocation2 + $0x3c8] sm:$0xff] }
  0x34   :  { %v3425_v62 = vcombine.high %v449_v59, %v453_v60  ;;  %v457_v3 = vld [vmem:[#allocation2 + $0x3c0] sm:$0xff]  ;;  %v462_v7 = vld [vmem:[#allocation2 + $0x3e8] sm:$0xff] }
  0x35   :  { %1886 = vmatpush1.bf16.msra.mxu0 %v3360_v0  ;;  %1968 = vmatpush1.bf16.msra.mxu1 %v3362_v1  ;;  %v3424_v0 = vcombine.low %v449_v59, %v453_v60  ;;  %v3426_v1 = vcombine.low %v450_v61, %v454_v63  ;;  %v461_v4 = vld [vmem:[#allocation2 + $0x3e0] sm:$0xff]  ;;  %v4077_v13 = vld [vmem:[#allocation2 + $0x408] sm:$0xff] }
  0x36   :  { %1887 = vmatprep.subr.bf16.mxu0 %v3369_v6  ;;  %1969 = vmatprep.subr.bf16.mxu1 %v3371_v10  ;;  %v3433_v6 = vcombine.high %v457_v3, %v461_v4  ;;  %v3435_v10 = vcombine.high %v458_v5, %v462_v7  ;;  %v4073_v11 = vld [vmem:[#allocation2 + $0x400] sm:$0xff]  ;;  %v4081_v15 = vld [vmem:[#allocation2 + $0x428] sm:$0xff] }
  0x37   :  { %v4075_v12 = vld [vmem:[#allocation2 + $0x420] sm:$0xff] }
  0x39   :  { %1888 = vmatpush1.bf16.msra.mxu0 %v3368_v8  ;;  %1970 = vmatpush1.bf16.msra.mxu1 %v3370_v9  ;;  %v3432_v8 = vcombine.low %v457_v3, %v461_v4  ;;  %v3434_v9 = vcombine.low %v458_v5, %v462_v7 }
  0x3a   :  { %1889 = vmatprep.subr.bf16.mxu0 %v3377_v14  ;;  %1971 = vmatprep.subr.bf16.mxu1 %v3379_v18  ;;  %v3441_v14 = vcombine.high %v4073_v11, %v4075_v12  ;;  %v3443_v18 = vcombine.high %v4077_v13, %v4081_v15 }
  0x3d   :  { %1890 = vmatpush1.bf16.msra.mxu0 %v3376_v16  ;;  %1972 = vmatpush1.bf16.msra.mxu1 %v3378_v17  ;;  %v3440_v16 = vcombine.low %v4073_v11, %v4075_v12  ;;  %v3442_v17 = vcombine.low %v4077_v13, %v4081_v15 }
  0x3e   :  { %1891 = vmatprep.subr.bf16.mxu0 %v3385_v22  ;;  %1973 = vmatprep.subr.bf16.mxu1 %v3387_v26 }
  0x41   :  { %1892 = vmatpush1.bf16.msra.mxu0 %v3384_v24  ;;  %1974 = vmatpush1.bf16.msra.mxu1 %v3386_v25 }
  0x42   :  { %1893 = vmatprep.subr.bf16.mxu0 %v3393_v29  ;;  %1975 = vmatprep.subr.bf16.mxu1 %v3395_v34 }
  0x45   :  { %1894 = vmatpush1.bf16.msra.mxu0 %v3392_v32  ;;  %1976 = vmatpush1.bf16.msra.mxu1 %v3394_v33  ;;  %v277_v33 = vsub.s32 2, %v4095_v23 }
  0x46   :  { %1895 = vmatprep.subr.bf16.mxu0 %v3401_v38  ;;  %1977 = vmatprep.subr.bf16.mxu1 %v3403_v42 }
  0x49   :  { %1896 = vmatpush1.bf16.msra.mxu0 %v3400_v40  ;;  %1978 = vmatpush1.bf16.msra.mxu1 %v3402_v41 }
  0x4a   :  { %1897 = vmatprep.subr.bf16.mxu0 %v3409_v46  ;;  %1979 = vmatprep.subr.bf16.mxu1 %v3411_v50 }
  0x4d   :  { %1898 = vmatpush1.bf16.msra.mxu0 %v3408_v48  ;;  %1980 = vmatpush1.bf16.msra.mxu1 %v3410_v49 }
  0x4e   :  { %1899 = vmatprep.subr.bf16.mxu0 %v3417_v54  ;;  %1981 = vmatprep.subr.bf16.mxu1 %v3419_v58 }
  0x51   :  { %1900 = vmatpush1.bf16.msra.mxu0 %v3416_v56  ;;  %1982 = vmatpush1.bf16.msra.mxu1 %v3418_v57 }
  0x52   :  { %1901 = vmatprep.subr.bf16.mxu0 %v3425_v62  ;;  %1983 = vmatprep.subr.bf16.mxu1 %v3427_v2 }
  0x55   :  { %1902 = vmatpush1.bf16.msra.mxu0 %v3424_v0  ;;  %1984 = vmatpush1.bf16.msra.mxu1 %v3426_v1 }
  0x56   :  { %1903 = vmatprep.subr.bf16.mxu0 %v3433_v6  ;;  %1985 = vmatprep.subr.bf16.mxu1 %v3435_v10 }
  0x59   :  { %1904 = vmatpush1.bf16.msra.mxu0 %v3432_v8  ;;  %1986 = vmatpush1.bf16.msra.mxu1 %v3434_v9 }
  0x5a   :  { %1914 = vmatprep.subr.bf16.mxu0 %v3441_v14  ;;  %1996 = vmatprep.subr.bf16.mxu1 %v3443_v18 }
  0xef   :  { %v4089_v20 = vpop.f32.mrb[0].mxu0  ;;  %v4104_v32 = vpop.f32.mrb[0].mxu1 }
  0xf0   :  { %v184_v21 = vsel %vm183_vm1, %v4089_v20, 0.0  ;;  %v217_v22 = vmul.f32 %v4089_v20, %v4089_v20  ;;  %v4097_v24 = vpop.f32.mrb[1].mxu0  ;;  %v198_v37 = vsel %vm183_vm1, %v4104_v32, 0.0  ;;  %v4110_v38 = vpop.f32.mrb[1].mxu1  ;;  %v219_v42 = vmul.f32 %v4104_v32, %v4104_v32 }
  0xf1   :  { %v185_v25 = vrot.slane %v184_v21, 4  ;;  %v191_v26 = vsel %vm183_vm1, %v4097_v24, 0.0  ;;  %v218_v27 = vmul.f32 %v4097_v24, %v4097_v24  ;;  %v139_v28 = vpop.f32.mrb[2].mxu0  ;;  %v199_v41 = vrot.slane %v198_v37, 4  ;;  %v180_v43 = vpop.f32.mrb[2].mxu1 }
  0xf2   :  { %v221_v29 = vsel %vm183_vm1, %v217_v22, 0.0  ;;  %v192_v30 = vrot.slane %v191_v26, 4  ;;  %v140_v31 = vpop.f32.mrb[3].mxu0  ;;  %v205_v46 = vsel %vm183_vm1, %v4110_v38, 0.0  ;;  %v220_v47 = vmul.f32 %v4110_v38, %v4110_v38  ;;  %v181_v48 = vpop.f32.mrb[3].mxu1 }
  0xf3   :  { %v186_v34 = vadd.f32 %v185_v25, %v184_v21  ;;  %v222_v35 = vrot.slane %v221_v29, 4  ;;  %v228_v36 = vsel %vm183_vm1, %v218_v27, 0.0  ;;  %v200_v51 = vadd.f32 %v199_v41, %v198_v37  ;;  %v261_v31 = vld [vmem:[%s4877_s2] sm:$0xf] }
  0xf4   :  { %v193_v39 = vadd.f32 %v192_v30, %v191_v26  ;;  %v229_v40 = vrot.slane %v228_v36, 4  ;;  %v235_v52 = vsel %vm183_vm1, %v219_v42, 0.0  ;;  %v206_v56 = vrot.slane %v205_v46, 4 }
  0xf5   :  { %v187_v44 = vrot.slane %v186_v34, 2  ;;  %v223_v45 = vadd.f32 %v222_v35, %v221_v29  ;;  %v236_v55 = vrot.slane %v235_v52, 4  ;;  %v201_v59 = vrot.slane %v200_v51, 2 }
  0xf6   :  { %v194_v49 = vrot.slane %v193_v39, 2  ;;  %v230_v50 = vadd.f32 %v229_v40, %v228_v36  ;;  %v242_v60 = vsel %vm183_vm1, %v220_v47, 0.0  ;;  %v207_v0 = vadd.f32 %v206_v56, %v205_v46 }
  0xf7   :  { %v188_v53 = vadd.f32 %v187_v44, %v186_v34  ;;  %v224_v54 = vrot.slane %v223_v45, 2  ;;  %v237_v63 = vadd.f32 %v236_v55, %v235_v52  ;;  %v202_v3 = vadd.f32 %v201_v59, %v200_v51 }
  0xf8   :  { %v195_v57 = vadd.f32 %v194_v49, %v193_v39  ;;  %v231_v58 = vrot.slane %v230_v50, 2  ;;  %v243_v4 = vrot.slane %v242_v60, 4  ;;  %v208_v8 = vrot.slane %v207_v0, 2 }
  0xf9   :  { %v189_v61 = vrot.slane %v188_v53, 1  ;;  %v225_v62 = vadd.f32 %v224_v54, %v223_v45  ;;  %v238_v7 = vrot.slane %v237_v63, 2  ;;  %v203_v14 = vrot.slane %v202_v3, 1 }
  0xfa   :  { %v196_v1 = vrot.slane %v195_v57, 1  ;;  %v232_v2 = vadd.f32 %v231_v58, %v230_v50  ;;  %v244_v18 = vadd.f32 %v243_v4, %v242_v60  ;;  %v209_v25 = vadd.f32 %v208_v8, %v207_v0 }
  0xfb   :  { %v190_v5 = vadd.f32 %v189_v61, %v188_v53  ;;  %v226_v6 = vrot.slane %v225_v62, 1  ;;  %v239_v22 = vadd.f32 %v238_v7, %v237_v63  ;;  %v204_v28 = vadd.f32 %v203_v14, %v202_v3 }
  0xfc   :  { %v197_v9 = vadd.f32 %v196_v1, %v195_v57  ;;  %v233_v10 = vrot.slane %v232_v2, 1  ;;  %v245_v35 = vrot.slane %v244_v18, 2  ;;  %v278_v40 = vrot.slane %v261_v31, %v277_v33 }
  0xfd   :  { %v213_v19 = vmul.f32 0.5, %v190_v5  ;;  %v227_v21 = vadd.f32 %v226_v6, %v225_v62  ;;  %v240_v34 = vrot.slane %v239_v22, 1  ;;  %v215_v39 = vmul.f32 0.5, %v204_v28  ;;  %v473_v28 = vld [vmem:[#allocation2 + $0x440] sm:$0xff] }
  0xfe   :  { %v214_v26 = vmul.f32 0.5, %v197_v9  ;;  %v234_v27 = vadd.f32 %v233_v10, %v232_v2  ;;  %v210_v43 = vrot.slane %v209_v25, 1  ;;  %v246_v50 = vadd.f32 %v245_v35, %v244_v18  ;;  %v303_v2 = vld [vmem:[%s4878_s3] sm:$0xf]  ;;  %v478_v35 = vld [vmem:[#allocation2 + $0x468] sm:$0xff] }
  0xff   :  { %v249_v29 = vmul.f32 0.5, %v227_v21  ;;  %v253_v30 = vmul.f32 %v213_v19, %v213_v19  ;;  %v241_v42 = vadd.f32 %v240_v34, %v239_v22  ;;  %v255_v45 = vmul.f32 %v215_v39, %v215_v39  ;;  %v474_v34 = vld [vmem:[#allocation2 + $0x448] sm:$0xff] }
 0x100   :  { %v250_v36 = vmul.f32 0.5, %v234_v27  ;;  %v254_v37 = vmul.f32 %v214_v26, %v214_v26  ;;  %v264_v46 = vsub.f32 %v4104_v32, %v215_v39  ;;  %v211_v49 = vadd.f32 %v210_v43, %v209_v25  ;;  %v485_v43 = vld [vmem:[#allocation2 + $0x4a0] sm:$0xff] }
 0x101   :  { %v257_v41 = vsub.f32 %v249_v29, %v253_v30  ;;  %v251_v48 = vmul.f32 0.5, %v241_v42  ;;  %v247_v55 = vrot.slane %v246_v50, 1  ;;  %v4127_v56 = vsub.s32 0, %v4095_v23  ;;  %v477_v30 = vld [vmem:[#allocation2 + $0x460] sm:$0xff] }
 0x102   :  { %v258_v44 = vsub.f32 %v250_v36, %v254_v37  ;;  %v289_v52 = vmul.f32 %v278_v40, %v264_v46  ;;  %v216_v54 = vmul.f32 0.5, %v211_v49  ;;  %v4130_v57 = vsub.s32 1, %v4095_v23 }
 0x103   :  { %v291_v47 = vadd.f32 1e-05, %v257_v41  ;;  %v259_v53 = vsub.f32 %v251_v48, %v255_v45  ;;  %v248_v59 = vadd.f32 %v247_v55, %v246_v50  ;;  %v262_v61 = vsub.f32 %v4089_v20, %v213_v19  ;;  %v481_v41 = vld [vmem:[#allocation2 + $0x480] sm:$0xff]  ;;  %v486_v45 = vld [vmem:[#allocation2 + $0x4a8] sm:$0xff] }
 0x104   :  { %v292_v51 = vadd.f32 1e-05, %v258_v44  ;;  %v256_v32 = vmul.f32 %v216_v54, %v216_v54  ;;  %v270_v62 = vrot.slane %v261_v31, %v4127_v56  ;;  %v263_v63 = vsub.f32 %v4097_v24, %v214_v26  ;;  %v482_v44 = vld [vmem:[#allocation2 + $0x488] sm:$0xff] }
 0x105   :  { %3942 = vrsqrt.f32 %v291_v47  ;;  %v293_v58 = vadd.f32 1e-05, %v259_v53  ;;  %v252_v60 = vmul.f32 0.5, %v248_v59  ;;  %v274_v0 = vrot.slane %v261_v31, %v4130_v57  ;;  %v493_v53 = vld [vmem:[#allocation2 + $0x4e0] sm:$0xff]  ;;  %v494_v55 = vld [vmem:[#allocation2 + $0x4e8] sm:$0xff] }
 0x106   :  { %3944 = vrsqrt.f32 %v292_v51  ;;  %v287_v4 = vmul.f32 %v270_v62, %v262_v61  ;;  %v281_v5 = vsub.s32 3, %v4095_v23  ;;  %v308_v6 = vrot.slane %v303_v2, %v4127_v56  ;;  %v489_v51 = vld [vmem:[#allocation2 + $0x4c0] sm:$0xff] }
 0x107   :  { %3946 = vrsqrt.f32 %v293_v58  ;;  %v260_v1 = vsub.f32 %v252_v60, %v256_v32  ;;  %v288_v8 = vmul.f32 %v274_v0, %v263_v63  ;;  %v312_v20 = vrot.slane %v303_v2, %v4130_v57  ;;  %v501_v59 = vld [vmem:[#allocation2 + $0x520] sm:$0xff]  ;;  %v498_v32 = vld [vmem:[#allocation2 + $0x508] sm:$0xff] }
 0x108   :  { %v265_v14 = vsub.f32 %v4110_v38, %v216_v54  ;;  %v282_v18 = vrot.slane %v261_v31, %v281_v5  ;;  %v316_v21 = vrot.slane %v303_v2, %v277_v33  ;;  %v3449_v31 = vcombine.high %v473_v28, %v477_v30  ;;  %v490_v54 = vld [vmem:[#allocation2 + $0x4c8] sm:$0xff] }
 0x109   :  { %v294_v3 = vadd.f32 1e-05, %v260_v1  ;;  %v3451_v40 = vcombine.high %v474_v34, %v478_v35  ;;  %v320_v33 = vrot.slane %v303_v2, %v281_v5  ;;  %v3448_v47 = vcombine.low %v473_v28, %v477_v30  ;;  %v502_v60 = vld [vmem:[#allocation2 + $0x528] sm:$0xff]  ;;  %v505_v1 = vld [vmem:[#allocation2 + $0x540] sm:$0xff] }
 0x10a   :  { %v290_v36 = vmul.f32 %v282_v18, %v265_v14  ;;  %v3450_v48 = vcombine.low %v474_v34, %v478_v35  ;;  %v3457_v49 = vcombine.high %v481_v41, %v485_v43  ;;  %v3459_v50 = vcombine.high %v482_v44, %v486_v45  ;;  %v509_v2 = vld [vmem:[#allocation2 + $0x560] sm:$0xff] }
 0x10b   :  { %3948 = vrsqrt.f32 %v294_v3  ;;  %v3456_v11 = vcombine.low %v481_v41, %v485_v43  ;;  %v3458_v12 = vcombine.low %v482_v44, %v486_v45  ;;  %v3465_v13 = vcombine.high %v489_v51, %v493_v53  ;;  %v506_v3 = vld [vmem:[#allocation2 + $0x548] sm:$0xff]  ;;  %v529_v35 = vld [vmem:[#allocation2 + $0x600] sm:$0xff] }
 0x10c   :  { %v3467_v15 = vcombine.high %v490_v54, %v494_v55  ;;  %v3464_v61 = vcombine.low %v489_v51, %v493_v53  ;;  %v3466_v62 = vcombine.low %v490_v54, %v494_v55  ;;  %v3475_v0 = vcombine.high %v498_v32, %v502_v60  ;;  %v537_v44 = vld [vmem:[#allocation2 + $0x640] sm:$0xff]  ;;  %v546_v54 = vld [vmem:[#allocation2 + $0x688] sm:$0xff] }
 0x10d   :  { %v3480_v14 = vcombine.low %v505_v1, %v509_v2  ;;  %v541_v45 = vld [vmem:[#allocation2 + $0x660] sm:$0xff]  ;;  %v550_v55 = vld [vmem:[#allocation2 + $0x6a8] sm:$0xff] }
 0x10e   :  { %v549_v53 = vld [vmem:[#allocation2 + $0x6a0] sm:$0xff] }
 0x10f   :  { %v3943_v7 = vpop.eup %3942 }
 0x110   :  { %v3945_v9 = vpop.eup %3944  ;;  %v299_v24 = vmul.f32 %v3943_v7, %v287_v4  ;;  %v510_v4 = vld [vmem:[#allocation2 + $0x568] sm:$0xff]  ;;  %v3481_v7 = vcombine.high %v505_v1, %v509_v2  ;;  %v565_v1 = vld [vmem:[#allocation2 + $0x720] sm:$0xff] }
 0x111   :  { %v300_v10 = vmul.f32 %v3945_v9, %v288_v8  ;;  %v3947_v22 = vpop.eup %3946  ;;  %v3483_v8 = vcombine.high %v506_v3, %v510_v4  ;;  %v517_v9 = vld [vmem:[#allocation2 + $0x5a0] sm:$0xff]  ;;  %v3482_v18 = vcombine.low %v506_v3, %v510_v4  ;;  %v562_v2 = vld [vmem:[#allocation2 + $0x708] sm:$0xff] }
 0x112   :  { %v325_v19 = vadd.f32 %v308_v6, %v299_v24  ;;  %v301_v26 = vmul.f32 %v3947_v22, %v289_v52  ;;  %v3474_v6 = vcombine.low %v498_v32, %v502_v60  ;;  %v514_v24 = vld [vmem:[#allocation2 + $0x588] sm:$0xff]  ;;  %v521_v22 = vld [vmem:[#allocation2 + $0x5c0] sm:$0xff] }
 0x113   :  { %v326_v25 = vadd.f32 %v312_v20, %v300_v10  ;;  %v513_v20 = vld [vmem:[#allocation2 + $0x580] sm:$0xff]  ;;  %v518_v10 = vld [vmem:[#allocation2 + $0x5a8] sm:$0xff] }
 0x114   :  { %v329_v27 = vmax.f32 %v325_v19, 0.0  ;;  %v4145_v37 = vadd.f32 %v316_v21, %v301_v26  ;;  %v3489_v19 = vcombine.high %v513_v20, %v517_v9  ;;  %v3491_v21 = vcombine.high %v514_v24, %v518_v10  ;;  %v522_v26 = vld [vmem:[#allocation2 + $0x5c8] sm:$0xff] }
 0x115   :  { %v330_v29 = vmax.f32 %v326_v25, 0.0  ;;  %v3949_v42 = vpop.eup %3948  ;;  %v525_v25 = vld [vmem:[#allocation2 + $0x5e0] sm:$0xff]  ;;  %v3488_v28 = vcombine.low %v513_v20, %v517_v9  ;;  %v558_v32 = vld [vmem:[#allocation2 + $0x6e8] sm:$0xff] }
 0x116   :  { %v4149_v38 = vpack.c.bf16 %v329_v27, %v329_v27  ;;  %v302_v46 = vmul.f32 %v3949_v42, %v290_v36  ;;  %v526_v27 = vld [vmem:[#allocation2 + $0x5e8] sm:$0xff]  ;;  %v3497_v30 = vcombine.high %v521_v22, %v525_v25  ;;  %v533_v36 = vld [vmem:[#allocation2 + $0x620] sm:$0xff]  ;;  %v3496_v41 = vcombine.low %v521_v22, %v525_v25 }
 0x117   :  { %v4147_v39 = vpack.c.bf16 %v330_v29, %v330_v29  ;;  %v3490_v29 = vcombine.low %v514_v24, %v518_v10  ;;  %v3499_v34 = vcombine.high %v522_v26, %v526_v27  ;;  %v3505_v42 = vcombine.high %v529_v35, %v533_v36  ;;  %v566_v3 = vld [vmem:[#allocation2 + $0x728] sm:$0xff]  ;;  %v573_v20 = vld [vmem:[#allocation2 + $0x760] sm:$0xff] }
 0x118   :  { %v328_v52 = vadd.f32 %v320_v33, %v302_v46  ;;  %v3498_v33 = vcombine.low %v522_v26, %v526_v27  ;;  %v538_v46 = vld [vmem:[#allocation2 + $0x648] sm:$0xff]  ;;  %v581_v22 = vld [vmem:[#allocation2 + $0x7a0] sm:$0xff] }
 0x119   :  { %1905 = vmatprep.mubr.bf16.mxu0 %v4147_v39  ;;  %1987 = vmatprep.mubr.bf16.mxu1 %v4147_v39  ;;  %v570_v9 = vld [vmem:[#allocation2 + $0x748] sm:$0xff] }
 0x11a   :  { %1906 = vmatmul.mubr.bf16.vlgmr.msra.gmra.mrb[4].mxu0 %v4149_v38  ;;  %1988 = vmatmul.mubr.bf16.vlgmr.msra.gmra.mrb[4].mxu1 %v4149_v38  ;;  %v332_v58 = vmax.f32 %v328_v52, 0.0  ;;  %v545_v52 = vld [vmem:[#allocation2 + $0x680] sm:$0xff]  ;;  %v574_v24 = vld [vmem:[#allocation2 + $0x768] sm:$0xff] }
 0x11b   :  { %1915 = vmatpush1.bf16.msra.mxu0 %v3440_v16  ;;  %1997 = vmatpush1.bf16.msra.mxu1 %v3442_v17  ;;  %v497_v16 = vld [vmem:[#allocation2 + $0x500] sm:$0xff]  ;;  %v3520_v60 = vcombine.low %v545_v52, %v549_v53  ;;  %v578_v25 = vld [vmem:[#allocation2 + $0x788] sm:$0xff] }
 0x11c   :  { %1916 = vmatprep.subr.bf16.mxu0 %v3449_v31  ;;  %1998 = vmatprep.subr.bf16.mxu1 %v3451_v40  ;;  %v4161_v17 = vpack.c.bf16 %v332_v58, %v332_v58  ;;  %v3473_v63 = vcombine.high %v497_v16, %v501_v59  ;;  %v3472_v5 = vcombine.low %v497_v16, %v501_v59  ;;  %v530_v31 = vld [vmem:[#allocation2 + $0x608] sm:$0xff]  ;;  %v557_v16 = vld [vmem:[#allocation2 + $0x6e0] sm:$0xff] }
 0x11d   :  { %v534_v40 = vld [vmem:[#allocation2 + $0x628] sm:$0xff]  ;;  %v3512_v58 = vcombine.low %v537_v44, %v541_v45 }
 0x11e   :  { %1946 = vmatprep.mubr.bf16.mxu0 %v4161_v17  ;;  %2028 = vmatprep.mubr.bf16.mxu1 %v4161_v17  ;;  %v3507_v43 = vcombine.high %v530_v31, %v534_v40  ;;  %v554_v59 = vld [vmem:[#allocation2 + $0x6c8] sm:$0xff] }
 0x11f   :  { %1917 = vmatpush1.bf16.msra.mxu0 %v3448_v47  ;;  %1999 = vmatpush1.bf16.msra.mxu1 %v3450_v48  ;;  %v542_v47 = vld [vmem:[#allocation2 + $0x668] sm:$0xff]  ;;  %v3504_v48 = vcombine.low %v529_v35, %v533_v36  ;;  %v589_v35 = vld [vmem:[#allocation2 + $0x7e0] sm:$0xff] }
 0x120   :  { %1918 = vmatprep.subr.bf16.mxu0 %v3457_v49  ;;  %2000 = vmatprep.subr.bf16.mxu1 %v3459_v50  ;;  %v3506_v49 = vcombine.low %v530_v31, %v534_v40  ;;  %v3513_v50 = vcombine.high %v537_v44, %v541_v45  ;;  %v3515_v51 = vcombine.high %v538_v46, %v542_v47  ;;  %v582_v26 = vld [vmem:[#allocation2 + $0x7a8] sm:$0xff]  ;;  %v343_v44 = vld [vmem:[#allocation2 + $0x30] sm:$0xff]  ;;  %v340_v45 = vld [vmem:[#allocation2 + $0x18] sm:$0xff] }
 0x121   :  { %v586_v36 = vld [vmem:[#allocation2 + $0x7c8] sm:$0xff] }
 0x122   :  { %v590_v31 = vld [vmem:[#allocation2 + $0x7e8] sm:$0xff] }
 0x123   :  { %1919 = vmatpush1.bf16.msra.mxu0 %v3456_v11  ;;  %2001 = vmatpush1.bf16.msra.mxu1 %v3458_v12  ;;  %v3514_v11 = vcombine.low %v538_v46, %v542_v47  ;;  %v3521_v12 = vcombine.high %v545_v52, %v549_v53  ;;  %v344_v46 = vld [vmem:[#allocation2 + $0x38] sm:$0xff]  ;;  %v347_v52 = vld [vmem:[#allocation2 + $0x50] sm:$0xff] }
 0x124   :  { %1920 = vmatprep.subr.bf16.mxu0 %v3465_v13  ;;  %2002 = vmatprep.subr.bf16.mxu1 %v3467_v15  ;;  %v3523_v13 = vcombine.high %v546_v54, %v550_v55  ;;  %v553_v15 = vld [vmem:[#allocation2 + $0x6c0] sm:$0xff]  ;;  %v351_v53 = vld [vmem:[#allocation2 + $0x70] sm:$0xff] }
 0x125   :  { %v3528_v4 = vcombine.low %v553_v15, %v557_v16 }
 0x127   :  { %1921 = vmatpush1.bf16.msra.mxu0 %v3464_v61  ;;  %2003 = vmatpush1.bf16.msra.mxu1 %v3466_v62  ;;  %v3522_v61 = vcombine.low %v546_v54, %v550_v55  ;;  %v3529_v62 = vcombine.high %v553_v15, %v557_v16  ;;  %v348_v54 = vld [vmem:[#allocation2 + $0x58] sm:$0xff]  ;;  %v355_v16 = vld [vmem:[#allocation2 + $0x90] sm:$0xff] }
 0x128   :  { %1922 = vmatprep.subr.bf16.mxu0 %v3473_v63  ;;  %2004 = vmatprep.subr.bf16.mxu1 %v3475_v0  ;;  %v3531_v63 = vcombine.high %v554_v59, %v558_v32  ;;  %v561_v0 = vld [vmem:[#allocation2 + $0x700] sm:$0xff]  ;;  %v352_v55 = vld [vmem:[#allocation2 + $0x78] sm:$0xff] }
 0x129   :  { %v3536_v10 = vcombine.low %v561_v0, %v565_v1  ;;  %v3327_v15 = vcombine.high %v348_v54, %v352_v55 }
 0x12b   :  { %1923 = vmatpush1.bf16.msra.mxu0 %v3472_v5  ;;  %2005 = vmatpush1.bf16.msra.mxu1 %v3474_v6  ;;  %v3530_v5 = vcombine.low %v554_v59, %v558_v32  ;;  %v3537_v6 = vcombine.high %v561_v0, %v565_v1  ;;  %v359_v59 = vld [vmem:[#allocation2 + $0xb0] sm:$0xff]  ;;  %v360_v32 = vld [vmem:[#allocation2 + $0xb8] sm:$0xff] }
 0x12c   :  { %1924 = vmatprep.subr.bf16.mxu0 %v3481_v7  ;;  %2006 = vmatprep.subr.bf16.mxu1 %v3483_v8  ;;  %v3539_v7 = vcombine.high %v562_v2, %v566_v3  ;;  %v569_v8 = vld [vmem:[#allocation2 + $0x740] sm:$0xff]  ;;  %v363_v0 = vld [vmem:[#allocation2 + $0xd0] sm:$0xff] }
 0x12d   :  { %v3544_v27 = vcombine.low %v569_v8, %v573_v20  ;;  %v367_v1 = vld [vmem:[#allocation2 + $0xf0] sm:$0xff] }
 0x12f   :  { %1925 = vmatpush1.bf16.msra.mxu0 %v3480_v14  ;;  %2007 = vmatpush1.bf16.msra.mxu1 %v3482_v18  ;;  %v3538_v14 = vcombine.low %v562_v2, %v566_v3  ;;  %v3545_v18 = vcombine.high %v569_v8, %v573_v20  ;;  %v364_v2 = vld [vmem:[#allocation2 + $0xd8] sm:$0xff]  ;;  %v371_v8 = vld [vmem:[#allocation2 + $0x110] sm:$0xff] }
 0x130   :  { %1926 = vmatprep.subr.bf16.mxu0 %v3489_v19  ;;  %2008 = vmatprep.subr.bf16.mxu1 %v3491_v21  ;;  %v3547_v19 = vcombine.high %v570_v9, %v574_v24  ;;  %v577_v21 = vld [vmem:[#allocation2 + $0x780] sm:$0xff]  ;;  %v368_v3 = vld [vmem:[#allocation2 + $0xf8] sm:$0xff]  ;;  %v375_v20 = vld [vmem:[#allocation2 + $0x130] sm:$0xff] }
 0x131   :  { %v3552_v40 = vcombine.low %v577_v21, %v581_v22 }
 0x133   :  { %1927 = vmatpush1.bf16.msra.mxu0 %v3488_v28  ;;  %2009 = vmatpush1.bf16.msra.mxu1 %v3490_v29  ;;  %v3546_v28 = vcombine.low %v570_v9, %v574_v24  ;;  %v3553_v29 = vcombine.high %v577_v21, %v581_v22  ;;  %v376_v9 = vld [vmem:[#allocation2 + $0x138] sm:$0xff]  ;;  %v3340_v24 = vcombine.low %v363_v0, %v367_v1  ;;  %v383_v21 = vld [vmem:[#allocation2 + $0x170] sm:$0xff] }
 0x134   :  { %1928 = vmatprep.subr.bf16.mxu0 %v3497_v30  ;;  %2010 = vmatprep.subr.bf16.mxu1 %v3499_v34  ;;  %v3555_v30 = vcombine.high %v578_v25, %v582_v26  ;;  %v585_v34 = vld [vmem:[#allocation2 + $0x7c0] sm:$0xff]  ;;  %v380_v22 = vld [vmem:[#allocation2 + $0x158] sm:$0xff] }
 0x135   :  { %v3560_v47 = vcombine.low %v585_v34, %v589_v35 }
 0x137   :  { %1929 = vmatpush1.bf16.msra.mxu0 %v3496_v41  ;;  %2011 = vmatpush1.bf16.msra.mxu1 %v3498_v33  ;;  %v3554_v41 = vcombine.low %v578_v25, %v582_v26  ;;  %v3561_v33 = vcombine.high %v585_v34, %v589_v35  ;;  %v384_v25 = vld [vmem:[#allocation2 + $0x178] sm:$0xff]  ;;  %v3348_v26 = vcombine.low %v371_v8, %v375_v20  ;;  %v391_v34 = vld [vmem:[#allocation2 + $0x1b0] sm:$0xff] }
 0x138   :  { %1930 = vmatprep.subr.bf16.mxu0 %v3505_v42  ;;  %2012 = vmatprep.subr.bf16.mxu1 %v3507_v43  ;;  %v3563_v42 = vcombine.high %v586_v36, %v590_v31  ;;  %v339_v43 = vld [vmem:[#allocation2 + $0x10] sm:$0xff]  ;;  %v388_v35 = vld [vmem:[#allocation2 + $0x198] sm:$0xff] }
 0x13b   :  { %1931 = vmatpush1.bf16.msra.mxu0 %v3504_v48  ;;  %2013 = vmatpush1.bf16.msra.mxu1 %v3506_v49  ;;  %v3562_v48 = vcombine.low %v586_v36, %v590_v31  ;;  %v331_v49 = vmax.f32 %v4145_v37, 0.0  ;;  %v356_v37 = vld [vmem:[#allocation2 + $0x98] sm:$0xff] }
 0x13c   :  { %1932 = vmatprep.subr.bf16.mxu0 %v3513_v50  ;;  %2014 = vmatprep.subr.bf16.mxu1 %v3515_v51  ;;  %v3317_v50 = vcombine.high %v339_v43, %v343_v44  ;;  %v3319_v51 = vcombine.high %v340_v45, %v344_v46  ;;  %v392_v36 = vld [vmem:[#allocation2 + $0x1b8] sm:$0xff] }
 0x13f   :  { %1933 = vmatpush1.bf16.msra.mxu0 %v3512_v58  ;;  %2015 = vmatpush1.bf16.msra.mxu1 %v3514_v11  ;;  %v3316_v58 = vcombine.low %v339_v43, %v343_v44  ;;  %v4166_v11 = vpack.c.bf16 %v331_v49, %v331_v49  ;;  %v399_v43 = vld [vmem:[#allocation2 + $0x1f0] sm:$0xff]  ;;  %v396_v44 = vld [vmem:[#allocation2 + $0x1d8] sm:$0xff] }
 0x140   :  { %1934 = vmatprep.subr.bf16.mxu0 %v3521_v12  ;;  %2016 = vmatprep.subr.bf16.mxu1 %v3523_v13  ;;  %v3318_v12 = vcombine.low %v340_v45, %v344_v46  ;;  %v3325_v13 = vcombine.high %v347_v52, %v351_v53  ;;  %v400_v45 = vld [vmem:[#allocation2 + $0x1f8] sm:$0xff] }
 0x141   :  { %v3375_v49 = vcombine.high %v396_v44, %v400_v45 }
 0x143   :  { %1935 = vmatpush1.bf16.msra.mxu0 %v3520_v60  ;;  %2017 = vmatpush1.bf16.msra.mxu1 %v3522_v61  ;;  %v3324_v60 = vcombine.low %v347_v52, %v351_v53  ;;  %v3326_v61 = vcombine.low %v348_v54, %v352_v55  ;;  %v404_v52 = vld [vmem:[#allocation2 + $0x218] sm:$0xff]  ;;  %v3374_v55 = vcombine.low %v396_v44, %v400_v45 }
 0x144   :  { %1936 = vmatprep.subr.bf16.mxu0 %v3529_v62  ;;  %2018 = vmatprep.subr.bf16.mxu1 %v3531_v63  ;;  %v3333_v62 = vcombine.high %v355_v16, %v359_v59  ;;  %v3335_v63 = vcombine.high %v356_v37, %v360_v32  ;;  %v408_v53 = vld [vmem:[#allocation2 + $0x238] sm:$0xff] }
 0x147   :  { %1937 = vmatpush1.bf16.msra.mxu0 %v3528_v4  ;;  %2019 = vmatpush1.bf16.msra.mxu1 %v3530_v5  ;;  %v3332_v4 = vcombine.low %v355_v16, %v359_v59  ;;  %v3334_v5 = vcombine.low %v356_v37, %v360_v32  ;;  %v412_v16 = vld [vmem:[#allocation2 + $0x258] sm:$0xff]  ;;  %v3382_v32 = vcombine.low %v404_v52, %v408_v53 }
 0x148   :  { %1938 = vmatprep.subr.bf16.mxu0 %v3537_v6  ;;  %2020 = vmatprep.subr.bf16.mxu1 %v3539_v7  ;;  %v3341_v6 = vcombine.high %v363_v0, %v367_v1  ;;  %v3343_v7 = vcombine.high %v364_v2, %v368_v3  ;;  %v416_v59 = vld [vmem:[#allocation2 + $0x278] sm:$0xff] }
 0x149   :  { %v420_v0 = vld [vmem:[#allocation2 + $0x298] sm:$0xff] }
 0x14a   :  { %v424_v1 = vld [vmem:[#allocation2 + $0x2b8] sm:$0xff] }
 0x14b   :  { %1939 = vmatpush1.bf16.msra.mxu0 %v3536_v10  ;;  %2021 = vmatpush1.bf16.msra.mxu1 %v3538_v14  ;;  %v3342_v10 = vcombine.low %v364_v2, %v368_v3  ;;  %v3349_v14 = vcombine.high %v371_v8, %v375_v20  ;;  %v3390_v3 = vcombine.low %v412_v16, %v416_v59  ;;  %v428_v8 = vld [vmem:[#allocation2 + $0x2d8] sm:$0xff] }
 0x14c   :  { %1940 = vmatprep.subr.bf16.mxu0 %v3545_v18  ;;  %2022 = vmatprep.subr.bf16.mxu1 %v3547_v19  ;;  %v379_v19 = vld [vmem:[#allocation2 + $0x150] sm:$0xff]  ;;  %v432_v20 = vld [vmem:[#allocation2 + $0x2f8] sm:$0xff] }
 0x14d   :  { %v3356_v31 = vcombine.low %v379_v19, %v383_v21 }
 0x14f   :  { %1941 = vmatpush1.bf16.msra.mxu0 %v3544_v27  ;;  %2023 = vmatpush1.bf16.msra.mxu1 %v3546_v28  ;;  %v3357_v28 = vcombine.high %v379_v19, %v383_v21  ;;  %v436_v19 = vld [vmem:[#allocation2 + $0x318] sm:$0xff] }
 0x150   :  { %1942 = vmatprep.subr.bf16.mxu0 %v3553_v29  ;;  %2024 = vmatprep.subr.bf16.mxu1 %v3555_v30  ;;  %v3359_v29 = vcombine.high %v380_v22, %v384_v25  ;;  %v387_v30 = vld [vmem:[#allocation2 + $0x190] sm:$0xff]  ;;  %v440_v21 = vld [vmem:[#allocation2 + $0x338] sm:$0xff] }
 0x151   :  { %v3364_v46 = vcombine.low %v387_v30, %v391_v34 }
 0x153   :  { %1943 = vmatpush1.bf16.msra.mxu0 %v3552_v40  ;;  %2025 = vmatpush1.bf16.msra.mxu1 %v3554_v41  ;;  %v3358_v40 = vcombine.low %v380_v22, %v384_v25  ;;  %v3365_v41 = vcombine.high %v387_v30, %v391_v34  ;;  %v3406_v25 = vcombine.low %v428_v8, %v432_v20  ;;  %v444_v30 = vld [vmem:[#allocation2 + $0x358] sm:$0xff] }
 0x154   :  { %1944 = vmatprep.subr.bf16.mxu0 %v3561_v33  ;;  %2026 = vmatprep.subr.bf16.mxu1 %v3563_v42  ;;  %v3367_v33 = vcombine.high %v388_v35, %v392_v36  ;;  %v395_v42 = vld [vmem:[#allocation2 + $0x1d0] sm:$0xff]  ;;  %v448_v34 = vld [vmem:[#allocation2 + $0x378] sm:$0xff] }
 0x155   :  { %v3372_v54 = vcombine.low %v395_v42, %v399_v43  ;;  %v3422_v45 = vcombine.low %v444_v30, %v448_v34 }
 0x157   :  { %1945 = vmatpush1.bf16.msra.mxu0 %v3560_v47  ;;  %2027 = vmatpush1.bf16.msra.mxu1 %v3562_v48  ;;  %v3366_v47 = vcombine.low %v388_v35, %v392_v36  ;;  %v3373_v48 = vcombine.high %v395_v42, %v399_v43  ;;  %v3414_v36 = vcombine.low %v436_v19, %v440_v21  ;;  %v452_v42 = vld [vmem:[#allocation2 + $0x398] sm:$0xff] }
 0x158   :  { %2037 = vmatprep.subr.bf16.mxu0 %v3317_v50  ;;  %2119 = vmatprep.subr.bf16.mxu1 %v3319_v51  ;;  %v403_v50 = vld [vmem:[#allocation2 + $0x210] sm:$0xff]  ;;  %v456_v43 = vld [vmem:[#allocation2 + $0x3b8] sm:$0xff] }
 0x159   :  { %v407_v51 = vld [vmem:[#allocation2 + $0x230] sm:$0xff] }
 0x15a   :  { %1947 = vmatmul.mubr.bf16.vlgmr.msra.gmra.mrb[4].mxu0 %v4166_v11  ;;  %2029 = vmatmul.mubr.bf16.vlgmr.msra.gmra.mrb[4].mxu1 %v4166_v11  ;;  %v3380_v37 = vcombine.low %v403_v50, %v407_v51 }
 0x15b   :  { %2038 = vmatpush1.bf16.msra.mxu0 %v3316_v58  ;;  %2069 = vmatprep.mubr.bf16.mxu0 %v4147_v39  ;;  %v3381_v58 = vcombine.high %v403_v50, %v407_v51  ;;  %v460_v50 = vld [vmem:[#allocation2 + $0x3d8] sm:$0xff] }
 0x15c   :  { %2120 = vmatpush1.bf16.msra.mxu1 %v3318_v12  ;;  %2151 = vmatprep.mubr.bf16.mxu1 %v4147_v39  ;;  %v372_v39 = vld [vmem:[#allocation2 + $0x118] sm:$0xff]  ;;  %v3383_v12 = vcombine.high %v404_v52, %v408_v53  ;;  %v3430_v53 = vcombine.low %v452_v42, %v456_v43 }
 0x15d   :  { %2039 = vmatprep.subr.bf16.mxu0 %v3325_v13  ;;  %2121 = vmatprep.subr.bf16.mxu1 %v3327_v15  ;;  %v3351_v18 = vcombine.high %v372_v39, %v376_v9  ;;  %v3350_v27 = vcombine.low %v372_v39, %v376_v9  ;;  %v411_v13 = vld [vmem:[#allocation2 + $0x250] sm:$0xff]  ;;  %v3398_v9 = vcombine.low %v420_v0, %v424_v1  ;;  %v464_v51 = vld [vmem:[#allocation2 + $0x3f8] sm:$0xff] }
 0x15e   :  { %v415_v15 = vld [vmem:[#allocation2 + $0x270] sm:$0xff] }
 0x15f   :  { %2040 = vmatpush1.bf16.msra.mxu0 %v3324_v60  ;;  %v3389_v60 = vcombine.high %v411_v13, %v415_v15  ;;  %v3388_v2 = vcombine.low %v411_v13, %v415_v15  ;;  %v468_v13 = vld [vmem:[#allocation2 + $0x418] sm:$0xff] }
 0x160   :  { %2122 = vmatpush1.bf16.msra.mxu1 %v3326_v61  ;;  %2041 = vmatprep.subr.bf16.mxu0 %v3333_v62  ;;  %v3391_v61 = vcombine.high %v412_v16, %v416_v59  ;;  %v419_v62 = vld [vmem:[#allocation2 + $0x290] sm:$0xff]  ;;  %v472_v15 = vld [vmem:[#allocation2 + $0x438] sm:$0xff]  ;;  %v3438_v59 = vcombine.low %v460_v50, %v464_v51 }
 0x161   :  { %2123 = vmatprep.subr.bf16.mxu1 %v3335_v63  ;;  %v423_v63 = vld [vmem:[#allocation2 + $0x2b0] sm:$0xff] }
 0x162   :  { %v3396_v39 = vcombine.low %v419_v62, %v423_v63 }
 0x163   :  { %2042 = vmatpush1.bf16.msra.mxu0 %v3332_v4  ;;  %v3397_v4 = vcombine.high %v419_v62, %v423_v63  ;;  %v476_v63 = vld [vmem:[#allocation2 + $0x458] sm:$0xff] }
 0x164   :  { %2124 = vmatpush1.bf16.msra.mxu1 %v3334_v5  ;;  %2043 = vmatprep.subr.bf16.mxu0 %v3341_v6  ;;  %v3399_v5 = vcombine.high %v420_v0, %v424_v1  ;;  %v427_v6 = vld [vmem:[#allocation2 + $0x2d0] sm:$0xff]  ;;  %v480_v0 = vld [vmem:[#allocation2 + $0x478] sm:$0xff]  ;;  %v3446_v1 = vcombine.low %v468_v13, %v472_v15 }
 0x165   :  { %2125 = vmatprep.subr.bf16.mxu1 %v3343_v7  ;;  %v431_v7 = vld [vmem:[#allocation2 + $0x2f0] sm:$0xff] }
 0x166   :  { %v3404_v22 = vcombine.low %v427_v6, %v431_v7 }
 0x167   :  { %2044 = vmatpush1.bf16.msra.mxu0 %v3340_v24  ;;  %v3405_v24 = vcombine.high %v427_v6, %v431_v7  ;;  %v484_v6 = vld [vmem:[#allocation2 + $0x498] sm:$0xff] }
 0x168   :  { %2126 = vmatpush1.bf16.msra.mxu1 %v3342_v10  ;;  %2045 = vmatprep.subr.bf16.mxu0 %v3349_v14  ;;  %v3407_v10 = vcombine.high %v428_v8, %v432_v20  ;;  %v435_v14 = vld [vmem:[#allocation2 + $0x310] sm:$0xff]  ;;  %v488_v7 = vld [vmem:[#allocation2 + $0x4b8] sm:$0xff]  ;;  %v3454_v20 = vcombine.low %v476_v63, %v480_v0 }
 0x169   :  { %2127 = vmatprep.subr.bf16.mxu1 %v3351_v18  ;;  %v439_v18 = vld [vmem:[#allocation2 + $0x330] sm:$0xff] }
 0x16a   :  { %v3412_v35 = vcombine.low %v435_v14, %v439_v18 }
 0x16b   :  { %2046 = vmatpush1.bf16.msra.mxu0 %v3348_v26  ;;  %v3413_v26 = vcombine.high %v435_v14, %v439_v18  ;;  %v492_v14 = vld [vmem:[#allocation2 + $0x4d8] sm:$0xff] }
 0x16c   :  { %2128 = vmatpush1.bf16.msra.mxu1 %v3350_v27  ;;  %2047 = vmatprep.subr.bf16.mxu0 %v3357_v28  ;;  %v3415_v27 = vcombine.high %v436_v19, %v440_v21  ;;  %v443_v28 = vld [vmem:[#allocation2 + $0x350] sm:$0xff]  ;;  %v496_v18 = vld [vmem:[#allocation2 + $0x4f8] sm:$0xff] }
 0x16d   :  { %2129 = vmatprep.subr.bf16.mxu1 %v3359_v29  ;;  %v447_v29 = vld [vmem:[#allocation2 + $0x370] sm:$0xff] }
 0x16e   :  { %v3420_v44 = vcombine.low %v443_v28, %v447_v29 }
 0x16f   :  { %2048 = vmatpush1.bf16.msra.mxu0 %v3356_v31  ;;  %v3421_v31 = vcombine.high %v443_v28, %v447_v29  ;;  %v504_v28 = vld [vmem:[#allocation2 + $0x538] sm:$0xff]  ;;  %v3470_v29 = vcombine.low %v492_v14, %v496_v18 }
 0x170   :  { %2130 = vmatpush1.bf16.msra.mxu1 %v3358_v40  ;;  %2049 = vmatprep.subr.bf16.mxu0 %v3365_v41  ;;  %v3423_v40 = vcombine.high %v444_v30, %v448_v34  ;;  %v451_v41 = vld [vmem:[#allocation2 + $0x390] sm:$0xff] }
 0x171   :  { %2131 = vmatprep.subr.bf16.mxu1 %v3367_v33  ;;  %v455_v33 = vld [vmem:[#allocation2 + $0x3b0] sm:$0xff] }
 0x172   :  { %v3428_v52 = vcombine.low %v451_v41, %v455_v33 }
 0x173   :  { %2050 = vmatpush1.bf16.msra.mxu0 %v3364_v46  ;;  %v3429_v46 = vcombine.high %v451_v41, %v455_v33 }
 0x174   :  { %2132 = vmatpush1.bf16.msra.mxu1 %v3366_v47  ;;  %2051 = vmatprep.subr.bf16.mxu0 %v3373_v48  ;;  %v3431_v47 = vcombine.high %v452_v42, %v456_v43  ;;  %v459_v48 = vld [vmem:[#allocation2 + $0x3d0] sm:$0xff] }
 0x175   :  { %2133 = vmatprep.subr.bf16.mxu1 %v3375_v49  ;;  %v463_v49 = vld [vmem:[#allocation2 + $0x3f0] sm:$0xff] }
 0x176   :  { %v3436_v16 = vcombine.low %v459_v48, %v463_v49 }
 0x177   :  { %2052 = vmatpush1.bf16.msra.mxu0 %v3372_v54  ;;  %v3437_v54 = vcombine.high %v459_v48, %v463_v49 }
 0x178   :  { %2134 = vmatpush1.bf16.msra.mxu1 %v3374_v55  ;;  %2053 = vmatprep.subr.bf16.mxu0 %v3381_v58  ;;  %v3439_v55 = vcombine.high %v460_v50, %v464_v51  ;;  %v467_v58 = vld [vmem:[#allocation2 + $0x410] sm:$0xff] }
 0x179   :  { %2135 = vmatprep.subr.bf16.mxu1 %v3383_v12  ;;  %v471_v12 = vld [vmem:[#allocation2 + $0x430] sm:$0xff] }
 0x17a   :  { %v3444_v62 = vcombine.low %v467_v58, %v471_v12 }
 0x17b   :  { %2054 = vmatpush1.bf16.msra.mxu0 %v3380_v37  ;;  %v3445_v37 = vcombine.high %v467_v58, %v471_v12 }
 0x17c   :  { %2136 = vmatpush1.bf16.msra.mxu1 %v3382_v32  ;;  %2055 = vmatprep.subr.bf16.mxu0 %v3389_v60  ;;  %v3447_v32 = vcombine.high %v468_v13, %v472_v15  ;;  %v475_v60 = vld [vmem:[#allocation2 + $0x450] sm:$0xff] }
 0x17d   :  { %2137 = vmatprep.subr.bf16.mxu1 %v3391_v61  ;;  %v479_v61 = vld [vmem:[#allocation2 + $0x470] sm:$0xff] }
 0x17e   :  { %v3452_v8 = vcombine.low %v475_v60, %v479_v61 }
 0x17f   :  { %2056 = vmatpush1.bf16.msra.mxu0 %v3388_v2  ;;  %v3453_v2 = vcombine.high %v475_v60, %v479_v61 }
 0x180   :  { %2138 = vmatpush1.bf16.msra.mxu1 %v3390_v3  ;;  %2057 = vmatprep.subr.bf16.mxu0 %v3397_v4  ;;  %v483_v3 = vld [vmem:[#allocation2 + $0x490] sm:$0xff] }
 0x181   :  { %2139 = vmatprep.subr.bf16.mxu1 %v3399_v5  ;;  %v487_v4 = vld [vmem:[#allocation2 + $0x4b0] sm:$0xff]  ;;  %v3455_v5 = vcombine.high %v476_v63, %v480_v0 }
 0x182   :  { %v3460_v19 = vcombine.low %v483_v3, %v487_v4  ;;  %v539_v0 = vld [vmem:[#allocation2 + $0x650] sm:$0xff] }
 0x183   :  { %2058 = vmatpush1.bf16.msra.mxu0 %v3396_v39  ;;  %v3461_v39 = vcombine.high %v483_v3, %v487_v4  ;;  %v544_v3 = vld [vmem:[#allocation2 + $0x678] sm:$0xff] }
 0x184   :  { %2140 = vmatpush1.bf16.msra.mxu1 %v3398_v9  ;;  %2059 = vmatprep.subr.bf16.mxu0 %v3405_v24  ;;  %v3463_v9 = vcombine.high %v484_v6, %v488_v7  ;;  %v491_v24 = vld [vmem:[#allocation2 + $0x4d0] sm:$0xff] }
 0x185   :  { %2141 = vmatprep.subr.bf16.mxu1 %v3407_v10  ;;  %v495_v10 = vld [vmem:[#allocation2 + $0x4f0] sm:$0xff] }
 0x186   :  { %v3469_v21 = vcombine.high %v491_v24, %v495_v10 }
 0x187   :  { %2060 = vmatpush1.bf16.msra.mxu0 %v3404_v22  ;;  %v3471_v22 = vcombine.high %v492_v14, %v496_v18 }
 0x188   :  { %2142 = vmatpush1.bf16.msra.mxu1 %v3406_v25  ;;  %2061 = vmatprep.subr.bf16.mxu0 %v3413_v26  ;;  %v499_v25 = vld [vmem:[#allocation2 + $0x510] sm:$0xff] }
 0x189   :  { %2143 = vmatprep.subr.bf16.mxu1 %v3415_v27  ;;  %v503_v26 = vld [vmem:[#allocation2 + $0x530] sm:$0xff]  ;;  %v500_v27 = vld [vmem:[#allocation2 + $0x518] sm:$0xff] }
 0x18a   :  { %v3477_v30 = vcombine.high %v499_v25, %v503_v26  ;;  %v3479_v34 = vcombine.high %v500_v27, %v504_v28  ;;  %v3476_v41 = vcombine.low %v499_v25, %v503_v26  ;;  %v3478_v33 = vcombine.low %v500_v27, %v504_v28 }
 0x18b   :  { %2062 = vmatpush1.bf16.msra.mxu0 %v3412_v35  ;;  %v507_v35 = vld [vmem:[#allocation2 + $0x550] sm:$0xff] }
 0x18c   :  { %2144 = vmatpush1.bf16.msra.mxu1 %v3414_v36  ;;  %2063 = vmatprep.subr.bf16.mxu0 %v3421_v31  ;;  %v511_v36 = vld [vmem:[#allocation2 + $0x570] sm:$0xff]  ;;  %v508_v31 = vld [vmem:[#allocation2 + $0x558] sm:$0xff] }
 0x18d   :  { %2145 = vmatprep.subr.bf16.mxu1 %v3423_v40  ;;  %v512_v40 = vld [vmem:[#allocation2 + $0x578] sm:$0xff]  ;;  %v3485_v42 = vcombine.high %v507_v35, %v511_v36  ;;  %v3484_v48 = vcombine.low %v507_v35, %v511_v36 }
 0x18e   :  { %v3487_v43 = vcombine.high %v508_v31, %v512_v40  ;;  %v3486_v49 = vcombine.low %v508_v31, %v512_v40 }
 0x18f   :  { %2064 = vmatpush1.bf16.msra.mxu0 %v3420_v44  ;;  %v515_v44 = vld [vmem:[#allocation2 + $0x590] sm:$0xff] }
 0x190   :  { %2146 = vmatpush1.bf16.msra.mxu1 %v3422_v45  ;;  %2065 = vmatprep.subr.bf16.mxu0 %v3429_v46  ;;  %v519_v45 = vld [vmem:[#allocation2 + $0x5b0] sm:$0xff]  ;;  %v516_v46 = vld [vmem:[#allocation2 + $0x598] sm:$0xff] }
 0x191   :  { %2147 = vmatprep.subr.bf16.mxu1 %v3431_v47  ;;  %v520_v47 = vld [vmem:[#allocation2 + $0x5b8] sm:$0xff]  ;;  %v3493_v50 = vcombine.high %v515_v44, %v519_v45  ;;  %v3492_v58 = vcombine.low %v515_v44, %v519_v45 }
 0x192   :  { %v3495_v51 = vcombine.high %v516_v46, %v520_v47  ;;  %v3494_v12 = vcombine.low %v516_v46, %v520_v47 }
 0x193   :  { %2066 = vmatpush1.bf16.msra.mxu0 %v3428_v52  ;;  %v523_v52 = vld [vmem:[#allocation2 + $0x5d0] sm:$0xff] }
 0x194   :  { %2148 = vmatpush1.bf16.msra.mxu1 %v3430_v53  ;;  %2067 = vmatprep.subr.bf16.mxu0 %v3437_v54  ;;  %v527_v53 = vld [vmem:[#allocation2 + $0x5f0] sm:$0xff]  ;;  %v524_v54 = vld [vmem:[#allocation2 + $0x5d8] sm:$0xff] }
 0x195   :  { %2149 = vmatprep.subr.bf16.mxu1 %v3439_v55  ;;  %v528_v55 = vld [vmem:[#allocation2 + $0x5f8] sm:$0xff]  ;;  %v3501_v13 = vcombine.high %v523_v52, %v527_v53  ;;  %v3500_v60 = vcombine.low %v523_v52, %v527_v53 }
 0x196   :  { %v3503_v15 = vcombine.high %v524_v54, %v528_v55  ;;  %v3502_v61 = vcombine.low %v524_v54, %v528_v55 }
 0x197   :  { %2068 = vmatpush1.bf16.msra.mxu0 %v3436_v16  ;;  %v531_v16 = vld [vmem:[#allocation2 + $0x610] sm:$0xff] }
 0x198   :  { %2150 = vmatpush1.bf16.msra.mxu1 %v3438_v59  ;;  %2078 = vmatprep.subr.bf16.mxu0 %v3445_v37  ;;  %v535_v59 = vld [vmem:[#allocation2 + $0x630] sm:$0xff]  ;;  %v532_v37 = vld [vmem:[#allocation2 + $0x618] sm:$0xff] }
 0x199   :  { %2160 = vmatprep.subr.bf16.mxu1 %v3447_v32  ;;  %v536_v32 = vld [vmem:[#allocation2 + $0x638] sm:$0xff]  ;;  %v3508_v4 = vcombine.low %v531_v16, %v535_v59 }
 0x19a   :  { %2070 = vmatmul.mubr.bf16.vlgmr.msra.gmra.mrb[8].mxu0 %v4149_v38  ;;  %v3511_v63 = vcombine.high %v532_v37, %v536_v32 }
 0x19b   :  { %2152 = vmatmul.mubr.bf16.vlgmr.msra.gmra.mrb[8].mxu1 %v4149_v38  ;;  %2079 = vmatpush1.bf16.msra.mxu0 %v3444_v62  ;;  %v3462_v38 = vcombine.low %v484_v6, %v488_v7  ;;  %v3509_v62 = vcombine.high %v531_v16, %v535_v59 }
 0x19c   :  { %2110 = vmatprep.mubr.bf16.mxu0 %v4161_v17  ;;  %2161 = vmatpush1.bf16.msra.mxu1 %v3446_v1  ;;  %v543_v1 = vld [vmem:[#allocation2 + $0x670] sm:$0xff] }
 0x19d   :  { %2192 = vmatprep.mubr.bf16.mxu1 %v4161_v17  ;;  %2080 = vmatprep.subr.bf16.mxu0 %v3453_v2  ;;  %v3468_v17 = vcombine.low %v491_v24, %v495_v10  ;;  %v540_v2 = vld [vmem:[#allocation2 + $0x658] sm:$0xff]  ;;  %v3517_v6 = vcombine.high %v539_v0, %v543_v1  ;;  %v3516_v24 = vcombine.low %v539_v0, %v543_v1 }
 0x19e   :  { %2162 = vmatprep.subr.bf16.mxu1 %v3455_v5  ;;  %v3510_v5 = vcombine.low %v532_v37, %v536_v32  ;;  %v3519_v7 = vcombine.high %v540_v2, %v544_v3  ;;  %v3518_v10 = vcombine.low %v540_v2, %v544_v3  ;;  %v2346_v3 = vld [vmem:[%s4880_s5] sm:$0xff] }
 0x19f   :  { %2081 = vmatpush1.bf16.msra.mxu0 %v3452_v8  ;;  %v547_v8 = vld [vmem:[#allocation2 + $0x690] sm:$0xff] }
 0x1a0   :  { %2163 = vmatpush1.bf16.msra.mxu1 %v3454_v20  ;;  %2082 = vmatprep.subr.bf16.mxu0 %v3461_v39  ;;  %v551_v20 = vld [vmem:[#allocation2 + $0x6b0] sm:$0xff]  ;;  %v548_v39 = vld [vmem:[#allocation2 + $0x698] sm:$0xff] }
 0x1a1   :  { %2164 = vmatprep.subr.bf16.mxu1 %v3463_v9  ;;  %v552_v9 = vld [vmem:[#allocation2 + $0x6b8] sm:$0xff]  ;;  %v3525_v14 = vcombine.high %v547_v8, %v551_v20  ;;  %v3524_v25 = vcombine.low %v547_v8, %v551_v20  ;;  %v2364_v8 = vld [vmem:[%s4880_s5 + $0x90] sm:$0xff] }
 0x1a2   :  { %v3527_v18 = vcombine.high %v548_v39, %v552_v9  ;;  %v3526_v26 = vcombine.low %v548_v39, %v552_v9  ;;  %v2365_v20 = vld [vmem:[%s4880_s5 + $0x98] sm:$0xff]  ;;  %v2396_v39 = vld [vmem:[%s4880_s5 + $0x190] sm:$0xff] }
 0x1a3   :  { %2083 = vmatpush1.bf16.msra.mxu0 %v3460_v19  ;;  %v555_v19 = vld [vmem:[#allocation2 + $0x6d0] sm:$0xff]  ;;  %v2397_v9 = vld [vmem:[%s4880_s5 + $0x198] sm:$0xff] }
 0x1a4   :  { %2165 = vmatpush1.bf16.msra.mxu1 %v3462_v38  ;;  %2084 = vmatprep.subr.bf16.mxu0 %v3469_v21  ;;  %v559_v38 = vld [vmem:[#allocation2 + $0x6f0] sm:$0xff]  ;;  %v556_v21 = vld [vmem:[#allocation2 + $0x6d8] sm:$0xff] }
 0x1a5   :  { %2166 = vmatprep.subr.bf16.mxu1 %v3471_v22  ;;  %v560_v22 = vld [vmem:[#allocation2 + $0x6f8] sm:$0xff]  ;;  %v3533_v27 = vcombine.high %v555_v19, %v559_v38  ;;  %v3532_v35 = vcombine.low %v555_v19, %v559_v38  ;;  %v2380_v38 = vld [vmem:[%s4880_s5 + $0x110] sm:$0xff] }
 0x1a6   :  { %v3535_v28 = vcombine.high %v556_v21, %v560_v22  ;;  %v3534_v36 = vcombine.low %v556_v21, %v560_v22  ;;  %v2349_v19 = vld [vmem:[%s4880_s5 + $0x18] sm:$0xff]  ;;  %v3752_v21 = vpack.c.bf16 %v2397_v9, %v2396_v39  ;;  %v2407_v39 = vld [vmem:[%s4880_s5 + $0x1e8] sm:$0xff] }
 0x1a7   :  { %2085 = vmatpush1.bf16.msra.mxu0 %v3468_v17  ;;  %v563_v17 = vld [vmem:[#allocation2 + $0x710] sm:$0xff]  ;;  %v2381_v22 = vld [vmem:[%s4880_s5 + $0x118] sm:$0xff] }
 0x1a8   :  { %2167 = vmatpush1.bf16.msra.mxu1 %v3470_v29  ;;  %2086 = vmatprep.subr.bf16.mxu0 %v3477_v30  ;;  %v567_v29 = vld [vmem:[#allocation2 + $0x730] sm:$0xff]  ;;  %v564_v30 = vld [vmem:[#allocation2 + $0x718] sm:$0xff] }
 0x1a9   :  { %2168 = vmatprep.subr.bf16.mxu1 %v3479_v34  ;;  %v568_v34 = vld [vmem:[#allocation2 + $0x738] sm:$0xff]  ;;  %v3541_v31 = vcombine.high %v563_v17, %v567_v29  ;;  %v3540_v44 = vcombine.low %v563_v17, %v567_v29  ;;  %v3754_v29 = vpack.c.bf16 %v2381_v22, %v2380_v38  ;;  %v2376_v22 = vld [vmem:[%s4880_s5 + $0xf0] sm:$0xff] }
 0x1aa   :  { %v3543_v40 = vcombine.high %v564_v30, %v568_v34  ;;  %v3542_v45 = vcombine.low %v564_v30, %v568_v34  ;;  %v2350_v34 = vld [vmem:[%s4880_s5 + $0x20] sm:$0xff] }
 0x1ab   :  { %2087 = vmatpush1.bf16.msra.mxu0 %v3476_v41  ;;  %v571_v41 = vld [vmem:[#allocation2 + $0x750] sm:$0xff] }
 0x1ac   :  { %2169 = vmatpush1.bf16.msra.mxu1 %v3478_v33  ;;  %2088 = vmatprep.subr.bf16.mxu0 %v3485_v42  ;;  %v575_v33 = vld [vmem:[#allocation2 + $0x770] sm:$0xff]  ;;  %v572_v42 = vld [vmem:[#allocation2 + $0x758] sm:$0xff] }
 0x1ad   :  { %2170 = vmatprep.subr.bf16.mxu1 %v3487_v43  ;;  %v576_v43 = vld [vmem:[#allocation2 + $0x778] sm:$0xff]  ;;  %v3549_v46 = vcombine.high %v571_v41, %v575_v33  ;;  %v3548_v52 = vcombine.low %v571_v41, %v575_v33  ;;  %v2400_v33 = vld [vmem:[%s4880_s5 + $0x1b0] sm:$0xff] }
 0x1ae   :  { %v3551_v47 = vcombine.high %v572_v42, %v576_v43  ;;  %v3550_v53 = vcombine.low %v572_v42, %v576_v43  ;;  %v2369_v41 = vld [vmem:[%s4880_s5 + $0xb8] sm:$0xff] }
 0x1af   :  { %2089 = vmatpush1.bf16.msra.mxu0 %v3484_v48  ;;  %v579_v48 = vld [vmem:[#allocation2 + $0x790] sm:$0xff]  ;;  %v2401_v42 = vld [vmem:[%s4880_s5 + $0x1b8] sm:$0xff] }
 0x1b0   :  { %2171 = vmatpush1.bf16.msra.mxu1 %v3486_v49  ;;  %2090 = vmatprep.subr.bf16.mxu0 %v3493_v50  ;;  %v583_v49 = vld [vmem:[#allocation2 + $0x7b0] sm:$0xff]  ;;  %v580_v50 = vld [vmem:[#allocation2 + $0x798] sm:$0xff] }
 0x1b1   :  { %2172 = vmatprep.subr.bf16.mxu1 %v3495_v51  ;;  %v584_v51 = vld [vmem:[#allocation2 + $0x7b8] sm:$0xff]  ;;  %v3557_v54 = vcombine.high %v579_v48, %v583_v49  ;;  %v3556_v16 = vcombine.low %v579_v48, %v583_v49  ;;  %v2384_v48 = vld [vmem:[%s4880_s5 + $0x130] sm:$0xff]  ;;  %v3760_v49 = vpack.c.bf16 %v2401_v42, %v2400_v33  ;;  %v2459_v33 = vld [vmem:[%s4880_s5 + $0x388] sm:$0xff] }
 0x1b2   :  { %v3559_v55 = vcombine.high %v580_v50, %v584_v51  ;;  %v3558_v59 = vcombine.low %v580_v50, %v584_v51  ;;  %v2385_v50 = vld [vmem:[%s4880_s5 + $0x138] sm:$0xff]  ;;  %v2370_v51 = vld [vmem:[%s4880_s5 + $0xc0] sm:$0xff] }
 0x1b3   :  { %2091 = vmatpush1.bf16.msra.mxu0 %v3492_v58  ;;  %v587_v58 = vld [vmem:[#allocation2 + $0x7d0] sm:$0xff] }
 0x1b4   :  { %2173 = vmatpush1.bf16.msra.mxu1 %v3494_v12  ;;  %2092 = vmatprep.subr.bf16.mxu0 %v3501_v13  ;;  %v591_v12 = vld [vmem:[#allocation2 + $0x7f0] sm:$0xff]  ;;  %v588_v13 = vld [vmem:[#allocation2 + $0x7d8] sm:$0xff] }
 0x1b5   :  { %2174 = vmatprep.subr.bf16.mxu1 %v3503_v15  ;;  %v592_v15 = vld [vmem:[#allocation2 + $0x7f8] sm:$0xff]  ;;  %v3565_v37 = vcombine.high %v587_v58, %v591_v12  ;;  %v3564_v0 = vcombine.low %v587_v58, %v591_v12  ;;  %v3762_v58 = vpack.c.bf16 %v2385_v50, %v2384_v48 }
 0x1b6   :  { %v3567_v32 = vcombine.high %v588_v13, %v592_v15  ;;  %v3566_v1 = vcombine.low %v588_v13, %v592_v15  ;;  %v2354_v13 = vld [vmem:[%s4880_s5 + $0x40] sm:$0xff]  ;;  %v2355_v15 = vld [vmem:[%s4880_s5 + $0x48] sm:$0xff] }
 0x1b7   :  { %2093 = vmatpush1.bf16.msra.mxu0 %v3500_v60  ;;  %v2362_v60 = vld [vmem:[%s4880_s5 + $0x80] sm:$0xff] }
 0x1b8   :  { %2175 = vmatpush1.bf16.msra.mxu1 %v3502_v61  ;;  %2094 = vmatprep.subr.bf16.mxu0 %v3509_v62  ;;  %v2363_v61 = vld [vmem:[%s4880_s5 + $0x88] sm:$0xff]  ;;  %v2394_v62 = vld [vmem:[%s4880_s5 + $0x180] sm:$0xff] }
 0x1b9   :  { %2176 = vmatprep.subr.bf16.mxu1 %v3511_v63  ;;  %v2395_v63 = vld [vmem:[%s4880_s5 + $0x188] sm:$0xff]  ;;  %v3716_v2 = vpack.c.bf16 %v2363_v61, %v2362_v60  ;;  %v2373_v60 = vld [vmem:[%s4880_s5 + $0xd8] sm:$0xff]  ;;  %v2404_v61 = vld [vmem:[%s4880_s5 + $0x1d0] sm:$0xff] }
 0x1bb   :  { %2095 = vmatpush1.bf16.msra.mxu0 %v3508_v4  ;;  %v2347_v4 = vld [vmem:[%s4880_s5 + $0x8] sm:$0xff] }
 0x1bc   :  { %2177 = vmatpush1.bf16.msra.mxu1 %v3510_v5  ;;  %2096 = vmatprep.subr.bf16.mxu0 %v3517_v6  ;;  %v2378_v5 = vld [vmem:[%s4880_s5 + $0x100] sm:$0xff]  ;;  %v3748_v6 = vpack.c.bf16 %v2395_v63, %v2394_v62  ;;  %v2405_v62 = vld [vmem:[%s4880_s5 + $0x1d8] sm:$0xff]  ;;  %v3734_v63 = vpack.c.bf16 %v2355_v15, %v2354_v13 }
 0x1bd   :  { %2178 = vmatprep.subr.bf16.mxu1 %v3519_v7  ;;  %v2379_v7 = vld [vmem:[%s4880_s5 + $0x108] sm:$0xff] }
 0x1bf   :  { %2097 = vmatpush1.bf16.msra.mxu0 %v3516_v24  ;;  %v3718_v24 = vpack.c.bf16 %v2347_v4, %v2346_v3  ;;  %v2357_v3 = vld [vmem:[%s4880_s5 + $0x58] sm:$0xff]  ;;  %v2388_v4 = vld [vmem:[%s4880_s5 + $0x150] sm:$0xff] }
 0x1c0   :  { %2179 = vmatpush1.bf16.msra.mxu1 %v3518_v10  ;;  %2098 = vmatprep.subr.bf16.mxu0 %v3525_v14  ;;  %v3750_v10 = vpack.c.bf16 %v2379_v7, %v2378_v5  ;;  %v3720_v14 = vpack.c.bf16 %v2365_v20, %v2364_v8  ;;  %v3768_v5 = vpack.c.bf16 %v2405_v62, %v2404_v61  ;;  %v2374_v7 = vld [vmem:[%s4880_s5 + $0xe0] sm:$0xff]  ;;  %v2375_v8 = vld [vmem:[%s4880_s5 + $0xe8] sm:$0xff] }
 0x1c1   :  { %2180 = vmatprep.subr.bf16.mxu1 %v3527_v18  ;;  %v2348_v18 = vld [vmem:[%s4880_s5 + $0x10] sm:$0xff]  ;;  %v2406_v20 = vld [vmem:[%s4880_s5 + $0x1e0] sm:$0xff] }
 0x1c2   :  { %v3722_v17 = vpack.c.bf16 %v2349_v19, %v2348_v18  ;;  %v2359_v18 = vld [vmem:[%s4880_s5 + $0x68] sm:$0xff]  ;;  %v2390_v19 = vld [vmem:[%s4880_s5 + $0x160] sm:$0xff]  ;;  %v3772_v38 = vpack.c.bf16 %v2407_v39, %v2406_v20 }
 0x1c3   :  { %2099 = vmatpush1.bf16.msra.mxu0 %v3524_v25  ;;  %v2366_v25 = vld [vmem:[%s4880_s5 + $0xa0] sm:$0xff] }
 0x1c4   :  { %2181 = vmatpush1.bf16.msra.mxu1 %v3526_v26  ;;  %2100 = vmatprep.subr.bf16.mxu0 %v3533_v27  ;;  %v2367_v26 = vld [vmem:[%s4880_s5 + $0xa8] sm:$0xff]  ;;  %v2398_v27 = vld [vmem:[%s4880_s5 + $0x1a0] sm:$0xff] }
 0x1c5   :  { %2182 = vmatprep.subr.bf16.mxu1 %v3535_v28  ;;  %v2399_v28 = vld [vmem:[%s4880_s5 + $0x1a8] sm:$0xff]  ;;  %v3724_v30 = vpack.c.bf16 %v2367_v26, %v2366_v25  ;;  %v2377_v25 = vld [vmem:[%s4880_s5 + $0xf8] sm:$0xff]  ;;  %v2408_v26 = vld [vmem:[%s4880_s5 + $0x1f0] sm:$0xff] }
 0x1c7   :  { %2101 = vmatpush1.bf16.msra.mxu0 %v3532_v35  ;;  %v2351_v35 = vld [vmem:[%s4880_s5 + $0x28] sm:$0xff] }
 0x1c8   :  { %2183 = vmatpush1.bf16.msra.mxu1 %v3534_v36  ;;  %2102 = vmatprep.subr.bf16.mxu0 %v3541_v31  ;;  %v2382_v36 = vld [vmem:[%s4880_s5 + $0x120] sm:$0xff]  ;;  %v2383_v31 = vld [vmem:[%s4880_s5 + $0x128] sm:$0xff]  ;;  %v3726_v43 = vpack.c.bf16 %v2351_v35, %v2350_v34  ;;  %v2361_v34 = vld [vmem:[%s4880_s5 + $0x78] sm:$0xff] }
 0x1c9   :  { %2184 = vmatprep.subr.bf16.mxu1 %v3543_v40  ;;  %v2368_v40 = vld [vmem:[%s4880_s5 + $0xb0] sm:$0xff] }
 0x1ca   :  { %v2392_v35 = vld [vmem:[%s4880_s5 + $0x170] sm:$0xff] }
 0x1cb   :  { %2103 = vmatpush1.bf16.msra.mxu0 %v3540_v44  ;;  %v3758_v44 = vpack.c.bf16 %v2383_v31, %v2382_v36  ;;  %v2426_v31 = vld [vmem:[%s4880_s5 + $0x280] sm:$0xff] }
 0x1cc   :  { %2185 = vmatpush1.bf16.msra.mxu1 %v3542_v45  ;;  %2104 = vmatprep.subr.bf16.mxu0 %v3549_v46  ;;  %v3728_v45 = vpack.c.bf16 %v2369_v41, %v2368_v40  ;;  %v2352_v46 = vld [vmem:[%s4880_s5 + $0x30] sm:$0xff]  ;;  %v2427_v40 = vld [vmem:[%s4880_s5 + $0x288] sm:$0xff]  ;;  %v2458_v41 = vld [vmem:[%s4880_s5 + $0x380] sm:$0xff] }
 0x1cd   :  { %2186 = vmatprep.subr.bf16.mxu1 %v3551_v47  ;;  %v2353_v47 = vld [vmem:[%s4880_s5 + $0x38] sm:$0xff] }
 0x1cf   :  { %2105 = vmatpush1.bf16.msra.mxu0 %v3548_v52  ;;  %v2371_v52 = vld [vmem:[%s4880_s5 + $0xc8] sm:$0xff] }
 0x1d0   :  { %2187 = vmatpush1.bf16.msra.mxu1 %v3550_v53  ;;  %2106 = vmatprep.subr.bf16.mxu0 %v3557_v54  ;;  %v2402_v53 = vld [vmem:[%s4880_s5 + $0x1c0] sm:$0xff]  ;;  %v2403_v54 = vld [vmem:[%s4880_s5 + $0x1c8] sm:$0xff]  ;;  %v3732_v12 = vpack.c.bf16 %v2371_v52, %v2370_v51 }
 0x1d1   :  { %2188 = vmatprep.subr.bf16.mxu1 %v3559_v55  ;;  %v3730_v55 = vpack.c.bf16 %v2353_v47, %v2352_v46 }
 0x1d3   :  { %2107 = vmatpush1.bf16.msra.mxu0 %v3556_v16  ;;  %v2386_v16 = vld [vmem:[%s4880_s5 + $0x140] sm:$0xff] }
 0x1d4   :  { %2189 = vmatpush1.bf16.msra.mxu1 %v3558_v59  ;;  %2108 = vmatprep.subr.bf16.mxu0 %v3565_v37  ;;  %v3764_v59 = vpack.c.bf16 %v2403_v54, %v2402_v53  ;;  %v2387_v37 = vld [vmem:[%s4880_s5 + $0x148] sm:$0xff] }
 0x1d5   :  { %2190 = vmatprep.subr.bf16.mxu1 %v3567_v32  ;;  %v2372_v32 = vld [vmem:[%s4880_s5 + $0xd0] sm:$0xff] }
 0x1d7   :  { %2109 = vmatpush1.bf16.msra.mxu0 %v3564_v0  ;;  %v3766_v0 = vpack.c.bf16 %v2387_v37, %v2386_v16 }
 0x1d8   :  { %2191 = vmatpush1.bf16.msra.mxu1 %v3566_v1  ;;  %3717 = vmatprep.subr.bf16.mxu0 %v3716_v2  ;;  %v3736_v1 = vpack.c.bf16 %v2373_v60, %v2372_v32  ;;  %v2356_v2 = vld [vmem:[%s4880_s5 + $0x50] sm:$0xff] }
 0x1d9   :  { %3749 = vmatprep.subr.bf16.mxu1 %v3748_v6  ;;  %v2389_v6 = vld [vmem:[%s4880_s5 + $0x158] sm:$0xff]  ;;  %v3738_v9 = vpack.c.bf16 %v2357_v3, %v2356_v2 }
 0x1da   :  { %2111 = vmatmul.mubr.bf16.vlgmr.msra.gmra.mrb[8].mxu0 %v4166_v11 }
 0x1db   :  { %2193 = vmatmul.mubr.bf16.vlgmr.msra.gmra.mrb[8].mxu1 %v4166_v11  ;;  %3719 = vmatpush3.bf16.msra.mxu0 %v3718_v24  ;;  %v3756_v11 = vpack.c.bf16 %v2399_v28, %v2398_v27  ;;  %v3770_v24 = vpack.c.bf16 %v2389_v6, %v2388_v4  ;;  %v2409_v27 = vld [vmem:[%s4880_s5 + $0x1f8] sm:$0xff] }
 0x1dc   :  { %3751 = vmatpush3.bf16.msra.mxu1 %v3750_v10  ;;  %3721 = vmatprep.subr.bf16.mxu0 %v3720_v14  ;;  %v3740_v10 = vpack.c.bf16 %v2375_v8, %v2374_v7  ;;  %v2358_v14 = vld [vmem:[%s4880_s5 + $0x60] sm:$0xff]  ;;  %v3776_v36 = vpack.c.bf16 %v2409_v27, %v2408_v26 }
 0x1dd   :  { %3753 = vmatprep.subr.bf16.mxu1 %v3752_v21  ;;  %v2391_v21 = vld [vmem:[%s4880_s5 + $0x168] sm:$0xff]  ;;  %v3742_v28 = vpack.c.bf16 %v2359_v18, %v2358_v14 }
 0x1df   :  { %3723 = vmatpush3.bf16.msra.mxu0 %v3722_v17  ;;  %v3774_v17 = vpack.c.bf16 %v2391_v21, %v2390_v19 }
 0x1e0   :  { %3755 = vmatpush3.bf16.msra.mxu1 %v3754_v29  ;;  %3725 = vmatprep.subr.bf16.mxu0 %v3724_v30  ;;  %v3744_v29 = vpack.c.bf16 %v2377_v25, %v2376_v22  ;;  %v2360_v30 = vld [vmem:[%s4880_s5 + $0x70] sm:$0xff] }
 0x1e1   :  { %3757 = vmatprep.subr.bf16.mxu1 %v3756_v11  ;;  %v2393_v11 = vld [vmem:[%s4880_s5 + $0x178] sm:$0xff]  ;;  %v3746_v42 = vpack.c.bf16 %v2361_v34, %v2360_v30 }
 0x1e3   :  { %3727 = vmatpush3.bf16.msra.mxu0 %v3726_v43  ;;  %v3778_v43 = vpack.c.bf16 %v2393_v11, %v2392_v35 }
 0x1e4   :  { %3759 = vmatpush3.bf16.msra.mxu1 %v3758_v44  ;;  %3729 = vmatprep.subr.bf16.mxu0 %v3728_v45  ;;  %v3780_v44 = vpack.c.bf16 %v2427_v40, %v2426_v31  ;;  %v3812_v45 = vpack.c.bf16 %v2459_v33, %v2458_v41 }
 0x1e5   :  { %3761 = vmatprep.subr.bf16.mxu1 %v3760_v49 }
 0x1e7   :  { %3731 = vmatpush3.bf16.msra.mxu0 %v3730_v55 }
 0x1e8   :  { %3763 = vmatpush3.bf16.msra.mxu1 %v3762_v58  ;;  %3733 = vmatprep.subr.bf16.mxu0 %v3732_v12 }
 0x1e9   :  { %3765 = vmatprep.subr.bf16.mxu1 %v3764_v59 }
 0x1eb   :  { %3735 = vmatpush3.bf16.msra.mxu0 %v3734_v63 }
 0x1ec   :  { %3767 = vmatpush3.bf16.msra.mxu1 %v3766_v0  ;;  %3737 = vmatprep.subr.bf16.mxu0 %v3736_v1 }
 0x1ed   :  { %3769 = vmatprep.subr.bf16.mxu1 %v3768_v5 }
 0x1ef   :  { %3739 = vmatpush3.bf16.msra.mxu0 %v3738_v9 }
 0x1f0   :  { %3771 = vmatpush3.bf16.msra.mxu1 %v3770_v24  ;;  %3741 = vmatprep.subr.bf16.mxu0 %v3740_v10 }
 0x1f1   :  { %3773 = vmatprep.subr.bf16.mxu1 %v3772_v38 }
 0x1f3   :  { %3743 = vmatpush3.bf16.msra.mxu0 %v3742_v28 }
 0x1f4   :  { %3775 = vmatpush3.bf16.msra.mxu1 %v3774_v17  ;;  %3745 = vmatprep.subr.bf16.mxu0 %v3744_v29 }
 0x1f5   :  { %3777 = vmatprep.subr.bf16.mxu1 %v3776_v36 }
 0x1f7   :  { %3747 = vmatpush3.bf16.msra.mxu0 %v3746_v42 }
 0x1f8   :  { %3779 = vmatpush3.bf16.msra.mxu1 %v3778_v43  ;;  %3781 = vmatprep.subr.bf16.mxu0 %v3780_v44 }
 0x1f9   :  { %3813 = vmatprep.subr.bf16.mxu1 %v3812_v45 }
 0x22d   :  { %v4382_v46 = vpop.f32.mrb[4].mxu0  ;;  %v4384_v47 = vpop.f32.mrb[4].mxu1 }
 0x22e   :  { %v2201_v48 = vsel %vm183_vm1, %v4382_v46, 0.0  ;;  %v2265_v49 = vmul.f32 %v4382_v46, %v4382_v46  ;;  %v2215_v50 = vsel %vm183_vm1, %v4384_v47, 0.0  ;;  %v2267_v51 = vmul.f32 %v4384_v47, %v4384_v47  ;;  %v4394_v52 = vpop.f32.mrb[5].mxu0  ;;  %v4396_v53 = vpop.f32.mrb[5].mxu1 }
 0x22f   :  { %v2202_v54 = vrot.slane %v2201_v48, 4  ;;  %v2216_v55 = vrot.slane %v2215_v50, 4  ;;  %v2208_v58 = vsel %vm183_vm1, %v4394_v52, 0.0  ;;  %v2266_v12 = vmul.f32 %v4394_v52, %v4394_v52  ;;  %v1952_v13 = vpop.f32.mrb[6].mxu0  ;;  %v2034_v15 = vpop.f32.mrb[6].mxu1 }
 0x230   :  { %v2273_v16 = vsel %vm183_vm1, %v2265_v49, 0.0  ;;  %v2287_v59 = vsel %vm183_vm1, %v2267_v51, 0.0  ;;  %v2209_v37 = vrot.slane %v2208_v58, 4  ;;  %v2222_v32 = vsel %vm183_vm1, %v4396_v53, 0.0  ;;  %v1953_v60 = vpop.f32.mrb[7].mxu0  ;;  %v2035_v61 = vpop.f32.mrb[7].mxu1 }
 0x231   :  { %v2203_v62 = vadd.f32 %v2202_v54, %v2201_v48  ;;  %v2274_v63 = vrot.slane %v2273_v16, 4  ;;  %v2217_v0 = vadd.f32 %v2216_v55, %v2215_v50  ;;  %v2288_v1 = vrot.slane %v2287_v59, 4  ;;  %v2410_v55 = vld [vmem:[%s4880_s5 + $0x200] sm:$0xff]  ;;  %v2428_v15 = vld [vmem:[%s4880_s5 + $0x290] sm:$0xff]  ;;  %v2443_v61 = vld [vmem:[%s4880_s5 + $0x308] sm:$0xff] }
 0x232   :  { %v2210_v2 = vadd.f32 %v2209_v37, %v2208_v58  ;;  %v2280_v3 = vsel %vm183_vm1, %v2266_v12, 0.0  ;;  %v2223_v4 = vrot.slane %v2222_v32, 4  ;;  %v2268_v5 = vmul.f32 %v4396_v53, %v4396_v53  ;;  %v2411_v58 = vld [vmem:[%s4880_s5 + $0x208] sm:$0xff]  ;;  %v2442_v60 = vld [vmem:[%s4880_s5 + $0x300] sm:$0xff] }
 0x233   :  { %v2204_v6 = vrot.slane %v2203_v62, 2  ;;  %v2275_v7 = vadd.f32 %v2274_v63, %v2273_v16  ;;  %v2218_v8 = vrot.slane %v2217_v0, 2  ;;  %v2289_v20 = vadd.f32 %v2288_v1, %v2287_v59  ;;  %v2429_v16 = vld [vmem:[%s4880_s5 + $0x298] sm:$0xff]  ;;  %v2460_v1 = vld [vmem:[%s4880_s5 + $0x390] sm:$0xff] }
 0x234   :  { %v2211_v39 = vrot.slane %v2210_v2, 2  ;;  %v2281_v9 = vrot.slane %v2280_v3, 4  ;;  %v2224_v24 = vadd.f32 %v2223_v4, %v2222_v32  ;;  %v2294_v10 = vsel %vm183_vm1, %v2268_v5, 0.0 }
 0x235   :  { %v2205_v14 = vadd.f32 %v2204_v6, %v2203_v62  ;;  %v2276_v18 = vrot.slane %v2275_v7, 2  ;;  %v2290_v19 = vrot.slane %v2289_v20, 2  ;;  %v2295_v25 = vrot.slane %v2294_v10, 4 }
 0x236   :  { %v2212_v38 = vadd.f32 %v2211_v39, %v2210_v2  ;;  %v2282_v21 = vadd.f32 %v2281_v9, %v2280_v3  ;;  %v2225_v22 = vrot.slane %v2224_v24, 2  ;;  %v2219_v27 = vadd.f32 %v2218_v8, %v2217_v0  ;;  %v2461_v2 = vld [vmem:[%s4880_s5 + $0x398] sm:$0xff] }
 0x237   :  { %v2277_v26 = vadd.f32 %v2276_v18, %v2275_v7  ;;  %v2291_v28 = vadd.f32 %v2290_v19, %v2289_v20  ;;  %v2296_v34 = vadd.f32 %v2295_v25, %v2294_v10  ;;  %v2206_v35 = vrot.slane %v2205_v14, 1  ;;  %v2412_v7 = vld [vmem:[%s4880_s5 + $0x210] sm:$0xff]  ;;  %v2413_v8 = vld [vmem:[%s4880_s5 + $0x218] sm:$0xff]  ;;  %v2431_v10 = vld [vmem:[%s4880_s5 + $0x2a8] sm:$0xff] }
 0x238   :  { %v2213_v17 = vrot.slane %v2212_v38, 1  ;;  %v2283_v29 = vrot.slane %v2282_v21, 2  ;;  %v2226_v30 = vadd.f32 %v2225_v22, %v2224_v24  ;;  %v2220_v33 = vrot.slane %v2219_v27, 1  ;;  %v2430_v24 = vld [vmem:[%s4880_s5 + $0x2a0] sm:$0xff]  ;;  %v2444_v19 = vld [vmem:[%s4880_s5 + $0x310] sm:$0xff] }
 0x239   :  { %v2278_v36 = vrot.slane %v2277_v26, 1  ;;  %v2292_v11 = vrot.slane %v2291_v28, 1  ;;  %v2297_v41 = vrot.slane %v2296_v34, 2  ;;  %v2207_v48 = vadd.f32 %v2206_v35, %v2205_v14  ;;  %v2462_v25 = vld [vmem:[%s4880_s5 + $0x3a0] sm:$0xff] }
 0x23a   :  { %v2284_v31 = vadd.f32 %v2283_v29, %v2282_v21  ;;  %v2227_v40 = vrot.slane %v2226_v30, 1  ;;  %v2214_v44 = vadd.f32 %v2213_v17, %v2212_v38  ;;  %v2221_v13 = vadd.f32 %v2220_v33, %v2219_v27  ;;  %v2445_v38 = vld [vmem:[%s4880_s5 + $0x318] sm:$0xff]  ;;  %v2415_v17 = vld [vmem:[%s4880_s5 + $0x228] sm:$0xff] }
 0x23b   :  { %v2279_v42 = vadd.f32 %v2278_v36, %v2277_v26  ;;  %v2298_v43 = vadd.f32 %v2297_v41, %v2296_v34  ;;  %v2293_v49 = vadd.f32 %v2292_v11, %v2291_v28  ;;  %v2257_v62 = vmul.f32 0.5, %v2207_v48  ;;  %v2463_v26 = vld [vmem:[%s4880_s5 + $0x3a8] sm:$0xff]  ;;  %v2414_v28 = vld [vmem:[%s4880_s5 + $0x220] sm:$0xff]  ;;  %v2433_v34 = vld [vmem:[%s4880_s5 + $0x2b8] sm:$0xff] }
 0x23c   :  { %v2285_v45 = vrot.slane %v2284_v31, 1  ;;  %v2228_v51 = vadd.f32 %v2227_v40, %v2226_v30  ;;  %v2258_v59 = vmul.f32 0.5, %v2214_v44  ;;  %v3782_v0 = vpack.c.bf16 %v2411_v58, %v2410_v55  ;;  %v2432_v30 = vld [vmem:[%s4880_s5 + $0x2b0] sm:$0xff]  ;;  %v2446_v36 = vld [vmem:[%s4880_s5 + $0x320] sm:$0xff]  ;;  %v2447_v11 = vld [vmem:[%s4880_s5 + $0x328] sm:$0xff] }
 0x23d   :  { %v2299_v54 = vrot.slane %v2298_v43, 1  ;;  %v2329_v12 = vmul.f32 0.5, %v2279_v42  ;;  %v2331_v63 = vmul.f32 0.5, %v2293_v49  ;;  %v3784_v6 = vpack.c.bf16 %v2429_v16, %v2428_v15  ;;  %v2464_v40 = vld [vmem:[%s4880_s5 + $0x3b0] sm:$0xff]  ;;  %v2465_v41 = vld [vmem:[%s4880_s5 + $0x3b8] sm:$0xff]  ;;  %v2435_v48 = vld [vmem:[%s4880_s5 + $0x2c8] sm:$0xff] }
 0x23e   :  { %v2286_v50 = vadd.f32 %v2285_v45, %v2284_v31  ;;  %v2260_v4 = vmul.f32 0.5, %v2228_v51  ;;  %v2259_v39 = vmul.f32 0.5, %v2221_v13  ;;  %v3814_v9 = vpack.c.bf16 %v2443_v61, %v2442_v60  ;;  %v2416_v42 = vld [vmem:[%s4880_s5 + $0x230] sm:$0xff]  ;;  %v2434_v45 = vld [vmem:[%s4880_s5 + $0x2c0] sm:$0xff]  ;;  %v2449_v51 = vld [vmem:[%s4880_s5 + $0x338] sm:$0xff] }
 0x23f   :  { %v2300_v32 = vadd.f32 %v2299_v54, %v2298_v43  ;;  %v2338_v20 = vsel %vm2337_vm2, %v2257_v62, %v2329_v12  ;;  %v3816_v18 = vpack.c.bf16 %v2461_v2, %v2460_v1  ;;  %v3786_v22 = vpack.c.bf16 %v2413_v8, %v2412_v7  ;;  %v2417_v43 = vld [vmem:[%s4880_s5 + $0x238] sm:$0xff]  ;;  %v2466_v55 = vld [vmem:[%s4880_s5 + $0x3c0] sm:$0xff]  ;;  %v2467_v58 = vld [vmem:[%s4880_s5 + $0x3c8] sm:$0xff] }
 0x240   :  { %v2330_v37 = vmul.f32 0.5, %v2286_v50  ;;  %v2340_v21 = vsel %vm2337_vm2, %v2259_v39, %v2331_v63  ;;  %v3788_v27 = vpack.c.bf16 %v2431_v10, %v2430_v24  ;;  %v3818_v29 = vpack.c.bf16 %v2445_v38, %v2444_v19  ;;  %v2448_v50 = vld [vmem:[%s4880_s5 + $0x330] sm:$0xff]  ;;  %v2418_v13 = vld [vmem:[%s4880_s5 + $0x240] sm:$0xff]  ;;  %v2419_v15 = vld [vmem:[%s4880_s5 + $0x248] sm:$0xff] }
 0x241   :  { %v2332_v5 = vmul.f32 0.5, %v2300_v32  ;;  %v3820_v35 = vpack.c.bf16 %v2463_v26, %v2462_v25  ;;  %v3790_v31 = vpack.c.bf16 %v2415_v17, %v2414_v28  ;;  %v3792_v33 = vpack.c.bf16 %v2433_v34, %v2432_v30  ;;  %v2450_v60 = vld [vmem:[%s4880_s5 + $0x340] sm:$0xff]  ;;  %v2451_v61 = vld [vmem:[%s4880_s5 + $0x348] sm:$0xff]  ;;  %v2468_v63 = vld [vmem:[%s4880_s5 + $0x3d0] sm:$0xff] }
 0x242   :  { %v2339_v3 = vsel %vm2337_vm2, %v2258_v59, %v2330_v37  ;;  %v3822_v44 = vpack.c.bf16 %v2447_v11, %v2446_v36  ;;  %v3824_v49 = vpack.c.bf16 %v2465_v41, %v2464_v40  ;;  %v3794_v54 = vpack.c.bf16 %v2417_v43, %v2416_v42  ;;  %v2436_v59 = vld [vmem:[%s4880_s5 + $0x2d0] sm:$0xff]  ;;  %v2437_v37 = vld [vmem:[%s4880_s5 + $0x2d8] sm:$0xff]  ;;  %v2471_v24 = vld [vmem:[%s4880_s5 + $0x3e8] sm:$0xff] }
 0x243   :  { %2538 = vmatprep.mubr.f32.mxu0 %v2339_v3  ;;  %v2341_v14 = vsel %vm2337_vm2, %v2260_v4, %v2332_v5  ;;  %v3796_v12 = vpack.c.bf16 %v2435_v48, %v2434_v45  ;;  %v3826_v16 = vpack.c.bf16 %v2449_v51, %v2448_v50  ;;  %v3828_v32 = vpack.c.bf16 %v2467_v58, %v2466_v55  ;;  %v2420_v2 = vld [vmem:[%s4880_s5 + $0x250] sm:$0xff]  ;;  %v2421_v3 = vld [vmem:[%s4880_s5 + $0x258] sm:$0xff]  ;;  %v2438_v5 = vld [vmem:[%s4880_s5 + $0x2e0] sm:$0xff] }
 0x244   :  { %2539 = vmatmul.mubr.f32.vlgmr.msra.gmra.mrb[12].mxu0 %v2338_v20  ;;  %2608 = vmatprep.mubr.f32.mxu1 %v2341_v14  ;;  %v3798_v62 = vpack.c.bf16 %v2419_v15, %v2418_v13  ;;  %v3800_v1 = vpack.c.bf16 %v2437_v37, %v2436_v59  ;;  %v3830_v4 = vpack.c.bf16 %v2451_v61, %v2450_v60  ;;  %v2452_v8 = vld [vmem:[%s4880_s5 + $0x350] sm:$0xff]  ;;  %v2453_v20 = vld [vmem:[%s4880_s5 + $0x358] sm:$0xff]  ;;  %v2422_v14 = vld [vmem:[%s4880_s5 + $0x260] sm:$0xff] }
 0x245   :  { %3783 = vmatpush3.bf16.msra.mxu0 %v3782_v0  ;;  %2609 = vmatmul.mubr.f32.vlgmr.msra.gmra.mrb[12].mxu1 %v2340_v21  ;;  %v2469_v0 = vld [vmem:[%s4880_s5 + $0x3d8] sm:$0xff]  ;;  %v3802_v39 = vpack.c.bf16 %v2421_v3, %v2420_v2  ;;  %v3834_v19 = vpack.c.bf16 %v2453_v20, %v2452_v8  ;;  %v2440_v38 = vld [vmem:[%s4880_s5 + $0x2f0] sm:$0xff]  ;;  %v2454_v25 = vld [vmem:[%s4880_s5 + $0x360] sm:$0xff] }
 0x246   :  { %3785 = vmatprep.subr.bf16.mxu0 %v3784_v6  ;;  %3815 = vmatpush3.bf16.msra.mxu1 %v3814_v9  ;;  %v2439_v6 = vld [vmem:[%s4880_s5 + $0x2e8] sm:$0xff]  ;;  %v3832_v7 = vpack.c.bf16 %v2469_v0, %v2468_v63  ;;  %v2470_v9 = vld [vmem:[%s4880_s5 + $0x3e0] sm:$0xff]  ;;  %v2441_v21 = vld [vmem:[%s4880_s5 + $0x2f8] sm:$0xff] }
 0x247   :  { %3817 = vmatprep.subr.bf16.mxu1 %v3816_v18  ;;  %v3804_v10 = vpack.c.bf16 %v2439_v6, %v2438_v5  ;;  %v2423_v18 = vld [vmem:[%s4880_s5 + $0x268] sm:$0xff]  ;;  %v2472_v28 = vld [vmem:[%s4880_s5 + $0x3f0] sm:$0xff]  ;;  %v2473_v17 = vld [vmem:[%s4880_s5 + $0x3f8] sm:$0xff] }
 0x248   :  { %v2455_v26 = vld [vmem:[%s4880_s5 + $0x368] sm:$0xff]  ;;  %v2424_v30 = vld [vmem:[%s4880_s5 + $0x270] sm:$0xff]  ;;  %v2425_v34 = vld [vmem:[%s4880_s5 + $0x278] sm:$0xff]  ;;  %v3840_v36 = vpack.c.bf16 %v2473_v17, %v2472_v28 }
 0x249   :  { %3787 = vmatpush3.bf16.msra.mxu0 %v3786_v22  ;;  %v3836_v22 = vpack.c.bf16 %v2471_v24, %v2470_v9  ;;  %v2456_v11 = vld [vmem:[%s4880_s5 + $0x370] sm:$0xff]  ;;  %v3810_v40 = vpack.c.bf16 %v2425_v34, %v2424_v30 }
 0x24a   :  { %3789 = vmatprep.subr.bf16.mxu0 %v3788_v27  ;;  %3819 = vmatpush3.bf16.msra.mxu1 %v3818_v29  ;;  %v3806_v27 = vpack.c.bf16 %v2423_v18, %v2422_v14  ;;  %v3808_v29 = vpack.c.bf16 %v2441_v21, %v2440_v38 }
 0x24b   :  { %3821 = vmatprep.subr.bf16.mxu1 %v3820_v35  ;;  %v3838_v35 = vpack.c.bf16 %v2455_v26, %v2454_v25 }
 0x24d   :  { %3791 = vmatpush3.bf16.msra.mxu0 %v3790_v31  ;;  %v2457_v31 = vld [vmem:[%s4880_s5 + $0x378] sm:$0xff] }
 0x24e   :  { %3793 = vmatprep.subr.bf16.mxu0 %v3792_v33  ;;  %3823 = vmatpush3.bf16.msra.mxu1 %v3822_v44  ;;  %v3842_v41 = vpack.c.bf16 %v2457_v31, %v2456_v11 }
 0x24f   :  { %3825 = vmatprep.subr.bf16.mxu1 %v3824_v49 }
 0x251   :  { %3795 = vmatpush3.bf16.msra.mxu0 %v3794_v54 }
 0x252   :  { %3797 = vmatprep.subr.bf16.mxu0 %v3796_v12  ;;  %3827 = vmatpush3.bf16.msra.mxu1 %v3826_v16 }
 0x253   :  { %3829 = vmatprep.subr.bf16.mxu1 %v3828_v32 }
 0x255   :  { %3799 = vmatpush3.bf16.msra.mxu0 %v3798_v62 }
 0x256   :  { %3801 = vmatprep.subr.bf16.mxu0 %v3800_v1  ;;  %3831 = vmatpush3.bf16.msra.mxu1 %v3830_v4 }
 0x257   :  { %3833 = vmatprep.subr.bf16.mxu1 %v3832_v7 }
 0x259   :  { %3803 = vmatpush3.bf16.msra.mxu0 %v3802_v39 }
 0x25a   :  { %3805 = vmatprep.subr.bf16.mxu0 %v3804_v10  ;;  %3835 = vmatpush3.bf16.msra.mxu1 %v3834_v19 }
 0x25b   :  { %3837 = vmatprep.subr.bf16.mxu1 %v3836_v22 }
 0x25d   :  { %3807 = vmatpush3.bf16.msra.mxu0 %v3806_v27 }
 0x25e   :  { %3809 = vmatprep.subr.bf16.mxu0 %v3808_v29  ;;  %3839 = vmatpush3.bf16.msra.mxu1 %v3838_v35 }
 0x25f   :  { %3841 = vmatprep.subr.bf16.mxu1 %v3840_v36 }
 0x261   :  { %3811 = vmatpush3.bf16.msra.mxu0 %v3810_v40 }
 0x262   :  { %3843 = vmatpush3.bf16.msra.mxu1 %v3842_v41 }
 0x2ad   :  { %v4594_v33 = vpop.f32.mrb[8].mxu0 }
 0x2ae   :  { %v2229_v42 = vsel %vm183_vm1, %v4594_v33, 0.0  ;;  %v2269_v43 = vmul.f32 %v4594_v33, %v4594_v33  ;;  %v4600_v44 = vpop.f32.mrb[8].mxu1  ;;  %v4602_v45 = vpop.f32.mrb[9].mxu0 }
 0x2af   :  { %v2230_v48 = vrot.slane %v2229_v42, 4  ;;  %v2243_v49 = vsel %vm183_vm1, %v4600_v44, 0.0  ;;  %v2271_v50 = vmul.f32 %v4600_v44, %v4600_v44  ;;  %v2236_v51 = vsel %vm183_vm1, %v4602_v45, 0.0  ;;  %v4610_v54 = vpop.f32.mrb[9].mxu1  ;;  %v2116_v55 = vpop.f32.mrb[10].mxu0 }
 0x2b0   :  { %v2301_v58 = vsel %vm183_vm1, %v2269_v43, 0.0  ;;  %v2244_v12 = vrot.slane %v2243_v49, 4  ;;  %v2237_v13 = vrot.slane %v2236_v51, 4  ;;  %v2270_v15 = vmul.f32 %v4602_v45, %v4602_v45  ;;  %v2198_v16 = vpop.f32.mrb[10].mxu1  ;;  %v2117_v59 = vpop.f32.mrb[11].mxu0 }
 0x2b1   :  { %v2231_v37 = vadd.f32 %v2230_v48, %v2229_v42  ;;  %v2302_v32 = vrot.slane %v2301_v58, 4  ;;  %v2315_v60 = vsel %vm183_vm1, %v2271_v50, 0.0  ;;  %v2250_v61 = vsel %vm183_vm1, %v4610_v54, 0.0  ;;  %v2199_v62 = vpop.f32.mrb[11].mxu1 }
 0x2b2   :  { %v2245_v63 = vadd.f32 %v2244_v12, %v2243_v49  ;;  %v2316_v0 = vrot.slane %v2315_v60, 4  ;;  %v2238_v1 = vadd.f32 %v2237_v13, %v2236_v51  ;;  %v2308_v2 = vsel %vm183_vm1, %v2270_v15, 0.0 }
 0x2b3   :  { %v2232_v3 = vrot.slane %v2231_v37, 2  ;;  %v2303_v4 = vadd.f32 %v2302_v32, %v2301_v58  ;;  %v2309_v5 = vrot.slane %v2308_v2, 4  ;;  %v2251_v6 = vrot.slane %v2250_v61, 4 }
 0x2b4   :  { %v2246_v7 = vrot.slane %v2245_v63, 2  ;;  %v2317_v8 = vadd.f32 %v2316_v0, %v2315_v60  ;;  %v2239_v20 = vrot.slane %v2238_v1, 2  ;;  %v2272_v39 = vmul.f32 %v4610_v54, %v4610_v54 }
 0x2b5   :  { %v2233_v9 = vadd.f32 %v2232_v3, %v2231_v37  ;;  %v2304_v24 = vrot.slane %v2303_v4, 2  ;;  %v2310_v10 = vadd.f32 %v2309_v5, %v2308_v2  ;;  %v2252_v14 = vadd.f32 %v2251_v6, %v2250_v61 }
 0x2b6   :  { %v2318_v18 = vrot.slane %v2317_v8, 2  ;;  %v2240_v19 = vadd.f32 %v2239_v20, %v2238_v1  ;;  %v2322_v38 = vsel %vm183_vm1, %v2272_v39, 0.0  ;;  %v2247_v29 = vadd.f32 %v2246_v7, %v2245_v63 }
 0x2b7   :  { %v2305_v21 = vadd.f32 %v2304_v24, %v2303_v4  ;;  %v2311_v22 = vrot.slane %v2310_v10, 2  ;;  %v2253_v25 = vrot.slane %v2252_v14, 2  ;;  %v2234_v26 = vrot.slane %v2233_v9, 1  ;;  %v2799_v24 = vld [vmem:[%s4881_s6 + $0x48] sm:$0xff] }
 0x2b8   :  { %v2319_v27 = vadd.f32 %v2318_v18, %v2317_v8  ;;  %v2241_v28 = vrot.slane %v2240_v19, 1  ;;  %v2323_v17 = vrot.slane %v2322_v38, 4  ;;  %v2248_v49 = vrot.slane %v2247_v29, 1  ;;  %v2801_v18 = vld [vmem:[%s4881_s6 + $0x58] sm:$0xff] }
 0x2b9   :  { %v2312_v30 = vadd.f32 %v2311_v22, %v2310_v10  ;;  %v2254_v34 = vadd.f32 %v2253_v25, %v2252_v14  ;;  %v2306_v35 = vrot.slane %v2305_v21, 1  ;;  %v2235_v48 = vadd.f32 %v2234_v26, %v2233_v9  ;;  %v2791_v9 = vld [vmem:[%s4881_s6 + $0x8] sm:$0xff]  ;;  %v2793_v10 = vld [vmem:[%s4881_s6 + $0x18] sm:$0xff]  ;;  %v2792_v25 = vld [vmem:[%s4881_s6 + $0x10] sm:$0xff] }
 0x2ba   :  { %v2324_v36 = vadd.f32 %v2323_v17, %v2322_v38  ;;  %v2242_v11 = vadd.f32 %v2241_v28, %v2240_v19  ;;  %v2320_v41 = vrot.slane %v2319_v27, 1  ;;  %v2249_v32 = vadd.f32 %v2248_v49, %v2247_v29  ;;  %v2790_v19 = vld [vmem:[%s4881_s6] sm:$0xff]  ;;  %v2800_v26 = vld [vmem:[%s4881_s6 + $0x50] sm:$0xff]  ;;  %v2807_v28 = vld [vmem:[%s4881_s6 + $0x88] sm:$0xff] }
 0x2bb   :  { %v2313_v31 = vrot.slane %v2312_v30, 1  ;;  %v2307_v40 = vadd.f32 %v2306_v35, %v2305_v21  ;;  %v2255_v42 = vrot.slane %v2254_v34, 1  ;;  %v2261_v59 = vmul.f32 0.5, %v2235_v48  ;;  %v2798_v38 = vld [vmem:[%s4881_s6 + $0x40] sm:$0xff]  ;;  %v2815_v17 = vld [vmem:[%s4881_s6 + $0xc8] sm:$0xff]  ;;  %v2809_v29 = vld [vmem:[%s4881_s6 + $0x98] sm:$0xff] }
 0x2bc   :  { %v2325_v43 = vrot.slane %v2324_v36, 2  ;;  %v2262_v58 = vmul.f32 0.5, %v2242_v11  ;;  %v2321_v13 = vadd.f32 %v2320_v41, %v2319_v27  ;;  %v2263_v1 = vmul.f32 0.5, %v2249_v32  ;;  %v2806_v35 = vld [vmem:[%s4881_s6 + $0x80] sm:$0xff]  ;;  %v2816_v41 = vld [vmem:[%s4881_s6 + $0xd0] sm:$0xff]  ;;  %v2831_v48 = vld [vmem:[%s4881_s6 + $0x148] sm:$0xff] }
 0x2bd   :  { %v2314_v50 = vadd.f32 %v2313_v31, %v2312_v30  ;;  %v2333_v55 = vmul.f32 0.5, %v2307_v40  ;;  %v2256_v15 = vadd.f32 %v2255_v42, %v2254_v34  ;;  %v3844_v14 = vpack.c.bf16 %v2799_v24, %v2791_v9  ;;  %v2817_v34 = vld [vmem:[%s4881_s6 + $0xd8] sm:$0xff]  ;;  %v2808_v40 = vld [vmem:[%s4881_s6 + $0x90] sm:$0xff]  ;;  %v2847_v32 = vld [vmem:[%s4881_s6 + $0x1c8] sm:$0xff] }
 0x2be   :  { %v2326_v51 = vadd.f32 %v2325_v43, %v2324_v36  ;;  %v2335_v62 = vmul.f32 0.5, %v2321_v13  ;;  %v3860_v21 = vpack.c.bf16 %v2801_v18, %v2793_v10  ;;  %v3846_v22 = vpack.c.bf16 %v2798_v38, %v2790_v19  ;;  %v2814_v36 = vld [vmem:[%s4881_s6 + $0xc0] sm:$0xff]  ;;  %v2823_v43 = vld [vmem:[%s4881_s6 + $0x108] sm:$0xff]  ;;  %v2825_v49 = vld [vmem:[%s4881_s6 + $0x118] sm:$0xff] }
 0x2bf   :  { %v2334_v12 = vmul.f32 0.5, %v2314_v50  ;;  %v2342_v61 = vsel %vm2337_vm2, %v2261_v59, %v2333_v55  ;;  %v2264_v63 = vmul.f32 0.5, %v2256_v15  ;;  %3845 = vmatprep.subr.bf16.mxu0 %v3844_v14  ;;  %v3862_v27 = vpack.c.bf16 %v2800_v26, %v2792_v25  ;;  %v2822_v55 = vld [vmem:[%s4881_s6 + $0x100] sm:$0xff]  ;;  %v2824_v13 = vld [vmem:[%s4881_s6 + $0x110] sm:$0xff]  ;;  %v2805_v9 = vld [vmem:[%s4881_s6 + $0x78] sm:$0xff] }
 0x2c0   :  { %v2327_v16 = vrot.slane %v2326_v51, 1  ;;  %v2344_v3 = vsel %vm2337_vm2, %v2263_v1, %v2335_v62  ;;  %3861 = vmatprep.subr.bf16.mxu1 %v3860_v21  ;;  %v3848_v30 = vpack.c.bf16 %v2815_v17, %v2807_v28  ;;  %v3864_v11 = vpack.c.bf16 %v2817_v34, %v2809_v29  ;;  %v2832_v15 = vld [vmem:[%s4881_s6 + $0x150] sm:$0xff]  ;;  %v2849_v62 = vld [vmem:[%s4881_s6 + $0x1d8] sm:$0xff] }
 0x2c1   :  { %v2343_v37 = vsel %vm2337_vm2, %v2262_v58, %v2334_v12  ;;  %v3850_v31 = vpack.c.bf16 %v2814_v36, %v2806_v35  ;;  %v3866_v42 = vpack.c.bf16 %v2816_v41, %v2808_v40  ;;  %v3852_v50 = vpack.c.bf16 %v2831_v48, %v2823_v43  ;;  %v2830_v12 = vld [vmem:[%s4881_s6 + $0x140] sm:$0xff] }
 0x2c2   :  { %2678 = vmatprep.mubr.f32.mxu0 %v2343_v37  ;;  %v2328_v60 = vadd.f32 %v2327_v16, %v2326_v51  ;;  %v2833_v51 = vld [vmem:[%s4881_s6 + $0x158] sm:$0xff]  ;;  %v3854_v16 = vpack.c.bf16 %v2830_v12, %v2822_v55  ;;  %v3870_v59 = vpack.c.bf16 %v2832_v15, %v2824_v13  ;;  %v2839_v37 = vld [vmem:[%s4881_s6 + $0x188] sm:$0xff]  ;;  %v2780_v43 = vld [vmem:[%s4883_s8] sm:$0x1] }
 0x2c3   :  { %2679 = vmatmul.mubr.f32.vlgmr.msra.gmra.mrb[14].mxu0 %v2342_v61  ;;  %v3868_v58 = vpack.c.bf16 %v2833_v51, %v2825_v49  ;;  %v3856_v61 = vpack.c.bf16 %v2847_v32, %v2839_v37  ;;  %v2802_v49 = vld [vmem:[%s4881_s6 + $0x60] sm:$0xff]  ;;  %v2804_v51 = vld [vmem:[%s4881_s6 + $0x70] sm:$0xff]  ;;  %v2811_v55 = vld [vmem:[%s4881_s6 + $0xa8] sm:$0xff] }
 0x2c4   :  { %v2336_v0 = vmul.f32 0.5, %v2328_v60  ;;  %3847 = vmatpush1.bf16.msra.mxu0 %v3846_v22  ;;  %v2841_v60 = vld [vmem:[%s4881_s6 + $0x198] sm:$0xff]  ;;  %v2819_v12 = vld [vmem:[%s4881_s6 + $0xe8] sm:$0xff]  ;;  %v2810_v32 = vld [vmem:[%s4881_s6 + $0xa0] sm:$0xff] }
 0x2c5   :  { %3849 = vmatprep.subr.bf16.mxu0 %v3848_v30  ;;  %v3872_v1 = vpack.c.bf16 %v2849_v62, %v2841_v60  ;;  %v3981_v30 = vmov 1966171168   ;;  %v2813_v13 = vld [vmem:[%s4881_s6 + $0xb8] sm:$0xff]  ;;  %v2818_v60 = vld [vmem:[%s4881_s6 + $0xe0] sm:$0xff] }
 0x2c6   :  { %v2345_v2 = vsel %vm2337_vm2, %v2264_v63, %v2336_v0  ;;  %v2838_v63 = vld [vmem:[%s4881_s6 + $0x180] sm:$0xff]  ;;  %v2764_v34 = vunpack.c.l.s4 %v3981_v30  ;;  %v2821_v15 = vld [vmem:[%s4881_s6 + $0xf8] sm:$0xff]  ;;  %v2852_v30 = vld [vmem:[%s4881_s6 + $0x1f0] sm:$0xff] }
 0x2c7   :  { %2748 = vmatprep.mubr.f32.mxu1 %v2345_v2  ;;  %v2846_v0 = vld [vmem:[%s4881_s6 + $0x1c0] sm:$0xff]  ;;  %v3896_v62 = vpack.c.bf16 %v2821_v15, %v2813_v13 }
 0x2c8   :  { %2749 = vmatmul.mubr.f32.vlgmr.msra.gmra.mrb[14].mxu1 %v2344_v3  ;;  %3851 = vmatpush1.bf16.msra.mxu0 %v3850_v31  ;;  %v3858_v2 = vpack.c.bf16 %v2846_v0, %v2838_v63  ;;  %v2840_v3 = vld [vmem:[%s4881_s6 + $0x190] sm:$0xff]  ;;  %v2765_v35 = vunpack.c.0.s8 %v2764_v34 }
 0x2c9   :  { %3863 = vmatpush1.bf16.msra.mxu1 %v3862_v27  ;;  %3853 = vmatprep.subr.bf16.mxu0 %v3852_v50  ;;  %v2796_v50 = vld [vmem:[%s4881_s6 + $0x30] sm:$0xff] }
 0x2ca   :  { %3865 = vmatprep.subr.bf16.mxu1 %v3864_v11  ;;  %v4740_v36 = vsub.s32 %v2765_v35, %v4095_v23  ;;  %v2794_v23 = vld [vmem:[%s4881_s6 + $0x20] sm:$0xff]  ;;  %v3894_v37 = vpack.c.bf16 %v2804_v51, %v2796_v50  ;;  %v2812_v63 = vld [vmem:[%s4881_s6 + $0xb0] sm:$0xff] }
 0x2cb   :  { %v2820_v0 = vld [vmem:[%s4881_s6 + $0xf0] sm:$0xff] }
 0x2cc   :  { %3855 = vmatpush1.bf16.msra.mxu0 %v3854_v16 }
 0x2cd   :  { %3867 = vmatpush1.bf16.msra.mxu1 %v3866_v42  ;;  %3857 = vmatprep.subr.bf16.mxu0 %v3856_v61  ;;  %v3880_v61 = vpack.c.bf16 %v2819_v12, %v2811_v55 }
 0x2ce   :  { %3869 = vmatprep.subr.bf16.mxu1 %v3868_v58 }
 0x2d0   :  { %3859 = vmatpush1.bf16.msra.mxu0 %v3858_v2 }
 0x2d1   :  { %3871 = vmatpush1.bf16.msra.mxu1 %v3870_v59  ;;  %v3878_v59 = vpack.c.bf16 %v2802_v49, %v2794_v23 }
 0x2d2   :  { %3873 = vmatprep.subr.bf16.mxu1 %v3872_v1  ;;  %v2827_v1 = vld [vmem:[%s4881_s6 + $0x128] sm:$0xff] }
 0x317   :  { %v3608_v4 = vpop.f32.mrb[12].mxu0 }
 0x318   :  { %v3609_v5 = vpop.f32.mrb[13].mxu0  ;;  %v3643_v6 = vpop.f32.mrb[12].mxu1 }
 0x319   :  { %v3610_v7 = vadd.f32 %v3609_v5, %v3608_v4  ;;  %v3644_v8 = vpop.f32.mrb[13].mxu1  ;;  %v2848_v4 = vld [vmem:[%s4881_s6 + $0x1d0] sm:$0xff]  ;;  %v3980_v5 = vmov 0.0  }
 0x31a   :  { %v3645_v20 = vadd.f32 %v3644_v8, %v3643_v6  ;;  %2922 = vmatprep.mubr.f32.mxu0 %v3980_v5  ;;  %2993 = vmatprep.mubr.f32.mxu1 %v3980_v5  ;;  %v2795_v6 = vld [vmem:[%s4881_s6 + $0x28] sm:$0xff] }
 0x31b   :  { %v2803_v8 = vld [vmem:[%s4881_s6 + $0x68] sm:$0xff] }
 0x31c   :  { %v4626_v39 = vadd.f32 %v3645_v20, %v3610_v7  ;;  %v3874_v7 = vpack.c.bf16 %v2848_v4, %v2840_v3  ;;  %v2797_v20 = vld [vmem:[%s4881_s6 + $0x38] sm:$0xff]  ;;  %v3876_v24 = vpack.c.bf16 %v2803_v8, %v2795_v6  ;;  %v2835_v3 = vld [vmem:[%s4881_s6 + $0x168] sm:$0xff]  ;;  %v3898_v8 = vpack.c.bf16 %v2820_v0, %v2812_v63 }
 0x31d   :  { %v3892_v10 = vpack.c.bf16 %v2805_v9, %v2797_v20  ;;  %v2829_v4 = vld [vmem:[%s4881_s6 + $0x138] sm:$0xff]  ;;  %v2826_v20 = vld [vmem:[%s4881_s6 + $0x120] sm:$0xff] }
 0x31e   :  { %3875 = vmatpush1.bf16.msra.mxu1 %v3874_v7  ;;  %3877 = vmatprep.subr.bf16.mxu0 %v3876_v24  ;;  %v2837_v6 = vld [vmem:[%s4881_s6 + $0x178] sm:$0xff]  ;;  %v3882_v7 = vpack.c.bf16 %v2818_v60, %v2810_v32  ;;  %v2834_v9 = vld [vmem:[%s4881_s6 + $0x160] sm:$0xff]  ;;  %v3884_v24 = vpack.c.bf16 %v2835_v3, %v2827_v1 }
 0x31f   :  { %3893 = vmatprep.subr.bf16.mxu1 %v3892_v10  ;;  %v3900_v10 = vpack.c.bf16 %v2837_v6, %v2829_v4 }
 0x396   :  { %v3678_v14 = vpop.f32.mrb[14].mxu0 }
 0x397   :  { %v3679_v18 = vpop.f32.mrb[15].mxu0 }
 0x398   :  { %v3680_v19 = vadd.f32 %v3679_v18, %v3678_v14  ;;  %v2828_v14 = vld [vmem:[%s4881_s6 + $0x130] sm:$0xff] }
 0x399   :  { %v2836_v18 = vld [vmem:[%s4881_s6 + $0x170] sm:$0xff] }
 0x39a   :  { %v2681_v38 = vadd.f32 %v3680_v19, %v4626_v39  ;;  %v2759_v39 = vld [vmem:[%s4882_s7] sm:$0x1]  ;;  %v2843_v19 = vld [vmem:[%s4881_s6 + $0x1a8] sm:$0xff] }
 0x39b   :  { %v3713_v21 = vpop.f32.mrb[14].mxu1 }
 0x39c   :  { %v3714_v22 = vpop.f32.mrb[15].mxu1 }
 0x39d   :  { %v3715_v25 = vadd.f32 %v3714_v22, %v3713_v21  ;;  %v2845_v21 = vld [vmem:[%s4881_s6 + $0x1b8] sm:$0xff] }
 0x39e   :  { %v2853_v22 = vld [vmem:[%s4881_s6 + $0x1f8] sm:$0xff] }
 0x39f   :  { %v2751_v26 = vadd.f32 %v3715_v25, %v2681_v38  ;;  %v2851_v38 = vld [vmem:[%s4881_s6 + $0x1e8] sm:$0xff]  ;;  %v3886_v25 = vpack.c.bf16 %v2834_v9, %v2826_v20 }
 0x3a1   :  { %v2754_v27 = vmul.f32 %v2751_v26, %v2751_v26 }
 0x3a3   :  { %v2756_v28 = vrot.slane %v2754_v27, 7  ;;  %v2842_v27 = vld [vmem:[%s4881_s6 + $0x1a0] sm:$0xff] }
 0x3a5   :  { %v2758_v17 = vsub.f32 %v2751_v26, %v2756_v28  ;;  %v3888_v28 = vpack.c.bf16 %v2851_v38, %v2843_v19 }
 0x3a7   :  { %v2760_v29 = vadd.f32 1e-05, %v2758_v17  ;;  %v3904_v17 = vpack.c.bf16 %v2853_v22, %v2845_v21 }
 0x3a9   :  { %3950 = vrsqrt.f32 %v2760_v29  ;;  %v2850_v29 = vld [vmem:[%s4881_s6 + $0x1e0] sm:$0xff] }
 0x3aa   :  { %v3890_v34 = vpack.c.bf16 %v2850_v29, %v2842_v27 }
 0x3b3   :  { %v3951_v11 = vpop.eup %3950 }
 0x3b4   :  { %v2769_v31 = vrot.slane %v3951_v11, %v4740_v36 }
 0x3b6   :  { %v2770_v40 = vcombine.high %v2769_v31, %v2769_v31 }
 0x3b8   :  { %v2777_v41 = vrot.slane %v2770_v40, %v4740_v36 }
 0x3ba   :  { %v2779_v42 = vmul.f32 %v2777_v41, %v2759_v39 }
 0x3bc   :  { %v2781_v48 = vmul.f32 %v2779_v42, %v2751_v26  ;;  %v3902_v26 = vpack.c.bf16 %v2836_v18, %v2828_v14 }
 0x3be   :  { %v2782_v58 = vsub.f32 %v2780_v43, %v2781_v48 }
 0x3c0   :  { %v2787_v16 = vrot.slane %v2782_v58, %v4127_v56 }
 0x3c2   :  { %v2789_v2 = vsel %vm2337_vm2, %v2779_v42, %v2787_v16 }
 0x3c3   :  { %3568 = vmatmul.mubr.msk.f32.vlgmr.msra.gmra.mrb[16].mxu0 %vm2854_vm3, %v2789_v2  ;;  %3569 = vmatmul.mubr.msk.f32.vlgmr.msra.gmra.mrb[16].mxu1 %vm2854_vm3, %v2789_v2 }
 0x3c4   :  { %3879 = vmatpush1.bf16.msra.mxu0 %v3878_v59  ;;  %3895 = vmatpush1.bf16.msra.mxu1 %v3894_v37 }
 0x3c5   :  { %3881 = vmatprep.subr.bf16.mxu0 %v3880_v61  ;;  %3897 = vmatprep.subr.bf16.mxu1 %v3896_v62 }
 0x3c6   :  { %3064 = vmatprep.mubr.f32.mxu0 %v3980_v5  ;;  %3135 = vmatprep.mubr.f32.mxu1 %v3980_v5  ;;  %v2844_v5 = vld [vmem:[%s4881_s6 + $0x1b0] sm:$0xff] }
 0x3c7   :  { %v3906_v35 = vpack.c.bf16 %v2852_v30, %v2844_v5 }
 0x3c8   :  { %3883 = vmatpush1.bf16.msra.mxu0 %v3882_v7  ;;  %3899 = vmatpush1.bf16.msra.mxu1 %v3898_v8 }
 0x3c9   :  { %3885 = vmatprep.subr.bf16.mxu0 %v3884_v24  ;;  %3901 = vmatprep.subr.bf16.mxu1 %v3900_v10 }
 0x3cc   :  { %3887 = vmatpush1.bf16.msra.mxu0 %v3886_v25  ;;  %3903 = vmatpush1.bf16.msra.mxu1 %v3902_v26 }
 0x3cd   :  { %3889 = vmatprep.subr.bf16.mxu0 %v3888_v28  ;;  %3905 = vmatprep.subr.bf16.mxu1 %v3904_v17 }
 0x3d0   :  { %3891 = vmatpush1.bf16.msra.mxu0 %v3890_v34  ;;  %3907 = vmatpush1.bf16.msra.mxu1 %v3906_v35 }
 0x3d3   :  { %3570 = vmatmul.mubr.msk.f32.vlgmr.msra.gmra.mrb[18].mxu0 %vm2854_vm3, %v2789_v2  ;;  %3571 = vmatmul.mubr.msk.f32.vlgmr.msra.gmra.mrb[18].mxu1 %vm2854_vm3, %v2789_v2 }
 0x496   :  { %v2924_v11 = vpop.f32.mrb[16].mxu0  ;;  %v2995_v31 = vpop.f32.mrb[16].mxu1 }
 0x497   :  { %v3145_v40 = vrot.slane %v2924_v11, %v4127_v56  ;;  %v3153_v39 = vrot.slane %v2995_v31, %v4127_v56  ;;  %v2926_v41 = vpop.f32.mrb[17].mxu0  ;;  %v2997_v42 = vpop.f32.mrb[17].mxu1  ;;  %v3185_v49 = vrot.slane %v2924_v11, %v4130_v57  ;;  %v3193_v51 = vrot.slane %v2995_v31, %v4130_v57 }
 0x498   :  { %v3149_v43 = vrot.slane %v2926_v41, %v4127_v56  ;;  %v3157_v48 = vrot.slane %v2997_v42, %v4127_v56  ;;  %v3189_v58 = vrot.slane %v2926_v41, %v4130_v57  ;;  %v3197_v13 = vrot.slane %v2997_v42, %v4130_v57 }
 0x499   :  { %v3174_v23 = vmul.f32 %v3145_v40, %v4382_v46  ;;  %v3176_v50 = vmul.f32 %v3153_v39, %v4384_v47 }
 0x49a   :  { %v3175_v55 = vmul.f32 %v3149_v43, %v4394_v52  ;;  %v3177_v12 = vmul.f32 %v3157_v48, %v4396_v53 }
 0x49b   :  { %v3214_v15 = vadd.f32 %v3185_v49, %v3174_v23  ;;  %v3216_v16 = vadd.f32 %v3193_v51, %v3176_v50 }
 0x49c   :  { %v3215_v59 = vadd.f32 %v3189_v58, %v3175_v55  ;;  %v3217_v37 = vadd.f32 %v3197_v13, %v3177_v12 }
 0x49d   :  { %v3222_v32 = vmax.f32 %v3214_v15, 0.0  ;;  %v3224_v46 = vmax.f32 %v3216_v16, 0.0 }
 0x49e   :  { %v3223_v60 = vmax.f32 %v3215_v59, 0.0  ;;  %v3225_v61 = vmax.f32 %v3217_v37, 0.0 }
 0x4a0   :  { %v3572_v62 = vpack.c.bf16 %v3223_v60, %v3222_v32  ;;  %v3573_v47 = vpack.c.bf16 %v3225_v61, %v3224_v46 }
 0x4a2   :  { %v3256_v63 = vrot.slane %v3572_v62, %v4740_v36  ;;  %v3263_v52 = vrot.slane %v3573_v47, %v4740_v36 }
 0x4a4   :  { %v3278_v0 = vcombine.low %v3256_v63, %v3263_v52 }
 0x4a6   :  { %v3066_v1 = vpop.f32.mrb[18].mxu0  ;;  %v3137_v2 = vpop.f32.mrb[18].mxu1  ;;  %v3286_v30 = vrot.slane %v3278_v0, %v4740_v36 }
 0x4a7   :  { %v3161_v53 = vrot.slane %v3066_v1, %v4127_v56  ;;  %v3169_v3 = vrot.slane %v3137_v2, %v4127_v56  ;;  %v3068_v4 = vpop.f32.mrb[19].mxu0  ;;  %v3139_v6 = vpop.f32.mrb[19].mxu1  ;;  %v3201_v9 = vrot.slane %v3066_v1, %v4130_v57  ;;  %v3209_v10 = vrot.slane %v3137_v2, %v4130_v57 }
 0x4a8   :  { %v3165_v7 = vrot.slane %v3068_v4, %v4127_v56  ;;  %v3173_v8 = vrot.slane %v3139_v6, %v4127_v56  ;;  %v3205_v18 = vrot.slane %v3068_v4, %v4130_v57  ;;  %v3213_v38 = vrot.slane %v3139_v6, %v4130_v57 }
 0x4a9   :  { %v3178_v20 = vmul.f32 %v3161_v53, %v4594_v33  ;;  %v3180_v24 = vmul.f32 %v3169_v3, %v4600_v44 }
 0x4aa   :  { %v3179_v14 = vmul.f32 %v3165_v7, %v4602_v45  ;;  %v3181_v19 = vmul.f32 %v3173_v8, %v4610_v54 }
 0x4ab   :  { %v3218_v21 = vadd.f32 %v3201_v9, %v3178_v20  ;;  %v3220_v22 = vadd.f32 %v3209_v10, %v3180_v24 }
 0x4ac   :  { %v3219_v25 = vadd.f32 %v3205_v18, %v3179_v14  ;;  %v3221_v56 = vadd.f32 %v3213_v38, %v3181_v19 }
 0x4ad   :  { %v3226_v26 = vmax.f32 %v3218_v21, 0.0  ;;  %v3228_v33 = vmax.f32 %v3220_v22, 0.0 }
 0x4ae   :  { %v3227_v27 = vmax.f32 %v3219_v25, 0.0  ;;  %v3229_v28 = vmax.f32 %v3221_v56, 0.0 }
 0x4b0   :  { %v3574_v17 = vpack.c.bf16 %v3227_v27, %v3226_v26  ;;  %v3575_v44 = vpack.c.bf16 %v3229_v28, %v3228_v33 }
 0x4b2   :  { %v3270_v29 = vrot.slane %v3574_v17, %v4740_v36  ;;  %v3277_v45 = vrot.slane %v3575_v44, %v4740_v36 }
 0x4b4   :  { %v3279_v5 = vcombine.low %v3270_v29, %v3277_v45 }
 0x4b6   :  { %v3293_v54 = vrot.slane %v3279_v5, %v4740_v36 }
 0x4b8   :  { %v3294_v57 = vcombine.low %v3286_v30, %v3293_v54 }
 0x4ba   :  { %3296 = vst [vmem:[%s4884_s9] sm:$0xff] %v3294_v57 }
 0x4bb   :  { %3301 = vsyncpa [#allocation3], 1 }

// kernel: squeeze.16
= control target key start
LH: loop header
LB: loop body
LE: loop exit
PB: predicated region body
PF: predicated region fallthrough
CT: control target
= control target key end

     0   :  { %vm210_vm0 = vcmask 130048   ;;  %s589_s0 = inlined_call_operand.vmem [shape: bf16[1,16,98], index: 0, kind: input, shape index: {}]   ;;  %s590_s1 = inlined_call_operand.vmem [shape: bf16[16,2,7,7], index: 1, kind: output, shape index: {}]  }
   0x1   :  { %v417_v0 = vld [vmem:[%s589_s0 + $0x30] sm:$0xf]  ;;  %v501_v1 = vld [vmem:[%s589_s0 + $0x28] sm:$0xff]   ;;  %v502_v2 = vld [vmem:[%s589_s0 + $0x20] sm:$0xff]  }
   0x2   :  { %v17_v3 = vunpack.c.l.bf16 %v417_v0  ;;  %v444_v4 = vunpack.c.l.bf16 %v501_v1  ;;  %v445_v5 = vunpack.c.h.bf16 %v501_v1  ;;  %v448_v6 = vunpack.c.l.bf16 %v502_v2  ;;  %v503_v7 = vld [vmem:[%s589_s0 + $0x18] sm:$0xff]   ;;  %v504_v8 = vld [vmem:[%s589_s0 + $0x10] sm:$0xff]   ;;  %v505_v9 = vld [vmem:[%s589_s0 + $0x8] sm:$0xff]  }
   0x3   :  { %v449_v10 = vunpack.c.h.bf16 %v502_v2  ;;  %v452_v11 = vunpack.c.l.bf16 %v503_v7  ;;  %v453_v12 = vunpack.c.h.bf16 %v503_v7  ;;  %v456_v13 = vunpack.c.l.bf16 %v504_v8  ;;  %v463_v14 = vld [vmem:[%s589_s0] sm:$0xff]  }
   0x4   :  { %20 = vst [vmem:[#allocation1 + $0x60] sm:$0xff] %v17_v3  ;;  %v457_v15 = vunpack.c.h.bf16 %v504_v8  ;;  %v460_v16 = vunpack.c.l.bf16 %v505_v9  ;;  %v461_v17 = vunpack.c.h.bf16 %v505_v9  ;;  %v464_v18 = vunpack.c.l.bf16 %v463_v14  ;;  %267 = vst.msk [vmem:[#allocation0 + $0x49] sm:$0x3f] %vm210_vm0, %v448_v6  }
   0x5   :  { %269 = vst.msk [vmem:[#allocation0 + $0x4a] sm:$0xc0] %vm210_vm0, %v448_v6   ;;  %281 = vst.msk [vmem:[#allocation0 + $0x5b] sm:$0xf] %vm210_vm0, %v444_v4   ;;  %v465_v19 = vunpack.c.h.bf16 %v463_v14 }
   0x6   :  { %283 = vst.msk [vmem:[#allocation0 + $0x5c] sm:$0xf0] %vm210_vm0, %v444_v4   ;;  %288 = vst.msk [vmem:[#allocation0 + $0x64] sm:$0x7] %vm210_vm0, %v445_v5  }
   0x7   :  { %290 = vst.msk [vmem:[#allocation0 + $0x65] sm:$0xf8] %vm210_vm0, %v445_v5   ;;  %239 = vst.msk [vmem:[#allocation0 + $0x24] sm:$0x7] %vm210_vm0, %v456_v13  }
   0x8   :  { %241 = vst.msk [vmem:[#allocation0 + $0x25] sm:$0xf8] %vm210_vm0, %v456_v13   ;;  %253 = vst.msk [vmem:[#allocation0 + $0x36] ss:$2 sm:$0x3] %vm210_vm0, %v452_v11  }
   0x9   :  { %255 = vst.msk [vmem:[#allocation0 + $0x37] sm:$0xfc] %vm210_vm0, %v452_v11   ;;  %260 = vst.msk [vmem:[#allocation0 + $0x40] sm:$0x7f] %vm210_vm0, %v453_v12  }
   0xa   :  { %262 = vst.msk [vmem:[#allocation0 + $0x41] sm:$0x80] %vm210_vm0, %v453_v12   ;;  %274 = vst.msk [vmem:[#allocation0 + $0x52] sm:$0x1f] %vm210_vm0, %v449_v10  }
   0xb   :  { %276 = vst.msk [vmem:[#allocation0 + $0x53] sm:$0xe0] %vm210_vm0, %v449_v10   ;;  %211 = vst.msk [vmem:[#allocation0] sm:$0x7f] %vm210_vm0, %v464_v18   ;;  %v292_v20 = vld [vmem:[#allocation1 + $0x60] sm:$0x3]  }
   0xc   :  { %213 = vst.msk [vmem:[#allocation0 + $0x1] sm:$0x80] %vm210_vm0, %v464_v18   ;;  %225 = vst.msk [vmem:[#allocation0 + $0x12] sm:$0x1f] %vm210_vm0, %v460_v16  }
   0xd   :  { %227 = vst.msk [vmem:[#allocation0 + $0x13] sm:$0xe0] %vm210_vm0, %v460_v16   ;;  %232 = vst.msk [vmem:[#allocation0 + $0x1b] sm:$0xf] %vm210_vm0, %v461_v17   ;;  %v381_v39 = vld [vmem:[#allocation0 + $0x60] sm:$0xff] }
   0xe   :  { %234 = vst.msk [vmem:[#allocation0 + $0x1c] sm:$0xf0] %vm210_vm0, %v461_v17   ;;  %246 = vst.msk [vmem:[#allocation0 + $0x2d] sm:$0x3] %vm210_vm0, %v457_v15  }
   0xf   :  { %248 = vst.msk [vmem:[#allocation0 + $0x2e] sm:$0xfc] %vm210_vm0, %v457_v15   ;;  %218 = vst.msk [vmem:[#allocation0 + $0x9] sm:$0x3f] %vm210_vm0, %v465_v19  }
  0x10   :  { %220 = vst.msk [vmem:[#allocation0 + $0xa] sm:$0xc0] %vm210_vm0, %v465_v19   ;;  %295 = vst.msk [vmem:[#allocation0 + $0x6d] sm:$0x3] %vm210_vm0, %v292_v20   ;;  %v346_v21 = vld [vmem:[#allocation0 + $0x38] sm:$0xff]  ;;  %v353_v22 = vld [vmem:[#allocation0 + $0x40] sm:$0xff] }
  0x11   :  { %v360_v23 = vld [vmem:[#allocation0 + $0x48] sm:$0xff]  ;;  %v367_v35 = vld [vmem:[#allocation0 + $0x50] sm:$0xff] }
  0x12   :  { %v300_v24 = vld [vmem:[#allocation0] sm:$0xff]  ;;  %v489_v27 = vpack.c.bf16 %v360_v23, %v353_v22  ;;  %v374_v36 = vld [vmem:[#allocation0 + $0x58] sm:$0xff] }
  0x13   :  { %v494_v38 = vpack.c.bf16 %v374_v36, %v367_v35 }
  0x14   :  { %v318_v25 = vld [vmem:[#allocation0 + $0x18] sm:$0xff]  ;;  %509 = vst [vmem:[%s590_s1 + $0x20] sm:$0xff] %v489_v27  }
  0x15   :  { %v325_v26 = vld [vmem:[#allocation0 + $0x20] sm:$0xff]  ;;  %v332_v30 = vld [vmem:[#allocation0 + $0x28] sm:$0xff]  ;;  %510 = vst [vmem:[%s590_s1 + $0x28] sm:$0xff] %v494_v38  }
  0x16   :  { %v305_v28 = vld [vmem:[#allocation0 + $0x8] sm:$0xff]  ;;  %v479_v33 = vpack.c.bf16 %v332_v30, %v325_v26  ;;  %v339_v34 = vld [vmem:[#allocation0 + $0x30] sm:$0xff] }
  0x17   :  { %v311_v29 = vld [vmem:[#allocation0 + $0x10] sm:$0xff]  ;;  %v469_v31 = vpack.c.bf16 %v305_v28, %v300_v24  ;;  %v484_v37 = vpack.c.bf16 %v346_v21, %v339_v34  ;;  %v388_v40 = vld [vmem:[#allocation0 + $0x68] sm:$0xff] }
  0x18   :  { %v474_v32 = vpack.c.bf16 %v318_v25, %v311_v29  ;;  %507 = vst [vmem:[%s590_s1 + $0x10] sm:$0xff] %v479_v33   ;;  %v499_v41 = vpack.c.bf16 %v388_v40, %v381_v39 }
  0x19   :  { %470 = vst [vmem:[%s590_s1] sm:$0xff] %v469_v31   ;;  %508 = vst [vmem:[%s590_s1 + $0x18] sm:$0xff] %v484_v37  }
  0x1a   :  { %506 = vst [vmem:[%s590_s1 + $0x8] sm:$0xff] %v474_v32   ;;  %511 = vst [vmem:[%s590_s1 + $0x30] sm:$0xff] %v499_v41  }

// kernel: cnn_decoder_forward.6
= control target key start
LH: loop header
LB: loop body
LE: loop exit
PB: predicated region body
PF: predicated region fallthrough
CT: control target
= control target key end

     0   :  { %v932_v0 = vmov 0.0   ;;  %vm933_vm0 = vmmov 0   ;;  %vm131_vm1 = vcmask 801792   ;;  %vm601_vm2 = vcmask 797696   ;;  %s1216_s0 = inlined_call_operand.vmem [shape: bf16[4,128,98], index: 0, kind: input, shape index: {}]   ;;  %s1217_s1 = inlined_call_operand.vmem [shape: bf16[4,16,128], index: 1, kind: input, shape index: {}]   ;;  %s1218_s2 = inlined_call_operand.vmem [shape: f32[16,1], index: 2, kind: input, shape index: {}]   ;;  %s1219_s3 = inlined_call_operand.vmem [shape: f32[16,1], index: 3, kind: input, shape index: {}]   ;;  %s1220_s4 = inlined_call_operand.vmem [shape: bf16[4,16,98], index: 4, kind: output, shape index: {}]  }
   0x1   :  { %807 = vmatprep.subr.bf16.mxu0 %v932_v0  ;;  %827 = vmatprep.subr.bf16.mxu1 %v932_v0  ;;  %v892_v1 = vld [vmem:[%s1216_s0] sm:$0xff]   ;;  %v894_v3 = vld [vmem:[%s1216_s0 + $0x8] sm:$0xff]   ;;  %v896_v5 = vld [vmem:[%s1216_s0 + $0x10] sm:$0xff]  }
   0x2   :  { %v893_v2 = vld [vmem:[%s1216_s0 + $0x40] sm:$0xff]   ;;  %823 = vmatprep.mubr.msk.bf16.mxu0 %vm933_vm0, %v932_v0  ;;  %843 = vmatprep.mubr.msk.bf16.mxu1 %vm933_vm0, %v932_v0  ;;  %v895_v4 = vld [vmem:[%s1216_s0 + $0x48] sm:$0xff]   ;;  %v897_v6 = vld [vmem:[%s1216_s0 + $0x50] sm:$0xff]  }
   0x3   :  { %808 = vmatpush3.bf16.msra.mxu0 %v892_v1  ;;  %828 = vmatpush3.bf16.msra.mxu1 %v893_v2  ;;  %v898_v7 = vld [vmem:[%s1216_s0 + $0x18] sm:$0xff]   ;;  %v900_v9 = vld [vmem:[%s1216_s0 + $0x20] sm:$0xff]   ;;  %v902_v11 = vld [vmem:[%s1216_s0 + $0x28] sm:$0xff]  }
   0x4   :  { %809 = vmatprep.subr.bf16.mxu0 %v932_v0  ;;  %829 = vmatprep.subr.bf16.mxu1 %v932_v0  ;;  %v899_v8 = vld [vmem:[%s1216_s0 + $0x58] sm:$0xff]   ;;  %v901_v10 = vld [vmem:[%s1216_s0 + $0x60] sm:$0xff]   ;;  %v903_v12 = vld [vmem:[%s1216_s0 + $0x68] sm:$0xff]  }
   0x5   :  { %v904_v13 = vld [vmem:[%s1216_s0 + $0x30] sm:$0xff]   ;;  %v906_v15 = vld [vmem:[%s1216_s0 + $0x38] sm:$0xff]   ;;  %v908_v17 = vld [vmem:[%s1217_s1] sm:$0xff]  }
   0x6   :  { %v905_v14 = vld [vmem:[%s1216_s0 + $0x70] sm:$0xff]   ;;  %v907_v16 = vld [vmem:[%s1216_s0 + $0x78] sm:$0xff]   ;;  %v909_v18 = vld [vmem:[%s1217_s1 + $0x8] sm:$0xff]  }
   0x7   :  { %810 = vmatpush3.bf16.msra.mxu0 %v894_v3  ;;  %830 = vmatpush3.bf16.msra.mxu1 %v895_v4  ;;  %v910_v19 = vld [vmem:[%s1216_s0 + $0x80] sm:$0xff]   ;;  %v912_v21 = vld [vmem:[%s1216_s0 + $0x88] sm:$0xff]   ;;  %v914_v23 = vld [vmem:[%s1216_s0 + $0x90] sm:$0xff]  }
   0x8   :  { %811 = vmatprep.subr.bf16.mxu0 %v932_v0  ;;  %831 = vmatprep.subr.bf16.mxu1 %v932_v0  ;;  %v911_v20 = vld [vmem:[%s1216_s0 + $0xc0] sm:$0xff]   ;;  %v913_v22 = vld [vmem:[%s1216_s0 + $0xc8] sm:$0xff]   ;;  %v915_v24 = vld [vmem:[%s1216_s0 + $0xd0] sm:$0xff]  }
   0x9   :  { %v916_v25 = vld [vmem:[%s1216_s0 + $0x98] sm:$0xff]   ;;  %v918_v27 = vld [vmem:[%s1216_s0 + $0xa0] sm:$0xff]   ;;  %v920_v29 = vld [vmem:[%s1216_s0 + $0xa8] sm:$0xff]  }
   0xa   :  { %v917_v26 = vld [vmem:[%s1216_s0 + $0xd8] sm:$0xff]   ;;  %v919_v28 = vld [vmem:[%s1216_s0 + $0xe0] sm:$0xff]   ;;  %v921_v30 = vld [vmem:[%s1216_s0 + $0xe8] sm:$0xff]  }
   0xb   :  { %812 = vmatpush3.bf16.msra.mxu0 %v896_v5  ;;  %832 = vmatpush3.bf16.msra.mxu1 %v897_v6  ;;  %v922_v31 = vld [vmem:[%s1216_s0 + $0xb0] sm:$0xff]   ;;  %v924_v33 = vld [vmem:[%s1216_s0 + $0xb8] sm:$0xff]  }
   0xc   :  { %813 = vmatprep.subr.bf16.mxu0 %v932_v0  ;;  %833 = vmatprep.subr.bf16.mxu1 %v932_v0  ;;  %v923_v32 = vld [vmem:[%s1216_s0 + $0xf0] sm:$0xff]   ;;  %v925_v34 = vld [vmem:[%s1216_s0 + $0xf8] sm:$0xff]  }
   0xd   :  { %v926_v35 = vld [vmem:[%s1217_s1 + $0x10] sm:$0xff]   ;;  %v927_v36 = vld [vmem:[%s1217_s1 + $0x18] sm:$0xff]  }
   0xf   :  { %814 = vmatpush3.bf16.msra.mxu0 %v898_v7  ;;  %834 = vmatpush3.bf16.msra.mxu1 %v899_v8 }
  0x10   :  { %815 = vmatprep.subr.bf16.mxu0 %v932_v0  ;;  %835 = vmatprep.subr.bf16.mxu1 %v932_v0 }
  0x13   :  { %816 = vmatpush3.bf16.msra.mxu0 %v900_v9  ;;  %836 = vmatpush3.bf16.msra.mxu1 %v901_v10 }
  0x14   :  { %817 = vmatprep.subr.bf16.mxu0 %v932_v0  ;;  %837 = vmatprep.subr.bf16.mxu1 %v932_v0 }
  0x17   :  { %818 = vmatpush3.bf16.msra.mxu0 %v902_v11  ;;  %838 = vmatpush3.bf16.msra.mxu1 %v903_v12 }
  0x18   :  { %819 = vmatprep.subr.bf16.mxu0 %v932_v0  ;;  %839 = vmatprep.subr.bf16.mxu1 %v932_v0 }
  0x1b   :  { %820 = vmatpush3.bf16.msra.mxu0 %v904_v13  ;;  %840 = vmatpush3.bf16.msra.mxu1 %v905_v14  ;;  %v934_v13 = vmov 0  }
  0x1c   :  { %821 = vmatprep.subr.bf16.mxu0 %v932_v0  ;;  %841 = vmatprep.subr.bf16.mxu1 %v932_v0 }
  0x1d   :  { %890 = vset.pattern.permute.xlu0 %v934_v13  ;;  %891 = vset.pattern.permute.xlu1 %v934_v13 }
  0x1f   :  { %822 = vmatpush3.bf16.msra.mxu0 %v906_v15  ;;  %842 = vmatpush3.bf16.msra.mxu1 %v907_v16 }
  0x20   :  { %847 = vmatprep.subr.bf16.mxu0 %v932_v0  ;;  %867 = vmatprep.subr.bf16.mxu1 %v932_v0 }
  0x22   :  { %824 = vmatmul.mubr.bf16.vlgmr.msra.gmra.mrb[0].mxu0 %v908_v17  ;;  %844 = vmatmul.mubr.bf16.vlgmr.msra.gmra.mrb[0].mxu1 %v909_v18 }
  0x23   :  { %848 = vmatpush3.bf16.msra.mxu0 %v910_v19  ;;  %868 = vmatpush3.bf16.msra.mxu1 %v911_v20 }
  0x24   :  { %849 = vmatprep.subr.bf16.mxu0 %v932_v0  ;;  %869 = vmatprep.subr.bf16.mxu1 %v932_v0 }
  0x25   :  { %863 = vmatprep.mubr.msk.bf16.mxu0 %vm933_vm0, %v932_v0  ;;  %883 = vmatprep.mubr.msk.bf16.mxu1 %vm933_vm0, %v932_v0 }
  0x27   :  { %850 = vmatpush3.bf16.msra.mxu0 %v912_v21  ;;  %870 = vmatpush3.bf16.msra.mxu1 %v913_v22 }
  0x28   :  { %851 = vmatprep.subr.bf16.mxu0 %v932_v0  ;;  %871 = vmatprep.subr.bf16.mxu1 %v932_v0 }
  0x2b   :  { %852 = vmatpush3.bf16.msra.mxu0 %v914_v23  ;;  %872 = vmatpush3.bf16.msra.mxu1 %v915_v24 }
  0x2c   :  { %853 = vmatprep.subr.bf16.mxu0 %v932_v0  ;;  %873 = vmatprep.subr.bf16.mxu1 %v932_v0 }
  0x2f   :  { %854 = vmatpush3.bf16.msra.mxu0 %v916_v25  ;;  %874 = vmatpush3.bf16.msra.mxu1 %v917_v26 }
  0x30   :  { %855 = vmatprep.subr.bf16.mxu0 %v932_v0  ;;  %875 = vmatprep.subr.bf16.mxu1 %v932_v0 }
  0x33   :  { %856 = vmatpush3.bf16.msra.mxu0 %v918_v27  ;;  %876 = vmatpush3.bf16.msra.mxu1 %v919_v28 }
  0x34   :  { %857 = vmatprep.subr.bf16.mxu0 %v932_v0  ;;  %877 = vmatprep.subr.bf16.mxu1 %v932_v0 }
  0x37   :  { %858 = vmatpush3.bf16.msra.mxu0 %v920_v29  ;;  %878 = vmatpush3.bf16.msra.mxu1 %v921_v30 }
  0x38   :  { %859 = vmatprep.subr.bf16.mxu0 %v932_v0  ;;  %879 = vmatprep.subr.bf16.mxu1 %v932_v0 }
  0x3b   :  { %860 = vmatpush3.bf16.msra.mxu0 %v922_v31  ;;  %880 = vmatpush3.bf16.msra.mxu1 %v923_v32 }
  0x3c   :  { %861 = vmatprep.subr.bf16.mxu0 %v932_v0  ;;  %881 = vmatprep.subr.bf16.mxu1 %v932_v0 }
  0x3f   :  { %862 = vmatpush3.bf16.msra.mxu0 %v924_v33  ;;  %882 = vmatpush3.bf16.msra.mxu1 %v925_v34 }
  0x42   :  { %864 = vmatmul.mubr.bf16.vlgmr.msra.gmra.mrb[4].mxu0 %v926_v35  ;;  %884 = vmatmul.mubr.bf16.vlgmr.msra.gmra.mrb[4].mxu1 %v927_v36 }
  0xf5   :  { %v1108_v37 = vpop.f32.mrb[0].mxu0  ;;  %v1110_v38 = vpop.f32.mrb[0].mxu1 }
  0xf6   :  { %v825_v39 = vpop.f32.mrb[1].mxu0  ;;  %v132_v40 = vsel %vm131_vm1, %v1108_v37, 0.0  ;;  %v261_v41 = vsel %vm131_vm1, %v1110_v38, 0.0  ;;  %v845_v43 = vpop.f32.mrb[1].mxu1  ;;  %v138_v49 = vmul.f32 %v1108_v37, %v1108_v37  ;;  %v267_v52 = vmul.f32 %v1110_v38, %v1110_v38 }
  0xf7   :  { %133 = vadd.xlane.f32.xlu0 %v132_v40  ;;  %v1116_v42 = vpop.f32.mrb[2].mxu0  ;;  %262 = vadd.xlane.f32.xlu1 %v261_v41  ;;  %v1118_v45 = vpop.f32.mrb[2].mxu1 }
  0xf8   :  { %v826_v44 = vpop.f32.mrb[3].mxu0  ;;  %v846_v46 = vpop.f32.mrb[3].mxu1  ;;  %v264_v47 = vsel %vm131_vm1, %v1118_v45, 0.0  ;;  %v135_v48 = vsel %vm131_vm1, %v1116_v42, 0.0  ;;  %v139_v50 = vmul.f32 %v1116_v42, %v1116_v42  ;;  %v140_v51 = vsel %vm131_vm1, %v138_v49, 0.0 }
  0xf9   :  { %v268_v54 = vmul.f32 %v1118_v45, %v1118_v45  ;;  %v269_v55 = vsel %vm131_vm1, %v267_v52, 0.0 }
  0xfa   :  { %v143_v53 = vsel %vm131_vm1, %v139_v50, 0.0 }
  0xfb   :  { %136 = vadd.xlane.f32.xlu0 %v135_v48  ;;  %265 = vadd.xlane.f32.xlu1 %v264_v47  ;;  %v272_v56 = vsel %vm131_vm1, %v268_v54, 0.0 }
  0xff   :  { %141 = vadd.xlane.f32.xlu0 %v140_v51  ;;  %144 = vadd.xlane.f32.xlu1 %v143_v53 }
 0x103   :  { %270 = vadd.xlane.f32.xlu0 %v269_v55  ;;  %273 = vadd.xlane.f32.xlu1 %v272_v56  ;;  %v553_v56 = vld [vmem:[%s1218_s2] sm:$0xff] }
 0x115   :  { %v1136_v57 = vpop.f32.mrb[4].mxu0  ;;  %v1138_v59 = vpop.f32.mrb[4].mxu1 }
 0x116   :  { %v865_v58 = vpop.f32.mrb[5].mxu0  ;;  %v394_v60 = vsel %vm131_vm1, %v1136_v57, 0.0  ;;  %v885_v61 = vpop.f32.mrb[5].mxu1  ;;  %v527_v2 = vsel %vm131_vm1, %v1138_v59, 0.0  ;;  %v400_v4 = vmul.f32 %v1136_v57, %v1136_v57  ;;  %v533_v8 = vmul.f32 %v1138_v59, %v1138_v59 }
 0x117   :  { %395 = vadd.xlane.f32.xlu0 %v394_v60  ;;  %v1142_v62 = vpop.f32.mrb[6].mxu0  ;;  %v1144_v0 = vpop.f32.mrb[6].mxu1  ;;  %v554_v60 = vld [vmem:[%s1218_s2 + $0x8] sm:$0xff] }
 0x118   :  { %v866_v63 = vpop.f32.mrb[7].mxu0  ;;  %v397_v1 = vsel %vm131_vm1, %v1142_v62, 0.0  ;;  %v886_v3 = vpop.f32.mrb[7].mxu1  ;;  %v530_v5 = vsel %vm131_vm1, %v1144_v0, 0.0  ;;  %v401_v6 = vmul.f32 %v1142_v62, %v1142_v62  ;;  %v402_v7 = vsel %vm131_vm1, %v400_v4, 0.0 }
 0x119   :  { %398 = vadd.xlane.f32.xlu1 %v397_v1  ;;  %v534_v10 = vmul.f32 %v1144_v0, %v1144_v0  ;;  %v535_v11 = vsel %vm131_vm1, %v533_v8, 0.0  ;;  %v561_v3 = vld [vmem:[%s1219_s3] sm:$0xff] }
 0x11a   :  { %v405_v9 = vsel %vm131_vm1, %v401_v6, 0.0  ;;  %v562_v6 = vld [vmem:[%s1219_s3 + $0x8] sm:$0xff] }
 0x11b   :  { %528 = vadd.xlane.f32.xlu0 %v527_v2  ;;  %v538_v12 = vsel %vm131_vm1, %v534_v10, 0.0 }
 0x11d   :  { %531 = vadd.xlane.f32.xlu1 %v530_v5 }
 0x11f   :  { %403 = vadd.xlane.f32.xlu0 %v402_v7 }
 0x121   :  { %406 = vadd.xlane.f32.xlu1 %v405_v9 }
 0x123   :  { %536 = vadd.xlane.f32.xlu0 %v535_v11 }
 0x125   :  { %539 = vadd.xlane.f32.xlu1 %v538_v12 }
 0x184   :  { %v134_v14 = vpop.xlane.xlu0 %133  ;;  %v263_v15 = vpop.xlane.xlu1 %262 }
 0x185   :  { %v275_v24 = vadd.f32 %v263_v15, %v134_v14 }
 0x188   :  { %v137_v16 = vpop.xlane.xlu0 %136  ;;  %v266_v17 = vpop.xlane.xlu1 %265 }
 0x189   :  { %v276_v26 = vadd.f32 %v266_v17, %v137_v16 }
 0x18c   :  { %v142_v18 = vpop.xlane.xlu0 %141  ;;  %v145_v19 = vpop.xlane.xlu1 %144 }
 0x190   :  { %v271_v20 = vpop.xlane.xlu0 %270  ;;  %v274_v21 = vpop.xlane.xlu1 %273 }
 0x191   :  { %v277_v32 = vadd.f32 %v271_v20, %v142_v18  ;;  %v278_v35 = vadd.f32 %v274_v21, %v145_v19 }
 0x1a4   :  { %v396_v22 = vpop.xlane.xlu0 %395 }
 0x1a5   :  { %v408_v27 = vadd.f32 %v396_v22, %v275_v24 }
 0x1a6   :  { %v399_v23 = vpop.xlane.xlu1 %398 }
 0x1a7   :  { %v409_v29 = vadd.f32 %v399_v23, %v276_v26 }
 0x1a8   :  { %v529_v25 = vpop.xlane.xlu0 %528 }
 0x1a9   :  { %v541_v30 = vadd.f32 %v529_v25, %v408_v27 }
 0x1aa   :  { %v532_v28 = vpop.xlane.xlu1 %531 }
 0x1ab   :  { %v542_v33 = vadd.f32 %v532_v28, %v409_v29  ;;  %v545_v36 = vmul.f32 0.0025510204, %v541_v30 }
 0x1ac   :  { %v404_v31 = vpop.xlane.xlu0 %403 }
 0x1ad   :  { %v410_v39 = vadd.f32 %v404_v31, %v277_v32  ;;  %v546_v41 = vmul.f32 0.0025510204, %v542_v33  ;;  %v549_v47 = vmul.f32 %v545_v36, %v545_v36 }
 0x1ae   :  { %v407_v34 = vpop.xlane.xlu1 %406 }
 0x1af   :  { %v411_v43 = vadd.f32 %v407_v34, %v278_v35  ;;  %v550_v50 = vmul.f32 %v546_v41, %v546_v41 }
 0x1b0   :  { %v537_v40 = vpop.xlane.xlu0 %536 }
 0x1b1   :  { %v543_v44 = vadd.f32 %v537_v40, %v410_v39 }
 0x1b2   :  { %v540_v46 = vpop.xlane.xlu1 %539 }
 0x1b3   :  { %v547_v48 = vmul.f32 0.0025510204, %v543_v44  ;;  %v544_v49 = vadd.f32 %v540_v46, %v411_v43 }
 0x1b5   :  { %v551_v51 = vsub.f32 %v547_v48, %v549_v47  ;;  %v548_v52 = vmul.f32 0.0025510204, %v544_v49 }
 0x1b7   :  { %v555_v53 = vadd.f32 1e-05, %v551_v51  ;;  %v552_v54 = vsub.f32 %v548_v52, %v550_v50 }
 0x1b9   :  { %928 = vrsqrt.f32 %v555_v53  ;;  %v556_v55 = vadd.f32 1e-05, %v552_v54 }
 0x1bb   :  { %930 = vrsqrt.f32 %v556_v55 }
 0x1c3   :  { %v929_v58 = vpop.eup %928 }
 0x1c4   :  { %v559_v61 = vmul.f32 %v929_v58, %v553_v56 }
 0x1c5   :  { %v931_v63 = vpop.eup %930 }
 0x1c6   :  { %569 = vperm.xlu0 %890, %v559_v61   ;;  %v560_v1 = vmul.f32 %v931_v63, %v554_v60  ;;  %v563_v2 = vmul.f32 %v559_v61, %v545_v36 }
 0x1c8   :  { %574 = vperm.xlu1 %891, %v560_v1   ;;  %v565_v4 = vsub.f32 %v561_v3, %v563_v2  ;;  %v564_v5 = vmul.f32 %v560_v1, %v546_v41 }
 0x1ca   :  { %v566_v7 = vsub.f32 %v562_v6, %v564_v5 }
 0x1cc   :  { %581 = vperm.xlu1 %891, %v565_v4  }
 0x1d0   :  { %586 = vperm.xlu1 %891, %v566_v7  }
 0x245   :  { %v570_v8 = vpop.permute.xlu0 %569 }
 0x246   :  { %v577_v10 = vmul.f32 %v570_v8, %v1108_v37  ;;  %v604_v11 = vmul.f32 %v570_v8, %v1110_v38  ;;  %v621_v12 = vmul.f32 %v570_v8, %v1136_v57  ;;  %v638_v13 = vmul.f32 %v570_v8, %v1138_v59 }
 0x247   :  { %v575_v9 = vpop.permute.xlu1 %574 }
 0x248   :  { %v578_v23 = vmul.f32 %v575_v9, %v1116_v42  ;;  %v605_v37 = vmul.f32 %v575_v9, %v1118_v45  ;;  %v622_v38 = vmul.f32 %v575_v9, %v1142_v62  ;;  %v639_v57 = vmul.f32 %v575_v9, %v1144_v0 }
 0x24b   :  { %v582_v14 = vpop.permute.xlu1 %581 }
 0x24c   :  { %v589_v15 = vadd.f32 %v582_v14, %v577_v10  ;;  %v606_v16 = vadd.f32 %v604_v11, %v582_v14  ;;  %v623_v17 = vadd.f32 %v621_v12, %v582_v14  ;;  %v640_v18 = vadd.f32 %v638_v13, %v582_v14 }
 0x24e   :  { %v591_v19 = vmax.f32 %v589_v15, 0.0  ;;  %v608_v20 = vmax.f32 %v606_v16, 0.0  ;;  %v625_v21 = vmax.f32 %v623_v17, 0.0  ;;  %v642_v22 = vmax.f32 %v640_v18, 0.0 }
 0x24f   :  { %v587_v24 = vpop.permute.xlu1 %586 }
 0x250   :  { %v763_v59 = vpack.c.bf16 %v591_v19, %v591_v19  ;;  %v765_v25 = vpack.c.bf16 %v608_v20, %v608_v20  ;;  %v767_v26 = vpack.c.bf16 %v625_v21, %v625_v21  ;;  %v769_v27 = vpack.c.bf16 %v642_v22, %v642_v22 }
 0x251   :  { %v590_v28 = vadd.f32 %v587_v24, %v578_v23  ;;  %v607_v29 = vadd.f32 %v605_v37, %v587_v24  ;;  %v624_v30 = vadd.f32 %v622_v38, %v587_v24  ;;  %v641_v31 = vadd.f32 %v639_v57, %v587_v24 }
 0x252   :  { %602 = vst.msk [vmem:[%s1220_s4] sm:$0xf] %vm601_vm2, %v763_v59  ;;  %753 = vst.msk [vmem:[%s1220_s4 + $0x8] sm:$0xf] %vm601_vm2, %v765_v25 }
 0x253   :  { %757 = vst.msk [vmem:[%s1220_s4 + $0x10] sm:$0xf] %vm601_vm2, %v767_v26  ;;  %761 = vst.msk [vmem:[%s1220_s4 + $0x18] sm:$0xf] %vm601_vm2, %v769_v27  ;;  %v592_v42 = vmax.f32 %v590_v28, 0.0  ;;  %v609_v45 = vmax.f32 %v607_v29, 0.0 }
 0x254   :  { %v626_v62 = vmax.f32 %v624_v30, 0.0  ;;  %v643_v0 = vmax.f32 %v641_v31, 0.0 }
 0x255   :  { %v764_v32 = vpack.c.bf16 %v592_v42, %v592_v42  ;;  %v766_v33 = vpack.c.bf16 %v609_v45, %v609_v45 }
 0x256   :  { %v768_v34 = vpack.c.bf16 %v626_v62, %v626_v62  ;;  %v770_v35 = vpack.c.bf16 %v643_v0, %v643_v0 }
 0x257   :  { %603 = vst.msk [vmem:[%s1220_s4 + $0x4] sm:$0xf] %vm601_vm2, %v764_v32  ;;  %754 = vst.msk [vmem:[%s1220_s4 + $0xc] sm:$0xf] %vm601_vm2, %v766_v33 }
 0x258   :  { %758 = vst.msk [vmem:[%s1220_s4 + $0x14] sm:$0xf] %vm601_vm2, %v768_v34  ;;  %762 = vst.msk [vmem:[%s1220_s4 + $0x1c] sm:$0xf] %vm601_vm2, %v770_v35 }

// kernel: cnn_decoder_forward.7
= control target key start
LH: loop header
LB: loop body
LE: loop exit
PB: predicated region body
PF: predicated region fallthrough
CT: control target
= control target key end

     0   :  { %v1262_v1 = vmov 0   ;;  %vm109_vm0 = vcmask 523264   ;;  %s1537_s0 = inlined_call_operand.vmem [shape: bf16[4,64,392], index: 0, kind: input, shape index: {}]   ;;  %s1538_s1 = inlined_call_operand.vmem [shape: bf16[4,1,64], index: 1, kind: input, shape index: {}]   ;;  %s1539_s2 = inlined_call_operand.vmem [shape: f32[4,1,392], index: 2, kind: output, shape index: {}]  }
   0x1   :  { %v1102_v0 = vld [vmem:[%s1537_s0 + $0x4] ss:$16 sps:$4 sm:$0xff]   ;;  %145 = vmatprep.mubr.bf16.mxu0 %v1262_v1  ;;  %186 = vmatprep.mubr.bf16.mxu1 %v1262_v1  ;;  %v1104_v2 = vld [vmem:[%s1537_s0 + $0xc] ss:$16 sps:$4 sm:$0xff]   ;;  %v1106_v3 = vld [vmem:[%s1537_s0] ss:$16 sps:$4 sm:$0xff]  }
   0x2   :  { %113 = vmatprep.subr.bf16.mxu0 %v1102_v0  ;;  %v1107_v4 = vld [vmem:[%s1537_s0 + $0x8] ss:$16 sps:$4 sm:$0xff]   ;;  %154 = vmatprep.subr.bf16.mxu1 %v1104_v2  ;;  %v1108_v5 = vld [vmem:[%s1537_s0 + $0x24] ss:$16 sps:$4 sm:$0xff]   ;;  %v1110_v6 = vld [vmem:[%s1537_s0 + $0x2c] ss:$16 sps:$4 sm:$0xff]  }
   0x3   :  { %114 = vmatpush1.bf16.msra.mxu0 %v1106_v3  ;;  %155 = vmatpush1.bf16.msra.mxu1 %v1107_v4  ;;  %v1112_v7 = vld [vmem:[%s1537_s0 + $0x20] ss:$16 sps:$4 sm:$0xff]   ;;  %v1113_v8 = vld [vmem:[%s1537_s0 + $0x28] ss:$16 sps:$4 sm:$0xff]   ;;  %v1114_v9 = vld [vmem:[%s1537_s0 + $0x44] ss:$16 sps:$4 sm:$0xff]  }
   0x4   :  { %115 = vmatprep.subr.bf16.mxu0 %v1108_v5  ;;  %156 = vmatprep.subr.bf16.mxu1 %v1110_v6  ;;  %v1116_v10 = vld [vmem:[%s1537_s0 + $0x4c] ss:$16 sps:$4 sm:$0xff]   ;;  %v1118_v11 = vld [vmem:[%s1537_s0 + $0x40] ss:$16 sps:$4 sm:$0xff]   ;;  %v1119_v12 = vld [vmem:[%s1537_s0 + $0x48] ss:$16 sps:$4 sm:$0xff]  }
   0x5   :  { %v1120_v13 = vld [vmem:[%s1537_s0 + $0x64] ss:$16 sps:$4 sm:$0xff]   ;;  %v1122_v14 = vld [vmem:[%s1537_s0 + $0x6c] ss:$16 sps:$4 sm:$0xff]   ;;  %v1124_v15 = vld [vmem:[%s1537_s0 + $0x60] ss:$16 sps:$4 sm:$0xff]  }
   0x6   :  { %v1125_v16 = vld [vmem:[%s1537_s0 + $0x68] ss:$16 sps:$4 sm:$0xff]   ;;  %v1128_v17 = vld [vmem:[%s1537_s0 + $0x84] ss:$16 sps:$4 sm:$0xff]   ;;  %v1131_v18 = vld [vmem:[%s1537_s0 + $0x8c] ss:$16 sps:$4 sm:$0xff]  }
   0x7   :  { %116 = vmatpush1.bf16.msra.mxu0 %v1112_v7  ;;  %157 = vmatpush1.bf16.msra.mxu1 %v1113_v8  ;;  %v12_v19 = vld [vmem:[%s1538_s1] sm:$0x1]  ;;  %v1129_v21 = vld [vmem:[%s1537_s0 + $0x88] ss:$16 sps:$4 sm:$0xff]   ;;  %v1134_v22 = vld [vmem:[%s1537_s0 + $0xa4] ss:$16 sps:$4 sm:$0xff]  }
   0x8   :  { %117 = vmatprep.subr.bf16.mxu0 %v1114_v9  ;;  %158 = vmatprep.subr.bf16.mxu1 %v1116_v10  ;;  %v1126_v20 = vld [vmem:[%s1537_s0 + $0x80] ss:$16 sps:$4 sm:$0xff]   ;;  %v1137_v23 = vld [vmem:[%s1537_s0 + $0xac] ss:$16 sps:$4 sm:$0xff]   ;;  %v1135_v25 = vld [vmem:[%s1537_s0 + $0xa8] ss:$16 sps:$4 sm:$0xff]  }
   0x9   :  { %v1132_v24 = vld [vmem:[%s1537_s0 + $0xa0] ss:$16 sps:$4 sm:$0xff]   ;;  %v1140_v26 = vld [vmem:[%s1537_s0 + $0xc4] ss:$16 sps:$4 sm:$0xff]   ;;  %v1143_v27 = vld [vmem:[%s1537_s0 + $0xcc] ss:$16 sps:$4 sm:$0xff]  }
   0xa   :  { %v1138_v28 = vld [vmem:[%s1537_s0 + $0xc0] ss:$16 sps:$4 sm:$0xff]   ;;  %v1141_v29 = vld [vmem:[%s1537_s0 + $0xc8] ss:$16 sps:$4 sm:$0xff]   ;;  %v1146_v30 = vld [vmem:[%s1537_s0 + $0xe4] ss:$16 sps:$4 sm:$0xff]  }
   0xb   :  { %118 = vmatpush1.bf16.msra.mxu0 %v1118_v11  ;;  %159 = vmatpush1.bf16.msra.mxu1 %v1119_v12  ;;  %v1149_v31 = vld [vmem:[%s1537_s0 + $0xec] ss:$16 sps:$4 sm:$0xff]   ;;  %v1144_v32 = vld [vmem:[%s1537_s0 + $0xe0] ss:$16 sps:$4 sm:$0xff]   ;;  %v1147_v33 = vld [vmem:[%s1537_s0 + $0xe8] ss:$16 sps:$4 sm:$0xff]  }
   0xc   :  { %119 = vmatprep.subr.bf16.mxu0 %v1120_v13  ;;  %160 = vmatprep.subr.bf16.mxu1 %v1122_v14  ;;  %v1152_v34 = vld [vmem:[%s1537_s0 + $0x104] ss:$16 sps:$4 sm:$0xff]   ;;  %v1155_v35 = vld [vmem:[%s1537_s0 + $0x10c] ss:$16 sps:$4 sm:$0xff]   ;;  %v992_v36 = vld [vmem:[%s1538_s1 + $0x1] sm:$0x1] }
   0xd   :  { %v1150_v37 = vld [vmem:[%s1537_s0 + $0x100] ss:$16 sps:$4 sm:$0xff]   ;;  %v1153_v38 = vld [vmem:[%s1537_s0 + $0x108] ss:$16 sps:$4 sm:$0xff]   ;;  %v1158_v39 = vld [vmem:[%s1537_s0 + $0x124] ss:$16 sps:$4 sm:$0xff]  }
   0xe   :  { %v1161_v40 = vld [vmem:[%s1537_s0 + $0x12c] ss:$16 sps:$4 sm:$0xff]   ;;  %v1156_v41 = vld [vmem:[%s1537_s0 + $0x120] ss:$16 sps:$4 sm:$0xff]   ;;  %v1159_v42 = vld [vmem:[%s1537_s0 + $0x128] ss:$16 sps:$4 sm:$0xff]  }
   0xf   :  { %120 = vmatpush1.bf16.msra.mxu0 %v1124_v15  ;;  %161 = vmatpush1.bf16.msra.mxu1 %v1125_v16  ;;  %v1164_v43 = vld [vmem:[%s1537_s0 + $0x144] ss:$16 sps:$4 sm:$0xff]   ;;  %v1167_v44 = vld [vmem:[%s1537_s0 + $0x14c] ss:$16 sps:$4 sm:$0xff]   ;;  %v1162_v45 = vld [vmem:[%s1537_s0 + $0x140] ss:$16 sps:$4 sm:$0xff]  }
  0x10   :  { %355 = vmatprep.subr.bf16.mxu0 %v1128_v17  ;;  %396 = vmatprep.subr.bf16.mxu1 %v1131_v18  ;;  %v1165_v46 = vld [vmem:[%s1537_s0 + $0x148] ss:$16 sps:$4 sm:$0xff]   ;;  %v1170_v47 = vld [vmem:[%s1537_s0 + $0x164] ss:$16 sps:$4 sm:$0xff]   ;;  %v1173_v48 = vld [vmem:[%s1537_s0 + $0x16c] ss:$16 sps:$4 sm:$0xff]  }
  0x11   :  { %v1168_v49 = vld [vmem:[%s1537_s0 + $0x160] ss:$16 sps:$4 sm:$0xff]   ;;  %v1171_v50 = vld [vmem:[%s1537_s0 + $0x168] ss:$16 sps:$4 sm:$0xff]   ;;  %v1176_v51 = vld [vmem:[%s1537_s0 + $0x184] ss:$16 sps:$4 sm:$0xff]  }
  0x12   :  { %990 = vmatmul.mubr.msk.bf16.vlgmr.msra.gmra.mrb[0].mxu0 %vm109_vm0, %v12_v19  ;;  %991 = vmatmul.mubr.msk.bf16.vlgmr.msra.gmra.mrb[0].mxu1 %vm109_vm0, %v12_v19  ;;  %v1179_v52 = vld [vmem:[%s1537_s0 + $0x18c] ss:$16 sps:$4 sm:$0xff]   ;;  %v1028_v53 = vld [vmem:[%s1538_s1 + $0x2] sm:$0x1]  ;;  %v1177_v55 = vld [vmem:[%s1537_s0 + $0x188] ss:$16 sps:$4 sm:$0xff]  }
  0x13   :  { %356 = vmatpush1.bf16.msra.mxu0 %v1126_v20  ;;  %397 = vmatpush1.bf16.msra.mxu1 %v1129_v21  ;;  %v1174_v54 = vld [vmem:[%s1537_s0 + $0x180] ss:$16 sps:$4 sm:$0xff]   ;;  %v1182_v56 = vld [vmem:[%s1537_s0 + $0x1a4] ss:$16 sps:$4 sm:$0xff]   ;;  %v1185_v57 = vld [vmem:[%s1537_s0 + $0x1ac] ss:$16 sps:$4 sm:$0xff]  }
  0x14   :  { %357 = vmatprep.subr.bf16.mxu0 %v1134_v22  ;;  %398 = vmatprep.subr.bf16.mxu1 %v1137_v23  ;;  %v1180_v58 = vld [vmem:[%s1537_s0 + $0x1a0] ss:$16 sps:$4 sm:$0xff]   ;;  %v1183_v59 = vld [vmem:[%s1537_s0 + $0x1a8] ss:$16 sps:$4 sm:$0xff]   ;;  %v1188_v60 = vld [vmem:[%s1537_s0 + $0x1c4] ss:$16 sps:$4 sm:$0xff]  }
  0x15   :  { %387 = vmatprep.mubr.bf16.mxu0 %v1262_v1  ;;  %428 = vmatprep.mubr.bf16.mxu1 %v1262_v1  ;;  %v1191_v61 = vld [vmem:[%s1537_s0 + $0x1cc] ss:$16 sps:$4 sm:$0xff]   ;;  %v1186_v62 = vld [vmem:[%s1537_s0 + $0x1c0] ss:$16 sps:$4 sm:$0xff]   ;;  %v1189_v63 = vld [vmem:[%s1537_s0 + $0x1c8] ss:$16 sps:$4 sm:$0xff]  }
  0x16   :  { %v1194_v0 = vld [vmem:[%s1537_s0 + $0x1e4] ss:$16 sps:$4 sm:$0xff]   ;;  %v1192_v2 = vld [vmem:[%s1537_s0 + $0x1e0] ss:$16 sps:$4 sm:$0xff]   ;;  %v1195_v3 = vld [vmem:[%s1537_s0 + $0x1e8] ss:$16 sps:$4 sm:$0xff]  }
  0x17   :  { %358 = vmatpush1.bf16.msra.mxu0 %v1132_v24  ;;  %399 = vmatpush1.bf16.msra.mxu1 %v1135_v25  ;;  %v1064_v4 = vld [vmem:[%s1538_s1 + $0x3] sm:$0x1] }
  0x18   :  { %359 = vmatprep.subr.bf16.mxu0 %v1140_v26  ;;  %400 = vmatprep.subr.bf16.mxu1 %v1143_v27 }
  0x1b   :  { %360 = vmatpush1.bf16.msra.mxu0 %v1138_v28  ;;  %401 = vmatpush1.bf16.msra.mxu1 %v1141_v29 }
  0x1c   :  { %361 = vmatprep.subr.bf16.mxu0 %v1146_v30  ;;  %402 = vmatprep.subr.bf16.mxu1 %v1149_v31 }
  0x1f   :  { %362 = vmatpush1.bf16.msra.mxu0 %v1144_v32  ;;  %403 = vmatpush1.bf16.msra.mxu1 %v1147_v33 }
  0x20   :  { %594 = vmatprep.subr.bf16.mxu0 %v1152_v34  ;;  %635 = vmatprep.subr.bf16.mxu1 %v1155_v35 }
  0x22   :  { %1025 = vmatmul.mubr.msk.bf16.vlgmr.msra.gmra.mrb[4].mxu0 %vm109_vm0, %v992_v36  ;;  %1026 = vmatmul.mubr.msk.bf16.vlgmr.msra.gmra.mrb[4].mxu1 %vm109_vm0, %v992_v36 }
  0x23   :  { %595 = vmatpush1.bf16.msra.mxu0 %v1150_v37  ;;  %636 = vmatpush1.bf16.msra.mxu1 %v1153_v38 }
  0x24   :  { %596 = vmatprep.subr.bf16.mxu0 %v1158_v39  ;;  %637 = vmatprep.subr.bf16.mxu1 %v1161_v40 }
  0x25   :  { %626 = vmatprep.mubr.bf16.mxu0 %v1262_v1  ;;  %667 = vmatprep.mubr.bf16.mxu1 %v1262_v1 }
  0x27   :  { %597 = vmatpush1.bf16.msra.mxu0 %v1156_v41  ;;  %638 = vmatpush1.bf16.msra.mxu1 %v1159_v42 }
  0x28   :  { %598 = vmatprep.subr.bf16.mxu0 %v1164_v43  ;;  %639 = vmatprep.subr.bf16.mxu1 %v1167_v44  ;;  %v1263_v44 = vmov 1966171168  }
  0x2b   :  { %599 = vmatpush1.bf16.msra.mxu0 %v1162_v45  ;;  %640 = vmatpush1.bf16.msra.mxu1 %v1165_v46  ;;  %v226_v45 = vunpack.c.l.s4 %v1263_v44  ;;  %v228_v46 = vlaneseq }
  0x2c   :  { %600 = vmatprep.subr.bf16.mxu0 %v1170_v47  ;;  %641 = vmatprep.subr.bf16.mxu1 %v1173_v48 }
  0x2d   :  { %v227_v48 = vunpack.c.0.s8 %v226_v45  ;;  %vm1503_vm1 = vcmp.lt.s32.totalorder %v228_v46, 392 }
  0x2f   :  { %601 = vmatpush1.bf16.msra.mxu0 %v1168_v49  ;;  %642 = vmatpush1.bf16.msra.mxu1 %v1171_v50  ;;  %v229_v49 = vshrl.u32 %v228_v46, 7 }
  0x30   :  { %833 = vmatprep.subr.bf16.mxu0 %v1176_v51  ;;  %874 = vmatprep.subr.bf16.mxu1 %v1179_v52 }
  0x31   :  { %v1499_v52 = vsub.s32 %v227_v48, %v229_v49 }
  0x32   :  { %1061 = vmatmul.mubr.msk.bf16.vlgmr.msra.gmra.mrb[8].mxu0 %vm109_vm0, %v1028_v53  ;;  %1062 = vmatmul.mubr.msk.bf16.vlgmr.msra.gmra.mrb[8].mxu1 %vm109_vm0, %v1028_v53 }
  0x33   :  { %834 = vmatpush1.bf16.msra.mxu0 %v1174_v54  ;;  %875 = vmatpush1.bf16.msra.mxu1 %v1177_v55 }
  0x34   :  { %835 = vmatprep.subr.bf16.mxu0 %v1182_v56  ;;  %876 = vmatprep.subr.bf16.mxu1 %v1185_v57 }
  0x35   :  { %865 = vmatprep.mubr.bf16.mxu0 %v1262_v1  ;;  %906 = vmatprep.mubr.bf16.mxu1 %v1262_v1  ;;  %v1197_v1 = vld [vmem:[%s1537_s0 + $0x1ec] ss:$16 sps:$4 sm:$0xff]  }
  0x37   :  { %836 = vmatpush1.bf16.msra.mxu0 %v1180_v58  ;;  %877 = vmatpush1.bf16.msra.mxu1 %v1183_v59 }
  0x38   :  { %837 = vmatprep.subr.bf16.mxu0 %v1188_v60  ;;  %878 = vmatprep.subr.bf16.mxu1 %v1191_v61 }
  0x3b   :  { %838 = vmatpush1.bf16.msra.mxu0 %v1186_v62  ;;  %879 = vmatpush1.bf16.msra.mxu1 %v1189_v63 }
  0x3c   :  { %839 = vmatprep.subr.bf16.mxu0 %v1194_v0  ;;  %880 = vmatprep.subr.bf16.mxu1 %v1197_v1 }
  0x3f   :  { %840 = vmatpush1.bf16.msra.mxu0 %v1192_v2  ;;  %881 = vmatpush1.bf16.msra.mxu1 %v1195_v3 }
  0x42   :  { %1097 = vmatmul.mubr.msk.bf16.vlgmr.msra.gmra.mrb[12].mxu0 %vm109_vm0, %v1064_v4  ;;  %1098 = vmatmul.mubr.msk.bf16.vlgmr.msra.gmra.mrb[12].mxu1 %vm109_vm0, %v1064_v4 }
  0xe5   :  { %v147_v5 = vpop.f32.mrb[0].mxu0  ;;  %v188_v6 = vpop.f32.mrb[0].mxu1 }
  0xe6   :  { %v195_v7 = vsub.f32 0.0, %v147_v5  ;;  %v197_v8 = vsub.f32 0.0, %v188_v6  ;;  %v149_v9 = vpop.f32.mrb[1].mxu0  ;;  %v190_v10 = vpop.f32.mrb[1].mxu1 }
  0xe7   :  { %v196_v11 = vsub.f32 0.0, %v149_v9  ;;  %v198_v12 = vsub.f32 0.0, %v190_v10  ;;  %v151_v13 = vpop.f32.mrb[2].mxu0  ;;  %v192_v14 = vpop.f32.mrb[2].mxu1 }
  0xe8   :  { %v199_v15 = vmul.f32 1.442695, %v195_v7  ;;  %v203_v16 = vmul.f32 1.442695, %v197_v8  ;;  %v152_v17 = vpop.f32.mrb[3].mxu0  ;;  %v193_v18 = vpop.f32.mrb[3].mxu1 }
  0xe9   :  { %v201_v19 = vmul.f32 1.442695, %v196_v11  ;;  %v205_v20 = vmul.f32 1.442695, %v198_v12 }
  0xea   :  { %1198 = vpow2.f32 %v199_v15 }
  0xeb   :  { %1200 = vpow2.f32 %v203_v16 }
  0xec   :  { %1202 = vpow2.f32 %v201_v19 }
  0xed   :  { %1204 = vpow2.f32 %v205_v20 }
  0xf4   :  { %v1199_v21 = vpop.eup %1198 }
  0xf5   :  { %v1201_v22 = vpop.eup %1200  ;;  %v207_v23 = vadd.f32 1.0, %v1199_v21  ;;  %v389_v24 = vpop.f32.mrb[4].mxu0 }
  0xf6   :  { %v430_v25 = vpop.f32.mrb[4].mxu1  ;;  %v1203_v26 = vpop.eup %1202  ;;  %v209_v27 = vadd.f32 1.0, %v1201_v22  ;;  %v437_v28 = vsub.f32 0.0, %v389_v24 }
  0xf7   :  { %v439_v29 = vsub.f32 0.0, %v430_v25  ;;  %v391_v30 = vpop.f32.mrb[5].mxu0  ;;  %v432_v31 = vpop.f32.mrb[5].mxu1  ;;  %1206 = vrcp.f32 %v207_v23  ;;  %v208_v33 = vadd.f32 1.0, %v1203_v26 }
  0xf8   :  { %v1205_v32 = vpop.eup %1204  ;;  %v438_v34 = vsub.f32 0.0, %v391_v30  ;;  %v440_v35 = vsub.f32 0.0, %v432_v31  ;;  %v393_v36 = vpop.f32.mrb[6].mxu0  ;;  %1208 = vrcp.f32 %v209_v27  ;;  %v441_v39 = vmul.f32 1.442695, %v437_v28 }
  0xf9   :  { %v434_v37 = vpop.f32.mrb[6].mxu1  ;;  %v210_v38 = vadd.f32 1.0, %v1205_v32  ;;  %v445_v40 = vmul.f32 1.442695, %v439_v29  ;;  %v394_v41 = vpop.f32.mrb[7].mxu0  ;;  %1210 = vrcp.f32 %v208_v33 }
  0xfa   :  { %v443_v42 = vmul.f32 1.442695, %v438_v34  ;;  %v435_v43 = vpop.f32.mrb[7].mxu1  ;;  %v447_v47 = vmul.f32 1.442695, %v440_v35 }
  0xfb   :  { %1212 = vrcp.f32 %v210_v38 }
  0xfc   :  { %1214 = vpow2.f32 %v441_v39 }
  0xfd   :  { %1216 = vpow2.f32 %v445_v40 }
  0xfe   :  { %1218 = vpow2.f32 %v443_v42 }
  0xff   :  { %1220 = vpow2.f32 %v447_v47 }
 0x101   :  { %v1207_v50 = vpop.eup %1206 }
 0x102   :  { %v1209_v51 = vpop.eup %1208 }
 0x103   :  { %v1211_v53 = vpop.eup %1210 }
 0x104   :  { %v223_v55 = vcombine.low %v1207_v50, %v1211_v53 }
 0x105   :  { %v1213_v54 = vpop.eup %1212  ;;  %v628_v58 = vpop.f32.mrb[8].mxu0 }
 0x106   :  { %v1215_v56 = vpop.eup %1214  ;;  %v224_v57 = vcombine.low %v1209_v51, %v1213_v54  ;;  %v669_v59 = vpop.f32.mrb[8].mxu1  ;;  %v231_v61 = vrot.slane %v223_v55, %v1499_v52  ;;  %v676_v63 = vsub.f32 0.0, %v628_v58 }
 0x107   :  { %v1217_v60 = vpop.eup %1216  ;;  %v449_v62 = vadd.f32 1.0, %v1215_v56  ;;  %v678_v0 = vsub.f32 0.0, %v669_v59  ;;  %v630_v1 = vpop.f32.mrb[9].mxu0 }
 0x108   :  { %v671_v2 = vpop.f32.mrb[9].mxu1  ;;  %v1219_v3 = vpop.eup %1218  ;;  %v238_v4 = vrot.slane %v224_v57, %v1499_v52  ;;  %v451_v5 = vadd.f32 1.0, %v1217_v60  ;;  %v677_v6 = vsub.f32 0.0, %v630_v1  ;;  %v680_v12 = vmul.f32 1.442695, %v676_v63 }
 0x109   :  { %v679_v7 = vsub.f32 0.0, %v671_v2  ;;  %v632_v8 = vpop.f32.mrb[10].mxu0  ;;  %v673_v9 = vpop.f32.mrb[10].mxu1  ;;  %1222 = vrcp.f32 %v449_v62  ;;  %v450_v11 = vadd.f32 1.0, %v1219_v3  ;;  %v684_v16 = vmul.f32 1.442695, %v678_v0 }
 0x10a   :  { %v1221_v10 = vpop.eup %1220  ;;  %v633_v13 = vpop.f32.mrb[11].mxu0  ;;  %v239_v14 = vcombine.low %v231_v61, %v238_v4  ;;  %1224 = vrcp.f32 %v451_v5  ;;  %v682_v19 = vmul.f32 1.442695, %v677_v6 }
 0x10b   :  { %v452_v15 = vadd.f32 1.0, %v1221_v10  ;;  %v674_v17 = vpop.f32.mrb[11].mxu1  ;;  %1226 = vrcp.f32 %v450_v11  ;;  %v686_v21 = vmul.f32 1.442695, %v679_v7 }
 0x10c   :  { %v246_v20 = vrot.slane %v239_v14, %v1499_v52 }
 0x10d   :  { %1228 = vrcp.f32 %v452_v15 }
 0x10e   :  { %1230 = vpow2.f32 %v680_v12  ;;  %252 = vst.msk [vmem:[%s1539_s2] sm:$0xf] %vm1503_vm1, %v246_v20 }
 0x10f   :  { %1232 = vpow2.f32 %v684_v16 }
 0x110   :  { %1234 = vpow2.f32 %v682_v19 }
 0x111   :  { %1236 = vpow2.f32 %v686_v21 }
 0x113   :  { %v1223_v22 = vpop.eup %1222 }
 0x114   :  { %v1225_v23 = vpop.eup %1224 }
 0x115   :  { %v1227_v24 = vpop.eup %1226  ;;  %v867_v27 = vpop.f32.mrb[12].mxu0 }
 0x116   :  { %v465_v26 = vcombine.low %v1223_v22, %v1227_v24  ;;  %v908_v28 = vpop.f32.mrb[12].mxu1  ;;  %v915_v31 = vsub.f32 0.0, %v867_v27  ;;  %v869_v33 = vpop.f32.mrb[13].mxu0 }
 0x117   :  { %v1229_v25 = vpop.eup %1228  ;;  %v917_v32 = vsub.f32 0.0, %v908_v28  ;;  %v910_v34 = vpop.f32.mrb[13].mxu1  ;;  %v916_v38 = vsub.f32 0.0, %v869_v33 }
 0x118   :  { %v1231_v29 = vpop.eup %1230  ;;  %v466_v30 = vcombine.low %v1225_v23, %v1229_v25  ;;  %v473_v36 = vrot.slane %v465_v26, %v1499_v52  ;;  %v871_v39 = vpop.f32.mrb[14].mxu0  ;;  %v918_v44 = vsub.f32 0.0, %v910_v34  ;;  %v919_v48 = vmul.f32 1.442695, %v915_v31 }
 0x119   :  { %v1233_v35 = vpop.eup %1232  ;;  %v688_v37 = vadd.f32 1.0, %v1231_v29  ;;  %v912_v40 = vpop.f32.mrb[14].mxu1  ;;  %v923_v53 = vmul.f32 1.442695, %v917_v32  ;;  %v921_v54 = vmul.f32 1.442695, %v916_v38 }
 0x11a   :  { %v1235_v41 = vpop.eup %1234  ;;  %v480_v42 = vrot.slane %v466_v30, %v1499_v52  ;;  %v690_v43 = vadd.f32 1.0, %v1233_v35  ;;  %v872_v45 = vpop.f32.mrb[15].mxu0  ;;  %v925_v56 = vmul.f32 1.442695, %v918_v44 }
 0x11b   :  { %v1237_v46 = vpop.eup %1236  ;;  %1238 = vrcp.f32 %v688_v37  ;;  %v689_v47 = vadd.f32 1.0, %v1235_v41  ;;  %v913_v49 = vpop.f32.mrb[15].mxu1 }
 0x11c   :  { %v481_v50 = vcombine.low %v473_v36, %v480_v42  ;;  %1240 = vrcp.f32 %v690_v43  ;;  %v691_v51 = vadd.f32 1.0, %v1237_v46 }
 0x11d   :  { %1242 = vrcp.f32 %v689_v47 }
 0x11e   :  { %v488_v55 = vrot.slane %v481_v50, %v1499_v52  ;;  %1244 = vrcp.f32 %v691_v51 }
 0x11f   :  { %1246 = vpow2.f32 %v919_v48 }
 0x120   :  { %1027 = vst.msk [vmem:[%s1539_s2 + $0x4] sm:$0xf] %vm1503_vm1, %v488_v55  ;;  %1248 = vpow2.f32 %v923_v53 }
 0x121   :  { %1250 = vpow2.f32 %v921_v54 }
 0x122   :  { %1252 = vpow2.f32 %v925_v56 }
 0x125   :  { %v1239_v57 = vpop.eup %1238 }
 0x126   :  { %v1241_v58 = vpop.eup %1240 }
 0x127   :  { %v1243_v59 = vpop.eup %1242 }
 0x128   :  { %v1245_v60 = vpop.eup %1244  ;;  %v704_v61 = vcombine.low %v1239_v57, %v1243_v59 }
 0x129   :  { %v1247_v62 = vpop.eup %1246  ;;  %v705_v63 = vcombine.low %v1241_v58, %v1245_v60 }
 0x12a   :  { %v1249_v0 = vpop.eup %1248  ;;  %v712_v1 = vrot.slane %v704_v61, %v1499_v52  ;;  %v927_v2 = vadd.f32 1.0, %v1247_v62 }
 0x12b   :  { %v1251_v3 = vpop.eup %1250  ;;  %v719_v4 = vrot.slane %v705_v63, %v1499_v52  ;;  %v929_v5 = vadd.f32 1.0, %v1249_v0 }
 0x12c   :  { %v1253_v6 = vpop.eup %1252  ;;  %1254 = vrcp.f32 %v927_v2  ;;  %v928_v7 = vadd.f32 1.0, %v1251_v3 }
 0x12d   :  { %v720_v8 = vcombine.low %v712_v1, %v719_v4  ;;  %1256 = vrcp.f32 %v929_v5  ;;  %v930_v9 = vadd.f32 1.0, %v1253_v6 }
 0x12e   :  { %1258 = vrcp.f32 %v928_v7 }
 0x12f   :  { %v727_v10 = vrot.slane %v720_v8, %v1499_v52  ;;  %1260 = vrcp.f32 %v930_v9 }
 0x131   :  { %1063 = vst.msk [vmem:[%s1539_s2 + $0x8] sm:$0xf] %vm1503_vm1, %v727_v10 }
 0x136   :  { %v1255_v11 = vpop.eup %1254 }
 0x137   :  { %v1257_v12 = vpop.eup %1256 }
 0x138   :  { %v1259_v13 = vpop.eup %1258 }
 0x139   :  { %v1261_v14 = vpop.eup %1260  ;;  %v943_v15 = vcombine.low %v1255_v11, %v1259_v13 }
 0x13a   :  { %v944_v16 = vcombine.low %v1257_v12, %v1261_v14 }
 0x13b   :  { %v951_v17 = vrot.slane %v943_v15, %v1499_v52 }
 0x13c   :  { %v958_v19 = vrot.slane %v944_v16, %v1499_v52 }
 0x13e   :  { %v959_v20 = vcombine.low %v951_v17, %v958_v19 }
 0x140   :  { %v966_v21 = vrot.slane %v959_v20, %v1499_v52 }
 0x142   :  { %1099 = vst.msk [vmem:[%s1539_s2 + $0xc] sm:$0xf] %vm1503_vm1, %v966_v21 }

</bundles_post_ra>
